<compile_context>
chip_gen: v6e
topology: v6e:2x2x1
jax: 0.10.0
libtpu: 0.0.40
codegen_flags: <defaults>
</compile_context>

<pallas_src>
import functools

import jax
import jax.numpy as jnp
from jax import lax
from jax.experimental import pallas as pl
from jax.experimental.pallas import tpu as pltpu


def topic_rnn_kernel(n_real,
                     x_ref, mask_ref,
                     wih_f_ref, whh_f_ref, b_f_ref,
                     wih_b_ref, whh_b_ref, b_b_ref,
                     wout_f_ref, wout_b_ref, bout_ref,
                     out_ref,
                     gir_f_ref, giz_f_ref, gin_f_ref,
                     gir_b_ref, giz_b_ref, gin_b_ref,
                     yf_ref, yb_ref):
    L, Np, E = x_ref.shape
    H = whh_f_ref.shape[-1]

    # ---- Hoisted input projection: one big MXU matmul per gate & direction ----
    # (removed from the serial chain; biases folded in once).
    x2 = x_ref[...].reshape(L * Np, E)          # Np is a multiple of 8 -> tile-aligned reshape

    def proj(wih_ref, b_ref, gate, dst_ref):
        dst_ref[...] = (jnp.dot(x2, wih_ref[gate], preferred_element_type=jnp.float32)
                        + b_ref[gate]).reshape(L, Np, H)

    proj(wih_f_ref, b_f_ref, 0, gir_f_ref)
    proj(wih_f_ref, b_f_ref, 1, giz_f_ref)
    proj(wih_f_ref, b_f_ref, 2, gin_f_ref)
    proj(wih_b_ref, b_b_ref, 0, gir_b_ref)
    proj(wih_b_ref, b_b_ref, 1, giz_b_ref)
    proj(wih_b_ref, b_b_ref, 2, gin_b_ref)

    # Hoisted loads / broadcasts (outside the unrolled loop).
    whr_f, whz_f, whn_f = whh_f_ref[0], whh_f_ref[1], whh_f_ref[2]
    whr_b, whz_b, whn_b = whh_b_ref[0], whh_b_ref[1], whh_b_ref[2]
    bhn_f = jnp.broadcast_to(b_f_ref[3], (Np, H))   # b_hh_n (needed inside r*(...))
    bhn_b = jnp.broadcast_to(b_b_ref[3], (Np, H))

    h0 = jnp.zeros((Np, H), jnp.float32)

    def cell(h, gi_r, gi_z, gi_n, whr, whz, whn, bhn):
        # PyTorch GRU: r = s(gi_r + h@Whr), z = s(gi_z + h@Whz),
        #              n = tanh(gi_n + r*(h@Whn + b_hh_n)), h' = (1-z)*n + z*h
        gh_r = jnp.dot(h, whr, preferred_element_type=jnp.float32)
        gh_z = jnp.dot(h, whz, preferred_element_type=jnp.float32)
        gh_n = jnp.dot(h, whn, preferred_element_type=jnp.float32)
        r = jax.nn.sigmoid(gi_r + gh_r)
        z = jax.nn.sigmoid(gi_z + gh_z)
        n = jnp.tanh(gi_n + r * (gh_n + bhn))
        return n + z * (h - n)

    # ---- Fused forward + backward recurrence (two independent chains -> ILP) ----
    def step(t, carry):
        h_f, h_b = carry
        tb = L - 1 - t
        h_f = cell(h_f, gir_f_ref[t], giz_f_ref[t], gin_f_ref[t],
                   whr_f, whz_f, whn_f, bhn_f)
        h_b = cell(h_b, gir_b_ref[tb], giz_b_ref[tb], gin_b_ref[tb],
                   whr_b, whz_b, whn_b, bhn_b)
        yf_ref[t] = h_f
        yb_ref[tb] = h_b
        return (h_f, h_b)

    lax.fori_loop(0, L, step, (h0, h0), unroll=True)

    # ---- mask -> Linear (split weights, no lane concat) -> max over batch ----
    yf = (yf_ref[...] * mask_ref[...]).reshape(L * Np, H)
    yb = (yb_ref[...] * mask_ref[...]).reshape(L * Np, H)
    y2 = (jnp.dot(yf, wout_f_ref[...], preferred_element_type=jnp.float32)
          + jnp.dot(yb, wout_b_ref[...], preferred_element_type=jnp.float32)
          + bout_ref[...]).reshape(L, Np, E)
    # TODO(synk): nn.Dropout treated as identity (eval mode); training-mode dropout would need pltpu PRNG.
    # Exclude padded batch rows from the max (they hold only b_out after masking).
    valid = lax.broadcasted_iota(jnp.int32, (1, Np, 1), 1) < n_real
    y2 = jnp.where(valid, y2, jnp.finfo(jnp.float32).min)
    out_ref[...] = jnp.max(y2, axis=1)          # torch.max(y, dim=1).values


def topic_rnn_forward(token_ids, mask, params):
    emb = params["embedding"][token_ids].astype(jnp.float32)   # embedding gather = glue, plain JAX
    L, N, E = emb.shape
    H = E

    # Pad batch to a multiple of 8 sublanes (fills vregs, unmasked loads/stores,
    # better MXU row occupancy). Padded rows are masked out of the max in-kernel.
    Np = max(8, ((N + 7) // 8) * 8)
    if Np != N:
        emb = jnp.pad(emb, ((0, 0), (0, Np - N), (0, 0)))
        mask = jnp.pad(mask, ((0, 0), (0, Np - N), (0, 0)))
    mask = mask.astype(jnp.float32)

    # Per-gate weight split + bias folding (free, plain JAX; avoids in-kernel lane slices).
    def split3(a):
        return a[..., 0:H], a[..., H:2 * H], a[..., 2 * H:3 * H]

    def pack_dir(w_ih, w_hh, b_ih, b_hh):
        wir, wiz, win = split3(w_ih)
        whr, whz, whn = split3(w_hh)
        bir, biz, bin_ = split3(b_ih)
        bhr, bhz, bhn = split3(b_hh)
        wih = jnp.stack([wir, wiz, win])                      # (3, E, H)
        whh = jnp.stack([whr, whz, whn])                      # (3, H, H)
        # rows: r-gate total bias, z-gate total bias, n-gate input bias, n-gate hidden bias
        b = jnp.stack([bir + bhr, biz + bhz, bin_, bhn])      # (4, 1, H)
        return wih, whh, b

    wih_f, whh_f, b_f = pack_dir(params["w_ih_f"], params["w_hh_f"],
                                 params["b_ih_f"], params["b_hh_f"])
    wih_b, whh_b, b_b = pack_dir(params["w_ih_b"], params["w_hh_b"],
                                 params["b_ih_b"], params["b_hh_b"])
    wout_f = params["w_out"][:H]          # (H, E) — forward half of Linear(2E -> E)
    wout_b = params["w_out"][H:]          # (H, E) — backward half
    b_out = params["b_out"]               # (1, E)

    args = (emb, mask, wih_f, whh_f, b_f, wih_b, whh_b, b_b, wout_f, wout_b, b_out)
    vmem = lambda: pl.BlockSpec(memory_space=pltpu.MemorySpace.VMEM)

    return pl.pallas_call(
        functools.partial(topic_rnn_kernel, N),
        out_shape=jax.ShapeDtypeStruct((L, E), jnp.float32),
        in_specs=[vmem() for _ in args],
        out_specs=vmem(),
        scratch_shapes=[pltpu.VMEM((L, Np, H), jnp.float32) for _ in range(8)],
        compiler_params=pltpu.CompilerParams(vmem_limit_bytes=32 * 1024 * 1024),
    )(*args)


def init_params(key, num_words, E):
    H = E
    k = 1.0 / float(jnp.sqrt(jnp.float32(H)))
    keys = jax.random.split(key, 11)
    u = lambda kk, shape: jax.random.uniform(kk, shape, jnp.float32, -k, k)
    return dict(
        embedding=jax.random.normal(keys[0], (num_words, E), jnp.float32),
        # GRU weights stored transposed relative to PyTorch: (in, 3H), gate order r|z|n
        w_ih_f=u(keys[1], (E, 3 * H)),
        w_hh_f=u(keys[2], (H, 3 * H)),
        b_ih_f=u(keys[3], (1, 3 * H)),
        b_hh_f=u(keys[4], (1, 3 * H)),
        w_ih_b=u(keys[5], (E, 3 * H)),
        w_hh_b=u(keys[6], (H, 3 * H)),
        b_ih_b=u(keys[7], (1, 3 * H)),
        b_hh_b=u(keys[8], (1, 3 * H)),
        # Linear(2E -> E): weight stored transposed (2H, E)
        w_out=u(keys[9], (2 * H, E)),
        b_out=u(keys[10], (1, E)),
    )


def reference_forward(token_ids, mask, params):
    """Pure-JAX reference mirroring PyTorch semantics (eval mode)."""
    emb = params["embedding"][token_ids]
    L, N, E = emb.shape
    H = E

    def cell(x_t, h, w_ih, w_hh, b_ih, b_hh):
        gi = x_t @ w_ih + b_ih
        gh = h @ w_hh + b_hh
        i_r, i_z, i_n = jnp.split(gi, 3, axis=-1)
        h_r, h_z, h_n = jnp.split(gh, 3, axis=-1)
        r = jax.nn.sigmoid(i_r + h_r)
        z = jax.nn.sigmoid(i_z + h_z)
        n = jnp.tanh(i_n + r * h_n)
        return (1.0 - z) * n + z * h

    h = jnp.zeros((N, H), jnp.float32)
    yf = []
    for t in range(L):
        h = cell(emb[t], h, params["w_ih_f"], params["w_hh_f"], params["b_ih_f"], params["b_hh_f"])
        yf.append(h)
    h = jnp.zeros((N, H), jnp.float32)
    yb = [None] * L
    for t in range(L - 1, -1, -1):
        h = cell(emb[t], h, params["w_ih_b"], params["w_hh_b"], params["b_ih_b"], params["b_hh_b"])
        yb[t] = h
    y = jnp.concatenate([jnp.stack(yf), jnp.stack(yb)], axis=-1)    # (L, N, 2H)
    y = y * mask
    y = y @ params["w_out"] + params["b_out"]                       # (L, N, E)
    return jnp.max(y, axis=1)                                       # (L, E)


if __name__ == "__main__":
    L, N, E, num_words = 8, 4, 32, 50
    key = jax.random.PRNGKey(0)
    pkey, ikey, mkey = jax.random.split(key, 3)

    params = init_params(pkey, num_words, E)
    token_ids = jax.random.randint(ikey, (L, N), 0, num_words)
    mask = (jax.random.uniform(mkey, (L, N, 1)) > 0.2).astype(jnp.float32)

    out = topic_rnn_forward(token_ids, mask, params)
    out = jax.block_until_ready(out)
    assert out.shape == (L, E), out.shape

    ref = reference_forward(token_ids, mask, params)
    if not jnp.allclose(out, ref, atol=2e-2, rtol=2e-2):
        raise AssertionError("Pallas kernel output mismatch vs JAX reference")

    print("KERNEL_OK")
</pallas_src>

<mosaic_0001>
module attributes {stable_mosaic.version = 11 : i64} {
  func.func @topic_rnn_kernel(%arg0: memref<8x8x32xf32, #tpu.memory_space<vmem>>, %arg1: memref<8x8x1xf32, #tpu.memory_space<vmem>>, %arg2: memref<3x32x32xf32, #tpu.memory_space<vmem>>, %arg3: memref<3x32x32xf32, #tpu.memory_space<vmem>>, %arg4: memref<4x1x32xf32, #tpu.memory_space<vmem>>, %arg5: memref<3x32x32xf32, #tpu.memory_space<vmem>>, %arg6: memref<3x32x32xf32, #tpu.memory_space<vmem>>, %arg7: memref<4x1x32xf32, #tpu.memory_space<vmem>>, %arg8: memref<32x32xf32, #tpu.memory_space<vmem>>, %arg9: memref<32x32xf32, #tpu.memory_space<vmem>>, %arg10: memref<1x32xf32, #tpu.memory_space<vmem>>, %arg11: memref<8x32xf32, #tpu.memory_space<vmem>>, %arg12: memref<8x8x32xf32, #tpu.memory_space<vmem>>, %arg13: memref<8x8x32xf32, #tpu.memory_space<vmem>>, %arg14: memref<8x8x32xf32, #tpu.memory_space<vmem>>, %arg15: memref<8x8x32xf32, #tpu.memory_space<vmem>>, %arg16: memref<8x8x32xf32, #tpu.memory_space<vmem>>, %arg17: memref<8x8x32xf32, #tpu.memory_space<vmem>>, %arg18: memref<8x8x32xf32, #tpu.memory_space<vmem>>, %arg19: memref<8x8x32xf32, #tpu.memory_space<vmem>>) attributes {dimension_semantics = [], scalar_prefetch = 0 : i64, scratch_operands = 8 : i64, tpu.core_type = #tpu.core_type<tc>} {
    %c0 = arith.constant 0 : index
    %c0_0 = arith.constant 0 : index
    %c0_1 = arith.constant 0 : index
    %0 = vector.load %arg0[%c0, %c0_0, %c0_1] : memref<8x8x32xf32, #tpu.memory_space<vmem>>, vector<8x8x32xf32>
    %1 = vector.shape_cast %0 : vector<8x8x32xf32> to vector<64x32xf32>
    %c0_2 = arith.constant 0 : index
    %c0_3 = arith.constant 0 : index
    %c0_4 = arith.constant 0 : index
    %2 = vector.load %arg2[%c0_2, %c0_3, %c0_4] : memref<3x32x32xf32, #tpu.memory_space<vmem>>, vector<1x32x32xf32>
    %3 = vector.shape_cast %2 : vector<1x32x32xf32> to vector<32x32xf32>
    %cst = arith.constant dense<0.000000e+00> : vector<64x32xf32>
    %4 = tpu.matmul %1, %3, %cst {dimension_numbers = #tpu.dot_dimension_numbers<[1], [0], [0], [1], [0, 0, 1, 1], [], []>} : vector<64x32xf32>, vector<32x32xf32>, vector<64x32xf32> -> vector<64x32xf32>
    %c0_5 = arith.constant 0 : index
    %c0_6 = arith.constant 0 : index
    %c0_7 = arith.constant 0 : index
    %5 = vector.load %arg4[%c0_5, %c0_6, %c0_7] : memref<4x1x32xf32, #tpu.memory_space<vmem>>, vector<1x1x32xf32>
    %6 = vector.shape_cast %5 : vector<1x1x32xf32> to vector<1x32xf32>
    %7 = vector.broadcast %6 : vector<1x32xf32> to vector<64x32xf32>
    %8 = arith.addf %4, %7 : vector<64x32xf32>
    %9 = vector.shape_cast %8 : vector<64x32xf32> to vector<8x8x32xf32>
    %c0_8 = arith.constant 0 : index
    %c0_9 = arith.constant 0 : index
    %c0_10 = arith.constant 0 : index
    %10 = vector.load %arg12[%c0_8, %c0_9, %c0_10] : memref<8x8x32xf32, #tpu.memory_space<vmem>>, vector<8x8x32xf32>
    tpu.vector_store %arg12[%c0_8, %c0_9, %c0_10], %9 {strides = array<i32>} : memref<8x8x32xf32, #tpu.memory_space<vmem>>, vector<8x8x32xf32>,
    %c1 = arith.constant 1 : index
    %c0_11 = arith.constant 0 : index
    %c0_12 = arith.constant 0 : index
    %11 = vector.load %arg2[%c1, %c0_11, %c0_12] : memref<3x32x32xf32, #tpu.memory_space<vmem>>, vector<1x32x32xf32>
    %12 = vector.shape_cast %11 : vector<1x32x32xf32> to vector<32x32xf32>
    %cst_13 = arith.constant dense<0.000000e+00> : vector<64x32xf32>
    %13 = tpu.matmul %1, %12, %cst_13 {dimension_numbers = #tpu.dot_dimension_numbers<[1], [0], [0], [1], [0, 0, 1, 1], [], []>} : vector<64x32xf32>, vector<32x32xf32>, vector<64x32xf32> -> vector<64x32xf32>
    %c1_14 = arith.constant 1 : index
    %c0_15 = arith.constant 0 : index
    %c0_16 = arith.constant 0 : index
    %14 = vector.load %arg4[%c1_14, %c0_15, %c0_16] : memref<4x1x32xf32, #tpu.memory_space<vmem>>, vector<1x1x32xf32>
    %15 = vector.shape_cast %14 : vector<1x1x32xf32> to vector<1x32xf32>
    %16 = vector.broadcast %15 : vector<1x32xf32> to vector<64x32xf32>
    %17 = arith.addf %13, %16 : vector<64x32xf32>
    %18 = vector.shape_cast %17 : vector<64x32xf32> to vector<8x8x32xf32>
    %c0_17 = arith.constant 0 : index
    %c0_18 = arith.constant 0 : index
    %c0_19 = arith.constant 0 : index
    %19 = vector.load %arg13[%c0_17, %c0_18, %c0_19] : memref<8x8x32xf32, #tpu.memory_space<vmem>>, vector<8x8x32xf32>
    tpu.vector_store %arg13[%c0_17, %c0_18, %c0_19], %18 {strides = array<i32>} : memref<8x8x32xf32, #tpu.memory_space<vmem>>, vector<8x8x32xf32>,
    %c2 = arith.constant 2 : index
    %c0_20 = arith.constant 0 : index
    %c0_21 = arith.constant 0 : index
    %20 = vector.load %arg2[%c2, %c0_20, %c0_21] : memref<3x32x32xf32, #tpu.memory_space<vmem>>, vector<1x32x32xf32>
    %21 = vector.shape_cast %20 : vector<1x32x32xf32> to vector<32x32xf32>
    %cst_22 = arith.constant dense<0.000000e+00> : vector<64x32xf32>
    %22 = tpu.matmul %1, %21, %cst_22 {dimension_numbers = #tpu.dot_dimension_numbers<[1], [0], [0], [1], [0, 0, 1, 1], [], []>} : vector<64x32xf32>, vector<32x32xf32>, vector<64x32xf32> -> vector<64x32xf32>
    %c2_23 = arith.constant 2 : index
    %c0_24 = arith.constant 0 : index
    %c0_25 = arith.constant 0 : index
    %23 = vector.load %arg4[%c2_23, %c0_24, %c0_25] : memref<4x1x32xf32, #tpu.memory_space<vmem>>, vector<1x1x32xf32>
    %24 = vector.shape_cast %23 : vector<1x1x32xf32> to vector<1x32xf32>
    %25 = vector.broadcast %24 : vector<1x32xf32> to vector<64x32xf32>
    %26 = arith.addf %22, %25 : vector<64x32xf32>
    %27 = vector.shape_cast %26 : vector<64x32xf32> to vector<8x8x32xf32>
    %c0_26 = arith.constant 0 : index
    %c0_27 = arith.constant 0 : index
    %c0_28 = arith.constant 0 : index
    %28 = vector.load %arg14[%c0_26, %c0_27, %c0_28] : memref<8x8x32xf32, #tpu.memory_space<vmem>>, vector<8x8x32xf32>
    tpu.vector_store %arg14[%c0_26, %c0_27, %c0_28], %27 {strides = array<i32>} : memref<8x8x32xf32, #tpu.memory_space<vmem>>, vector<8x8x32xf32>,
    %c0_29 = arith.constant 0 : index
    %c0_30 = arith.constant 0 : index
    %c0_31 = arith.constant 0 : index
    %29 = vector.load %arg5[%c0_29, %c0_30, %c0_31] : memref<3x32x32xf32, #tpu.memory_space<vmem>>, vector<1x32x32xf32>
    %30 = vector.shape_cast %29 : vector<1x32x32xf32> to vector<32x32xf32>
    %cst_32 = arith.constant dense<0.000000e+00> : vector<64x32xf32>
    %31 = tpu.matmul %1, %30, %cst_32 {dimension_numbers = #tpu.dot_dimension_numbers<[1], [0], [0], [1], [0, 0, 1, 1], [], []>} : vector<64x32xf32>, vector<32x32xf32>, vector<64x32xf32> -> vector<64x32xf32>
    %c0_33 = arith.constant 0 : index
    %c0_34 = arith.constant 0 : index
    %c0_35 = arith.constant 0 : index
    %32 = vector.load %arg7[%c0_33, %c0_34, %c0_35] : memref<4x1x32xf32, #tpu.memory_space<vmem>>, vector<1x1x32xf32>
    %33 = vector.shape_cast %32 : vector<1x1x32xf32> to vector<1x32xf32>
    %34 = vector.broadcast %33 : vector<1x32xf32> to vector<64x32xf32>
    %35 = arith.addf %31, %34 : vector<64x32xf32>
    %36 = vector.shape_cast %35 : vector<64x32xf32> to vector<8x8x32xf32>
    %c0_36 = arith.constant 0 : index
    %c0_37 = arith.constant 0 : index
    %c0_38 = arith.constant 0 : index
    %37 = vector.load %arg15[%c0_36, %c0_37, %c0_38] : memref<8x8x32xf32, #tpu.memory_space<vmem>>, vector<8x8x32xf32>
    tpu.vector_store %arg15[%c0_36, %c0_37, %c0_38], %36 {strides = array<i32>} : memref<8x8x32xf32, #tpu.memory_space<vmem>>, vector<8x8x32xf32>,
    %c1_39 = arith.constant 1 : index
    %c0_40 = arith.constant 0 : index
    %c0_41 = arith.constant 0 : index
    %38 = vector.load %arg5[%c1_39, %c0_40, %c0_41] : memref<3x32x32xf32, #tpu.memory_space<vmem>>, vector<1x32x32xf32>
    %39 = vector.shape_cast %38 : vector<1x32x32xf32> to vector<32x32xf32>
    %cst_42 = arith.constant dense<0.000000e+00> : vector<64x32xf32>
    %40 = tpu.matmul %1, %39, %cst_42 {dimension_numbers = #tpu.dot_dimension_numbers<[1], [0], [0], [1], [0, 0, 1, 1], [], []>} : vector<64x32xf32>, vector<32x32xf32>, vector<64x32xf32> -> vector<64x32xf32>
    %c1_43 = arith.constant 1 : index
    %c0_44 = arith.constant 0 : index
    %c0_45 = arith.constant 0 : index
    %41 = vector.load %arg7[%c1_43, %c0_44, %c0_45] : memref<4x1x32xf32, #tpu.memory_space<vmem>>, vector<1x1x32xf32>
    %42 = vector.shape_cast %41 : vector<1x1x32xf32> to vector<1x32xf32>
    %43 = vector.broadcast %42 : vector<1x32xf32> to vector<64x32xf32>
    %44 = arith.addf %40, %43 : vector<64x32xf32>
    %45 = vector.shape_cast %44 : vector<64x32xf32> to vector<8x8x32xf32>
    %c0_46 = arith.constant 0 : index
    %c0_47 = arith.constant 0 : index
    %c0_48 = arith.constant 0 : index
    %46 = vector.load %arg16[%c0_46, %c0_47, %c0_48] : memref<8x8x32xf32, #tpu.memory_space<vmem>>, vector<8x8x32xf32>
    tpu.vector_store %arg16[%c0_46, %c0_47, %c0_48], %45 {strides = array<i32>} : memref<8x8x32xf32, #tpu.memory_space<vmem>>, vector<8x8x32xf32>,
    %c2_49 = arith.constant 2 : index
    %c0_50 = arith.constant 0 : index
    %c0_51 = arith.constant 0 : index
    %47 = vector.load %arg5[%c2_49, %c0_50, %c0_51] : memref<3x32x32xf32, #tpu.memory_space<vmem>>, vector<1x32x32xf32>
    %48 = vector.shape_cast %47 : vector<1x32x32xf32> to vector<32x32xf32>
    %cst_52 = arith.constant dense<0.000000e+00> : vector<64x32xf32>
    %49 = tpu.matmul %1, %48, %cst_52 {dimension_numbers = #tpu.dot_dimension_numbers<[1], [0], [0], [1], [0, 0, 1, 1], [], []>} : vector<64x32xf32>, vector<32x32xf32>, vector<64x32xf32> -> vector<64x32xf32>
    %c2_53 = arith.constant 2 : index
    %c0_54 = arith.constant 0 : index
    %c0_55 = arith.constant 0 : index
    %50 = vector.load %arg7[%c2_53, %c0_54, %c0_55] : memref<4x1x32xf32, #tpu.memory_space<vmem>>, vector<1x1x32xf32>
    %51 = vector.shape_cast %50 : vector<1x1x32xf32> to vector<1x32xf32>
    %52 = vector.broadcast %51 : vector<1x32xf32> to vector<64x32xf32>
    %53 = arith.addf %49, %52 : vector<64x32xf32>
    %54 = vector.shape_cast %53 : vector<64x32xf32> to vector<8x8x32xf32>
    %c0_56 = arith.constant 0 : index
    %c0_57 = arith.constant 0 : index
    %c0_58 = arith.constant 0 : index
    %55 = vector.load %arg17[%c0_56, %c0_57, %c0_58] : memref<8x8x32xf32, #tpu.memory_space<vmem>>, vector<8x8x32xf32>
    tpu.vector_store %arg17[%c0_56, %c0_57, %c0_58], %54 {strides = array<i32>} : memref<8x8x32xf32, #tpu.memory_space<vmem>>, vector<8x8x32xf32>,
    %c0_59 = arith.constant 0 : index
    %c0_60 = arith.constant 0 : index
    %c0_61 = arith.constant 0 : index
    %56 = vector.load %arg3[%c0_59, %c0_60, %c0_61] : memref<3x32x32xf32, #tpu.memory_space<vmem>>, vector<1x32x32xf32>
    %57 = vector.shape_cast %56 : vector<1x32x32xf32> to vector<32x32xf32>
    %c1_62 = arith.constant 1 : index
    %c0_63 = arith.constant 0 : index
    %c0_64 = arith.constant 0 : index
    %58 = vector.load %arg3[%c1_62, %c0_63, %c0_64] : memref<3x32x32xf32, #tpu.memory_space<vmem>>, vector<1x32x32xf32>
    %59 = vector.shape_cast %58 : vector<1x32x32xf32> to vector<32x32xf32>
    %c2_65 = arith.constant 2 : index
    %c0_66 = arith.constant 0 : index
    %c0_67 = arith.constant 0 : index
    %60 = vector.load %arg3[%c2_65, %c0_66, %c0_67] : memref<3x32x32xf32, #tpu.memory_space<vmem>>, vector<1x32x32xf32>
    %61 = vector.shape_cast %60 : vector<1x32x32xf32> to vector<32x32xf32>
    %c0_68 = arith.constant 0 : index
    %c0_69 = arith.constant 0 : index
    %c0_70 = arith.constant 0 : index
    %62 = vector.load %arg6[%c0_68, %c0_69, %c0_70] : memref<3x32x32xf32, #tpu.memory_space<vmem>>, vector<1x32x32xf32>
    %63 = vector.shape_cast %62 : vector<1x32x32xf32> to vector<32x32xf32>
    %c1_71 = arith.constant 1 : index
    %c0_72 = arith.constant 0 : index
    %c0_73 = arith.constant 0 : index
    %64 = vector.load %arg6[%c1_71, %c0_72, %c0_73] : memref<3x32x32xf32, #tpu.memory_space<vmem>>, vector<1x32x32xf32>
    %65 = vector.shape_cast %64 : vector<1x32x32xf32> to vector<32x32xf32>
    %c2_74 = arith.constant 2 : index
    %c0_75 = arith.constant 0 : index
    %c0_76 = arith.constant 0 : index
    %66 = vector.load %arg6[%c2_74, %c0_75, %c0_76] : memref<3x32x32xf32, #tpu.memory_space<vmem>>, vector<1x32x32xf32>
    %67 = vector.shape_cast %66 : vector<1x32x32xf32> to vector<32x32xf32>
    %c3 = arith.constant 3 : index
    %c0_77 = arith.constant 0 : index
    %c0_78 = arith.constant 0 : index
    %68 = vector.load %arg4[%c3, %c0_77, %c0_78] : memref<4x1x32xf32, #tpu.memory_space<vmem>>, vector<1x1x32xf32>
    %69 = vector.shape_cast %68 : vector<1x1x32xf32> to vector<1x32xf32>
    %70 = vector.shape_cast %69 : vector<1x32xf32> to vector<1x32xf32>
    %71 = vector.broadcast %70 : vector<1x32xf32> to vector<8x32xf32>
    %c3_79 = arith.constant 3 : index
    %c0_80 = arith.constant 0 : index
    %c0_81 = arith.constant 0 : index
    %72 = vector.load %arg7[%c3_79, %c0_80, %c0_81] : memref<4x1x32xf32, #tpu.memory_space<vmem>>, vector<1x1x32xf32>
    %73 = vector.shape_cast %72 : vector<1x1x32xf32> to vector<1x32xf32>
    %74 = vector.shape_cast %73 : vector<1x32xf32> to vector<1x32xf32>
    %75 = vector.broadcast %74 : vector<1x32xf32> to vector<8x32xf32>
    %cst_82 = arith.constant 0.000000e+00 : f32
    %76 = vector.broadcast %cst_82 : f32 to vector<8x32xf32>
    %c0_i32 = arith.constant 0 : i32
    %c7_i32 = arith.constant 7 : i32
    %77 = arith.subi %c7_i32, %c0_i32 : i32
    %78 = arith.index_cast %c0_i32 : i32 to index
    %c0_83 = arith.constant 0 : index
    %c0_84 = arith.constant 0 : index
    %79 = vector.load %arg12[%78, %c0_83, %c0_84] : memref<8x8x32xf32, #tpu.memory_space<vmem>>, vector<1x8x32xf32>
    %80 = vector.shape_cast %79 : vector<1x8x32xf32> to vector<8x32xf32>
    %81 = arith.index_cast %c0_i32 : i32 to index
    %c0_85 = arith.constant 0 : index
    %c0_86 = arith.constant 0 : index
    %82 = vector.load %arg13[%81, %c0_85, %c0_86] : memref<8x8x32xf32, #tpu.memory_space<vmem>>, vector<1x8x32xf32>
    %83 = vector.shape_cast %82 : vector<1x8x32xf32> to vector<8x32xf32>
    %84 = arith.index_cast %c0_i32 : i32 to index
    %c0_87 = arith.constant 0 : index
    %c0_88 = arith.constant 0 : index
    %85 = vector.load %arg14[%84, %c0_87, %c0_88] : memref<8x8x32xf32, #tpu.memory_space<vmem>>, vector<1x8x32xf32>
    %86 = vector.shape_cast %85 : vector<1x8x32xf32> to vector<8x32xf32>
    %cst_89 = arith.constant dense<0.000000e+00> : vector<8x32xf32>
    %87 = tpu.matmul %76, %57, %cst_89 {dimension_numbers = #tpu.dot_dimension_numbers<[1], [0], [0], [1], [0, 0, 1, 1], [], []>} : vector<8x32xf32>, vector<32x32xf32>, vector<8x32xf32> -> vector<8x32xf32>
    %cst_90 = arith.constant dense<0.000000e+00> : vector<8x32xf32>
    %88 = tpu.matmul %76, %59, %cst_90 {dimension_numbers = #tpu.dot_dimension_numbers<[1], [0], [0], [1], [0, 0, 1, 1], [], []>} : vector<8x32xf32>, vector<32x32xf32>, vector<8x32xf32> -> vector<8x32xf32>
    %cst_91 = arith.constant dense<0.000000e+00> : vector<8x32xf32>
    %89 = tpu.matmul %76, %61, %cst_91 {dimension_numbers = #tpu.dot_dimension_numbers<[1], [0], [0], [1], [0, 0, 1, 1], [], []>} : vector<8x32xf32>, vector<32x32xf32>, vector<8x32xf32> -> vector<8x32xf32>
    %90 = arith.addf %80, %87 : vector<8x32xf32>
    %91 = arith.negf %90 : vector<8x32xf32>
    %92 = math.exp %91 : vector<8x32xf32>
    %cst_92 = arith.constant 1.000000e+00 : f32
    %93 = vector.broadcast %cst_92 : f32 to vector<8x32xf32>
    %94 = arith.addf %93, %92 : vector<8x32xf32>
    %95 = arith.divf %93, %94 : vector<8x32xf32>
    %96 = arith.addf %83, %88 : vector<8x32xf32>
    %97 = arith.negf %96 : vector<8x32xf32>
    %98 = math.exp %97 : vector<8x32xf32>
    %cst_93 = arith.constant 1.000000e+00 : f32
    %99 = vector.broadcast %cst_93 : f32 to vector<8x32xf32>
    %100 = arith.addf %99, %98 : vector<8x32xf32>
    %101 = arith.divf %99, %100 : vector<8x32xf32>
    %102 = arith.addf %89, %71 : vector<8x32xf32>
    %103 = arith.mulf %95, %102 : vector<8x32xf32>
    %104 = arith.addf %86, %103 : vector<8x32xf32>
    %105 = math.tanh %104 : vector<8x32xf32>
    %106 = arith.subf %76, %105 : vector<8x32xf32>
    %107 = arith.mulf %101, %106 : vector<8x32xf32>
    %108 = arith.addf %105, %107 : vector<8x32xf32>
    %109 = arith.index_cast %77 : i32 to index
    %c0_94 = arith.constant 0 : index
    %c0_95 = arith.constant 0 : index
    %110 = vector.load %arg15[%109, %c0_94, %c0_95] : memref<8x8x32xf32, #tpu.memory_space<vmem>>, vector<1x8x32xf32>
    %111 = vector.shape_cast %110 : vector<1x8x32xf32> to vector<8x32xf32>
    %112 = arith.index_cast %77 : i32 to index
    %c0_96 = arith.constant 0 : index
    %c0_97 = arith.constant 0 : index
    %113 = vector.load %arg16[%112, %c0_96, %c0_97] : memref<8x8x32xf32, #tpu.memory_space<vmem>>, vector<1x8x32xf32>
    %114 = vector.shape_cast %113 : vector<1x8x32xf32> to vector<8x32xf32>
    %115 = arith.index_cast %77 : i32 to index
    %c0_98 = arith.constant 0 : index
    %c0_99 = arith.constant 0 : index
    %116 = vector.load %arg17[%115, %c0_98, %c0_99] : memref<8x8x32xf32, #tpu.memory_space<vmem>>, vector<1x8x32xf32>
    %117 = vector.shape_cast %116 : vector<1x8x32xf32> to vector<8x32xf32>
    %cst_100 = arith.constant dense<0.000000e+00> : vector<8x32xf32>
    %118 = tpu.matmul %76, %63, %cst_100 {dimension_numbers = #tpu.dot_dimension_numbers<[1], [0], [0], [1], [0, 0, 1, 1], [], []>} : vector<8x32xf32>, vector<32x32xf32>, vector<8x32xf32> -> vector<8x32xf32>
    %cst_101 = arith.constant dense<0.000000e+00> : vector<8x32xf32>
    %119 = tpu.matmul %76, %65, %cst_101 {dimension_numbers = #tpu.dot_dimension_numbers<[1], [0], [0], [1], [0, 0, 1, 1], [], []>} : vector<8x32xf32>, vector<32x32xf32>, vector<8x32xf32> -> vector<8x32xf32>
    %cst_102 = arith.constant dense<0.000000e+00> : vector<8x32xf32>
    %120 = tpu.matmul %76, %67, %cst_102 {dimension_numbers = #tpu.dot_dimension_numbers<[1], [0], [0], [1], [0, 0, 1, 1], [], []>} : vector<8x32xf32>, vector<32x32xf32>, vector<8x32xf32> -> vector<8x32xf32>
    %121 = arith.addf %111, %118 : vector<8x32xf32>
    %122 = arith.negf %121 : vector<8x32xf32>
    %123 = math.exp %122 : vector<8x32xf32>
    %cst_103 = arith.constant 1.000000e+00 : f32
    %124 = vector.broadcast %cst_103 : f32 to vector<8x32xf32>
    %125 = arith.addf %124, %123 : vector<8x32xf32>
    %126 = arith.divf %124, %125 : vector<8x32xf32>
    %127 = arith.addf %114, %119 : vector<8x32xf32>
    %128 = arith.negf %127 : vector<8x32xf32>
    %129 = math.exp %128 : vector<8x32xf32>
    %cst_104 = arith.constant 1.000000e+00 : f32
    %130 = vector.broadcast %cst_104 : f32 to vector<8x32xf32>
    %131 = arith.addf %130, %129 : vector<8x32xf32>
    %132 = arith.divf %130, %131 : vector<8x32xf32>
    %133 = arith.addf %120, %75 : vector<8x32xf32>
    %134 = arith.mulf %126, %133 : vector<8x32xf32>
    %135 = arith.addf %117, %134 : vector<8x32xf32>
    %136 = math.tanh %135 : vector<8x32xf32>
    %137 = arith.subf %76, %136 : vector<8x32xf32>
    %138 = arith.mulf %132, %137 : vector<8x32xf32>
    %139 = arith.addf %136, %138 : vector<8x32xf32>
    %140 = arith.index_cast %c0_i32 : i32 to index
    %c0_105 = arith.constant 0 : index
    %c0_106 = arith.constant 0 : index
    %141 = vector.load %arg18[%140, %c0_105, %c0_106] : memref<8x8x32xf32, #tpu.memory_space<vmem>>, vector<1x8x32xf32>
    %142 = vector.shape_cast %141 : vector<1x8x32xf32> to vector<8x32xf32>
    %143 = vector.shape_cast %108 : vector<8x32xf32> to vector<1x8x32xf32>
    tpu.vector_store %arg18[%140, %c0_105, %c0_106], %143 {strides = array<i32>} : memref<8x8x32xf32, #tpu.memory_space<vmem>>, vector<1x8x32xf32>,
    %144 = arith.index_cast %77 : i32 to index
    %c0_107 = arith.constant 0 : index
    %c0_108 = arith.constant 0 : index
    %145 = vector.load %arg19[%144, %c0_107, %c0_108] : memref<8x8x32xf32, #tpu.memory_space<vmem>>, vector<1x8x32xf32>
    %146 = vector.shape_cast %145 : vector<1x8x32xf32> to vector<8x32xf32>
    %147 = vector.shape_cast %139 : vector<8x32xf32> to vector<1x8x32xf32>
    tpu.vector_store %arg19[%144, %c0_107, %c0_108], %147 {strides = array<i32>} : memref<8x8x32xf32, #tpu.memory_space<vmem>>, vector<1x8x32xf32>,
    %c1_i32 = arith.constant 1 : i32
    %c7_i32_109 = arith.constant 7 : i32
    %148 = arith.subi %c7_i32_109, %c1_i32 : i32
    %149 = arith.index_cast %c1_i32 : i32 to index
    %c0_110 = arith.constant 0 : index
    %c0_111 = arith.constant 0 : index
    %150 = vector.load %arg12[%149, %c0_110, %c0_111] : memref<8x8x32xf32, #tpu.memory_space<vmem>>, vector<1x8x32xf32>
    %151 = vector.shape_cast %150 : vector<1x8x32xf32> to vector<8x32xf32>
    %152 = arith.index_cast %c1_i32 : i32 to index
    %c0_112 = arith.constant 0 : index
    %c0_113 = arith.constant 0 : index
    %153 = vector.load %arg13[%152, %c0_112, %c0_113] : memref<8x8x32xf32, #tpu.memory_space<vmem>>, vector<1x8x32xf32>
    %154 = vector.shape_cast %153 : vector<1x8x32xf32> to vector<8x32xf32>
    %155 = arith.index_cast %c1_i32 : i32 to index
    %c0_114 = arith.constant 0 : index
    %c0_115 = arith.constant 0 : index
    %156 = vector.load %arg14[%155, %c0_114, %c0_115] : memref<8x8x32xf32, #tpu.memory_space<vmem>>, vector<1x8x32xf32>
    %157 = vector.shape_cast %156 : vector<1x8x32xf32> to vector<8x32xf32>
    %cst_116 = arith.constant dense<0.000000e+00> : vector<8x32xf32>
    %158 = tpu.matmul %108, %57, %cst_116 {dimension_numbers = #tpu.dot_dimension_numbers<[1], [0], [0], [1], [0, 0, 1, 1], [], []>} : vector<8x32xf32>, vector<32x32xf32>, vector<8x32xf32> -> vector<8x32xf32>
    %cst_117 = arith.constant dense<0.000000e+00> : vector<8x32xf32>
    %159 = tpu.matmul %108, %59, %cst_117 {dimension_numbers = #tpu.dot_dimension_numbers<[1], [0], [0], [1], [0, 0, 1, 1], [], []>} : vector<8x32xf32>, vector<32x32xf32>, vector<8x32xf32> -> vector<8x32xf32>
    %cst_118 = arith.constant dense<0.000000e+00> : vector<8x32xf32>
    %160 = tpu.matmul %108, %61, %cst_118 {dimension_numbers = #tpu.dot_dimension_numbers<[1], [0], [0], [1], [0, 0, 1, 1], [], []>} : vector<8x32xf32>, vector<32x32xf32>, vector<8x32xf32> -> vector<8x32xf32>
    %161 = arith.addf %151, %158 : vector<8x32xf32>
    %162 = arith.negf %161 : vector<8x32xf32>
    %163 = math.exp %162 : vector<8x32xf32>
    %cst_119 = arith.constant 1.000000e+00 : f32
    %164 = vector.broadcast %cst_119 : f32 to vector<8x32xf32>
    %165 = arith.addf %164, %163 : vector<8x32xf32>
    %166 = arith.divf %164, %165 : vector<8x32xf32>
    %167 = arith.addf %154, %159 : vector<8x32xf32>
    %168 = arith.negf %167 : vector<8x32xf32>
    %169 = math.exp %168 : vector<8x32xf32>
    %cst_120 = arith.constant 1.000000e+00 : f32
    %170 = vector.broadcast %cst_120 : f32 to vector<8x32xf32>
    %171 = arith.addf %170, %169 : vector<8x32xf32>
    %172 = arith.divf %170, %171 : vector<8x32xf32>
    %173 = arith.addf %160, %71 : vector<8x32xf32>
    %174 = arith.mulf %166, %173 : vector<8x32xf32>
    %175 = arith.addf %157, %174 : vector<8x32xf32>
    %176 = math.tanh %175 : vector<8x32xf32>
    %177 = arith.subf %108, %176 : vector<8x32xf32>
    %178 = arith.mulf %172, %177 : vector<8x32xf32>
    %179 = arith.addf %176, %178 : vector<8x32xf32>
    %180 = arith.index_cast %148 : i32 to index
    %c0_121 = arith.constant 0 : index
    %c0_122 = arith.constant 0 : index
    %181 = vector.load %arg15[%180, %c0_121, %c0_122] : memref<8x8x32xf32, #tpu.memory_space<vmem>>, vector<1x8x32xf32>
    %182 = vector.shape_cast %181 : vector<1x8x32xf32> to vector<8x32xf32>
    %183 = arith.index_cast %148 : i32 to index
    %c0_123 = arith.constant 0 : index
    %c0_124 = arith.constant 0 : index
    %184 = vector.load %arg16[%183, %c0_123, %c0_124] : memref<8x8x32xf32, #tpu.memory_space<vmem>>, vector<1x8x32xf32>
    %185 = vector.shape_cast %184 : vector<1x8x32xf32> to vector<8x32xf32>
    %186 = arith.index_cast %148 : i32 to index
    %c0_125 = arith.constant 0 : index
    %c0_126 = arith.constant 0 : index
    %187 = vector.load %arg17[%186, %c0_125, %c0_126] : memref<8x8x32xf32, #tpu.memory_space<vmem>>, vector<1x8x32xf32>
    %188 = vector.shape_cast %187 : vector<1x8x32xf32> to vector<8x32xf32>
    %cst_127 = arith.constant dense<0.000000e+00> : vector<8x32xf32>
    %189 = tpu.matmul %139, %63, %cst_127 {dimension_numbers = #tpu.dot_dimension_numbers<[1], [0], [0], [1], [0, 0, 1, 1], [], []>} : vector<8x32xf32>, vector<32x32xf32>, vector<8x32xf32> -> vector<8x32xf32>
    %cst_128 = arith.constant dense<0.000000e+00> : vector<8x32xf32>
    %190 = tpu.matmul %139, %65, %cst_128 {dimension_numbers = #tpu.dot_dimension_numbers<[1], [0], [0], [1], [0, 0, 1, 1], [], []>} : vector<8x32xf32>, vector<32x32xf32>, vector<8x32xf32> -> vector<8x32xf32>
    %cst_129 = arith.constant dense<0.000000e+00> : vector<8x32xf32>
    %191 = tpu.matmul %139, %67, %cst_129 {dimension_numbers = #tpu.dot_dimension_numbers<[1], [0], [0], [1], [0, 0, 1, 1], [], []>} : vector<8x32xf32>, vector<32x32xf32>, vector<8x32xf32> -> vector<8x32xf32>
    %192 = arith.addf %182, %189 : vector<8x32xf32>
    %193 = arith.negf %192 : vector<8x32xf32>
    %194 = math.exp %193 : vector<8x32xf32>
    %cst_130 = arith.constant 1.000000e+00 : f32
    %195 = vector.broadcast %cst_130 : f32 to vector<8x32xf32>
    %196 = arith.addf %195, %194 : vector<8x32xf32>
    %197 = arith.divf %195, %196 : vector<8x32xf32>
    %198 = arith.addf %185, %190 : vector<8x32xf32>
    %199 = arith.negf %198 : vector<8x32xf32>
    %200 = math.exp %199 : vector<8x32xf32>
    %cst_131 = arith.constant 1.000000e+00 : f32
    %201 = vector.broadcast %cst_131 : f32 to vector<8x32xf32>
    %202 = arith.addf %201, %200 : vector<8x32xf32>
    %203 = arith.divf %201, %202 : vector<8x32xf32>
    %204 = arith.addf %191, %75 : vector<8x32xf32>
    %205 = arith.mulf %197, %204 : vector<8x32xf32>
    %206 = arith.addf %188, %205 : vector<8x32xf32>
    %207 = math.tanh %206 : vector<8x32xf32>
    %208 = arith.subf %139, %207 : vector<8x32xf32>
    %209 = arith.mulf %203, %208 : vector<8x32xf32>
    %210 = arith.addf %207, %209 : vector<8x32xf32>
    %211 = arith.index_cast %c1_i32 : i32 to index
    %c0_132 = arith.constant 0 : index
    %c0_133 = arith.constant 0 : index
    %212 = vector.load %arg18[%211, %c0_132, %c0_133] : memref<8x8x32xf32, #tpu.memory_space<vmem>>, vector<1x8x32xf32>
    %213 = vector.shape_cast %212 : vector<1x8x32xf32> to vector<8x32xf32>
    %214 = vector.shape_cast %179 : vector<8x32xf32> to vector<1x8x32xf32>
    tpu.vector_store %arg18[%211, %c0_132, %c0_133], %214 {strides = array<i32>} : memref<8x8x32xf32, #tpu.memory_space<vmem>>, vector<1x8x32xf32>,
    %215 = arith.index_cast %148 : i32 to index
    %c0_134 = arith.constant 0 : index
    %c0_135 = arith.constant 0 : index
    %216 = vector.load %arg19[%215, %c0_134, %c0_135] : memref<8x8x32xf32, #tpu.memory_space<vmem>>, vector<1x8x32xf32>
    %217 = vector.shape_cast %216 : vector<1x8x32xf32> to vector<8x32xf32>
    %218 = vector.shape_cast %210 : vector<8x32xf32> to vector<1x8x32xf32>
    tpu.vector_store %arg19[%215, %c0_134, %c0_135], %218 {strides = array<i32>} : memref<8x8x32xf32, #tpu.memory_space<vmem>>, vector<1x8x32xf32>,
    %c2_i32 = arith.constant 2 : i32
    %c7_i32_136 = arith.constant 7 : i32
    %219 = arith.subi %c7_i32_136, %c2_i32 : i32
    %220 = arith.index_cast %c2_i32 : i32 to index
    %c0_137 = arith.constant 0 : index
    %c0_138 = arith.constant 0 : index
    %221 = vector.load %arg12[%220, %c0_137, %c0_138] : memref<8x8x32xf32, #tpu.memory_space<vmem>>, vector<1x8x32xf32>
    %222 = vector.shape_cast %221 : vector<1x8x32xf32> to vector<8x32xf32>
    %223 = arith.index_cast %c2_i32 : i32 to index
    %c0_139 = arith.constant 0 : index
    %c0_140 = arith.constant 0 : index
    %224 = vector.load %arg13[%223, %c0_139, %c0_140] : memref<8x8x32xf32, #tpu.memory_space<vmem>>, vector<1x8x32xf32>
    %225 = vector.shape_cast %224 : vector<1x8x32xf32> to vector<8x32xf32>
    %226 = arith.index_cast %c2_i32 : i32 to index
    %c0_141 = arith.constant 0 : index
    %c0_142 = arith.constant 0 : index
    %227 = vector.load %arg14[%226, %c0_141, %c0_142] : memref<8x8x32xf32, #tpu.memory_space<vmem>>, vector<1x8x32xf32>
    %228 = vector.shape_cast %227 : vector<1x8x32xf32> to vector<8x32xf32>
    %cst_143 = arith.constant dense<0.000000e+00> : vector<8x32xf32>
    %229 = tpu.matmul %179, %57, %cst_143 {dimension_numbers = #tpu.dot_dimension_numbers<[1], [0], [0], [1], [0, 0, 1, 1], [], []>} : vector<8x32xf32>, vector<32x32xf32>, vector<8x32xf32> -> vector<8x32xf32>
    %cst_144 = arith.constant dense<0.000000e+00> : vector<8x32xf32>
    %230 = tpu.matmul %179, %59, %cst_144 {dimension_numbers = #tpu.dot_dimension_numbers<[1], [0], [0], [1], [0, 0, 1, 1], [], []>} : vector<8x32xf32>, vector<32x32xf32>, vector<8x32xf32> -> vector<8x32xf32>
    %cst_145 = arith.constant dense<0.000000e+00> : vector<8x32xf32>
    %231 = tpu.matmul %179, %61, %cst_145 {dimension_numbers = #tpu.dot_dimension_numbers<[1], [0], [0], [1], [0, 0, 1, 1], [], []>} : vector<8x32xf32>, vector<32x32xf32>, vector<8x32xf32> -> vector<8x32xf32>
    %232 = arith.addf %222, %229 : vector<8x32xf32>
    %233 = arith.negf %232 : vector<8x32xf32>
    %234 = math.exp %233 : vector<8x32xf32>
    %cst_146 = arith.constant 1.000000e+00 : f32
    %235 = vector.broadcast %cst_146 : f32 to vector<8x32xf32>
    %236 = arith.addf %235, %234 : vector<8x32xf32>
    %237 = arith.divf %235, %236 : vector<8x32xf32>
    %238 = arith.addf %225, %230 : vector<8x32xf32>
    %239 = arith.negf %238 : vector<8x32xf32>
    %240 = math.exp %239 : vector<8x32xf32>
    %cst_147 = arith.constant 1.000000e+00 : f32
    %241 = vector.broadcast %cst_147 : f32 to vector<8x32xf32>
    %242 = arith.addf %241, %240 : vector<8x32xf32>
    %243 = arith.divf %241, %242 : vector<8x32xf32>
    %244 = arith.addf %231, %71 : vector<8x32xf32>
    %245 = arith.mulf %237, %244 : vector<8x32xf32>
    %246 = arith.addf %228, %245 : vector<8x32xf32>
    %247 = math.tanh %246 : vector<8x32xf32>
    %248 = arith.subf %179, %247 : vector<8x32xf32>
    %249 = arith.mulf %243, %248 : vector<8x32xf32>
    %250 = arith.addf %247, %249 : vector<8x32xf32>
    %251 = arith.index_cast %219 : i32 to index
    %c0_148 = arith.constant 0 : index
    %c0_149 = arith.constant 0 : index
    %252 = vector.load %arg15[%251, %c0_148, %c0_149] : memref<8x8x32xf32, #tpu.memory_space<vmem>>, vector<1x8x32xf32>
    %253 = vector.shape_cast %252 : vector<1x8x32xf32> to vector<8x32xf32>
    %254 = arith.index_cast %219 : i32 to index
    %c0_150 = arith.constant 0 : index
    %c0_151 = arith.constant 0 : index
    %255 = vector.load %arg16[%254, %c0_150, %c0_151] : memref<8x8x32xf32, #tpu.memory_space<vmem>>, vector<1x8x32xf32>
    %256 = vector.shape_cast %255 : vector<1x8x32xf32> to vector<8x32xf32>
    %257 = arith.index_cast %219 : i32 to index
    %c0_152 = arith.constant 0 : index
    %c0_153 = arith.constant 0 : index
    %258 = vector.load %arg17[%257, %c0_152, %c0_153] : memref<8x8x32xf32, #tpu.memory_space<vmem>>, vector<1x8x32xf32>
    %259 = vector.shape_cast %258 : vector<1x8x32xf32> to vector<8x32xf32>
    %cst_154 = arith.constant dense<0.000000e+00> : vector<8x32xf32>
    %260 = tpu.matmul %210, %63, %cst_154 {dimension_numbers = #tpu.dot_dimension_numbers<[1], [0], [0], [1], [0, 0, 1, 1], [], []>} : vector<8x32xf32>, vector<32x32xf32>, vector<8x32xf32> -> vector<8x32xf32>
    %cst_155 = arith.constant dense<0.000000e+00> : vector<8x32xf32>
    %261 = tpu.matmul %210, %65, %cst_155 {dimension_numbers = #tpu.dot_dimension_numbers<[1], [0], [0], [1], [0, 0, 1, 1], [], []>} : vector<8x32xf32>, vector<32x32xf32>, vector<8x32xf32> -> vector<8x32xf32>
    %cst_156 = arith.constant dense<0.000000e+00> : vector<8x32xf32>
    %262 = tpu.matmul %210, %67, %cst_156 {dimension_numbers = #tpu.dot_dimension_numbers<[1], [0], [0], [1], [0, 0, 1, 1], [], []>} : vector<8x32xf32>, vector<32x32xf32>, vector<8x32xf32> -> vector<8x32xf32>
    %263 = arith.addf %253, %260 : vector<8x32xf32>
    %264 = arith.negf %263 : vector<8x32xf32>
    %265 = math.exp %264 : vector<8x32xf32>
    %cst_157 = arith.constant 1.000000e+00 : f32
    %266 = vector.broadcast %cst_157 : f32 to vector<8x32xf32>
    %267 = arith.addf %266, %265 : vector<8x32xf32>
    %268 = arith.divf %266, %267 : vector<8x32xf32>
    %269 = arith.addf %256, %261 : vector<8x32xf32>
    %270 = arith.negf %269 : vector<8x32xf32>
    %271 = math.exp %270 : vector<8x32xf32>
    %cst_158 = arith.constant 1.000000e+00 : f32
    %272 = vector.broadcast %cst_158 : f32 to vector<8x32xf32>
    %273 = arith.addf %272, %271 : vector<8x32xf32>
    %274 = arith.divf %272, %273 : vector<8x32xf32>
    %275 = arith.addf %262, %75 : vector<8x32xf32>
    %276 = arith.mulf %268, %275 : vector<8x32xf32>
    %277 = arith.addf %259, %276 : vector<8x32xf32>
    %278 = math.tanh %277 : vector<8x32xf32>
    %279 = arith.subf %210, %278 : vector<8x32xf32>
    %280 = arith.mulf %274, %279 : vector<8x32xf32>
    %281 = arith.addf %278, %280 : vector<8x32xf32>
    %282 = arith.index_cast %c2_i32 : i32 to index
    %c0_159 = arith.constant 0 : index
    %c0_160 = arith.constant 0 : index
    %283 = vector.load %arg18[%282, %c0_159, %c0_160] : memref<8x8x32xf32, #tpu.memory_space<vmem>>, vector<1x8x32xf32>
    %284 = vector.shape_cast %283 : vector<1x8x32xf32> to vector<8x32xf32>
    %285 = vector.shape_cast %250 : vector<8x32xf32> to vector<1x8x32xf32>
    tpu.vector_store %arg18[%282, %c0_159, %c0_160], %285 {strides = array<i32>} : memref<8x8x32xf32, #tpu.memory_space<vmem>>, vector<1x8x32xf32>,
    %286 = arith.index_cast %219 : i32 to index
    %c0_161 = arith.constant 0 : index
    %c0_162 = arith.constant 0 : index
    %287 = vector.load %arg19[%286, %c0_161, %c0_162] : memref<8x8x32xf32, #tpu.memory_space<vmem>>, vector<1x8x32xf32>
    %288 = vector.shape_cast %287 : vector<1x8x32xf32> to vector<8x32xf32>
    %289 = vector.shape_cast %281 : vector<8x32xf32> to vector<1x8x32xf32>
    tpu.vector_store %arg19[%286, %c0_161, %c0_162], %289 {strides = array<i32>} : memref<8x8x32xf32, #tpu.memory_space<vmem>>, vector<1x8x32xf32>,
    %c3_i32 = arith.constant 3 : i32
    %c7_i32_163 = arith.constant 7 : i32
    %290 = arith.subi %c7_i32_163, %c3_i32 : i32
    %291 = arith.index_cast %c3_i32 : i32 to index
    %c0_164 = arith.constant 0 : index
    %c0_165 = arith.constant 0 : index
    %292 = vector.load %arg12[%291, %c0_164, %c0_165] : memref<8x8x32xf32, #tpu.memory_space<vmem>>, vector<1x8x32xf32>
    %293 = vector.shape_cast %292 : vector<1x8x32xf32> to vector<8x32xf32>
    %294 = arith.index_cast %c3_i32 : i32 to index
    %c0_166 = arith.constant 0 : index
    %c0_167 = arith.constant 0 : index
    %295 = vector.load %arg13[%294, %c0_166, %c0_167] : memref<8x8x32xf32, #tpu.memory_space<vmem>>, vector<1x8x32xf32>
    %296 = vector.shape_cast %295 : vector<1x8x32xf32> to vector<8x32xf32>
    %297 = arith.index_cast %c3_i32 : i32 to index
    %c0_168 = arith.constant 0 : index
    %c0_169 = arith.constant 0 : index
    %298 = vector.load %arg14[%297, %c0_168, %c0_169] : memref<8x8x32xf32, #tpu.memory_space<vmem>>, vector<1x8x32xf32>
    %299 = vector.shape_cast %298 : vector<1x8x32xf32> to vector<8x32xf32>
    %cst_170 = arith.constant dense<0.000000e+00> : vector<8x32xf32>
    %300 = tpu.matmul %250, %57, %cst_170 {dimension_numbers = #tpu.dot_dimension_numbers<[1], [0], [0], [1], [0, 0, 1, 1], [], []>} : vector<8x32xf32>, vector<32x32xf32>, vector<8x32xf32> -> vector<8x32xf32>
    %cst_171 = arith.constant dense<0.000000e+00> : vector<8x32xf32>
    %301 = tpu.matmul %250, %59, %cst_171 {dimension_numbers = #tpu.dot_dimension_numbers<[1], [0], [0], [1], [0, 0, 1, 1], [], []>} : vector<8x32xf32>, vector<32x32xf32>, vector<8x32xf32> -> vector<8x32xf32>
    %cst_172 = arith.constant dense<0.000000e+00> : vector<8x32xf32>
    %302 = tpu.matmul %250, %61, %cst_172 {dimension_numbers = #tpu.dot_dimension_numbers<[1], [0], [0], [1], [0, 0, 1, 1], [], []>} : vector<8x32xf32>, vector<32x32xf32>, vector<8x32xf32> -> vector<8x32xf32>
    %303 = arith.addf %293, %300 : vector<8x32xf32>
    %304 = arith.negf %303 : vector<8x32xf32>
    %305 = math.exp %304 : vector<8x32xf32>
    %cst_173 = arith.constant 1.000000e+00 : f32
    %306 = vector.broadcast %cst_173 : f32 to vector<8x32xf32>
    %307 = arith.addf %306, %305 : vector<8x32xf32>
    %308 = arith.divf %306, %307 : vector<8x32xf32>
    %309 = arith.addf %296, %301 : vector<8x32xf32>
    %310 = arith.negf %309 : vector<8x32xf32>
    %311 = math.exp %310 : vector<8x32xf32>
    %cst_174 = arith.constant 1.000000e+00 : f32
    %312 = vector.broadcast %cst_174 : f32 to vector<8x32xf32>
    %313 = arith.addf %312, %311 : vector<8x32xf32>
    %314 = arith.divf %312, %313 : vector<8x32xf32>
    %315 = arith.addf %302, %71 : vector<8x32xf32>
    %316 = arith.mulf %308, %315 : vector<8x32xf32>
    %317 = arith.addf %299, %316 : vector<8x32xf32>
    %318 = math.tanh %317 : vector<8x32xf32>
    %319 = arith.subf %250, %318 : vector<8x32xf32>
    %320 = arith.mulf %314, %319 : vector<8x32xf32>
    %321 = arith.addf %318, %320 : vector<8x32xf32>
    %322 = arith.index_cast %290 : i32 to index
    %c0_175 = arith.constant 0 : index
    %c0_176 = arith.constant 0 : index
    %323 = vector.load %arg15[%322, %c0_175, %c0_176] : memref<8x8x32xf32, #tpu.memory_space<vmem>>, vector<1x8x32xf32>
    %324 = vector.shape_cast %323 : vector<1x8x32xf32> to vector<8x32xf32>
    %325 = arith.index_cast %290 : i32 to index
    %c0_177 = arith.constant 0 : index
    %c0_178 = arith.constant 0 : index
    %326 = vector.load %arg16[%325, %c0_177, %c0_178] : memref<8x8x32xf32, #tpu.memory_space<vmem>>, vector<1x8x32xf32>
    %327 = vector.shape_cast %326 : vector<1x8x32xf32> to vector<8x32xf32>
    %328 = arith.index_cast %290 : i32 to index
    %c0_179 = arith.constant 0 : index
    %c0_180 = arith.constant 0 : index
    %329 = vector.load %arg17[%328, %c0_179, %c0_180] : memref<8x8x32xf32, #tpu.memory_space<vmem>>, vector<1x8x32xf32>
    %330 = vector.shape_cast %329 : vector<1x8x32xf32> to vector<8x32xf32>
    %cst_181 = arith.constant dense<0.000000e+00> : vector<8x32xf32>
    %331 = tpu.matmul %281, %63, %cst_181 {dimension_numbers = #tpu.dot_dimension_numbers<[1], [0], [0], [1], [0, 0, 1, 1], [], []>} : vector<8x32xf32>, vector<32x32xf32>, vector<8x32xf32> -> vector<8x32xf32>
    %cst_182 = arith.constant dense<0.000000e+00> : vector<8x32xf32>
    %332 = tpu.matmul %281, %65, %cst_182 {dimension_numbers = #tpu.dot_dimension_numbers<[1], [0], [0], [1], [0, 0, 1, 1], [], []>} : vector<8x32xf32>, vector<32x32xf32>, vector<8x32xf32> -> vector<8x32xf32>
    %cst_183 = arith.constant dense<0.000000e+00> : vector<8x32xf32>
    %333 = tpu.matmul %281, %67, %cst_183 {dimension_numbers = #tpu.dot_dimension_numbers<[1], [0], [0], [1], [0, 0, 1, 1], [], []>} : vector<8x32xf32>, vector<32x32xf32>, vector<8x32xf32> -> vector<8x32xf32>
    %334 = arith.addf %324, %331 : vector<8x32xf32>
    %335 = arith.negf %334 : vector<8x32xf32>
    %336 = math.exp %335 : vector<8x32xf32>
    %cst_184 = arith.constant 1.000000e+00 : f32
    %337 = vector.broadcast %cst_184 : f32 to vector<8x32xf32>
    %338 = arith.addf %337, %336 : vector<8x32xf32>
    %339 = arith.divf %337, %338 : vector<8x32xf32>
    %340 = arith.addf %327, %332 : vector<8x32xf32>
    %341 = arith.negf %340 : vector<8x32xf32>
    %342 = math.exp %341 : vector<8x32xf32>
    %cst_185 = arith.constant 1.000000e+00 : f32
    %343 = vector.broadcast %cst_185 : f32 to vector<8x32xf32>
    %344 = arith.addf %343, %342 : vector<8x32xf32>
    %345 = arith.divf %343, %344 : vector<8x32xf32>
    %346 = arith.addf %333, %75 : vector<8x32xf32>
    %347 = arith.mulf %339, %346 : vector<8x32xf32>
    %348 = arith.addf %330, %347 : vector<8x32xf32>
    %349 = math.tanh %348 : vector<8x32xf32>
    %350 = arith.subf %281, %349 : vector<8x32xf32>
    %351 = arith.mulf %345, %350 : vector<8x32xf32>
    %352 = arith.addf %349, %351 : vector<8x32xf32>
    %353 = arith.index_cast %c3_i32 : i32 to index
    %c0_186 = arith.constant 0 : index
    %c0_187 = arith.constant 0 : index
    %354 = vector.load %arg18[%353, %c0_186, %c0_187] : memref<8x8x32xf32, #tpu.memory_space<vmem>>, vector<1x8x32xf32>
    %355 = vector.shape_cast %354 : vector<1x8x32xf32> to vector<8x32xf32>
    %356 = vector.shape_cast %321 : vector<8x32xf32> to vector<1x8x32xf32>
    tpu.vector_store %arg18[%353, %c0_186, %c0_187], %356 {strides = array<i32>} : memref<8x8x32xf32, #tpu.memory_space<vmem>>, vector<1x8x32xf32>,
    %357 = arith.index_cast %290 : i32 to index
    %c0_188 = arith.constant 0 : index
    %c0_189 = arith.constant 0 : index
    %358 = vector.load %arg19[%357, %c0_188, %c0_189] : memref<8x8x32xf32, #tpu.memory_space<vmem>>, vector<1x8x32xf32>
    %359 = vector.shape_cast %358 : vector<1x8x32xf32> to vector<8x32xf32>
    %360 = vector.shape_cast %352 : vector<8x32xf32> to vector<1x8x32xf32>
    tpu.vector_store %arg19[%357, %c0_188, %c0_189], %360 {strides = array<i32>} : memref<8x8x32xf32, #tpu.memory_space<vmem>>, vector<1x8x32xf32>,
    %c4_i32 = arith.constant 4 : i32
    %c7_i32_190 = arith.constant 7 : i32
    %361 = arith.subi %c7_i32_190, %c4_i32 : i32
    %362 = arith.index_cast %c4_i32 : i32 to index
    %c0_191 = arith.constant 0 : index
    %c0_192 = arith.constant 0 : index
    %363 = vector.load %arg12[%362, %c0_191, %c0_192] : memref<8x8x32xf32, #tpu.memory_space<vmem>>, vector<1x8x32xf32>
    %364 = vector.shape_cast %363 : vector<1x8x32xf32> to vector<8x32xf32>
    %365 = arith.index_cast %c4_i32 : i32 to index
    %c0_193 = arith.constant 0 : index
    %c0_194 = arith.constant 0 : index
    %366 = vector.load %arg13[%365, %c0_193, %c0_194] : memref<8x8x32xf32, #tpu.memory_space<vmem>>, vector<1x8x32xf32>
    %367 = vector.shape_cast %366 : vector<1x8x32xf32> to vector<8x32xf32>
    %368 = arith.index_cast %c4_i32 : i32 to index
    %c0_195 = arith.constant 0 : index
    %c0_196 = arith.constant 0 : index
    %369 = vector.load %arg14[%368, %c0_195, %c0_196] : memref<8x8x32xf32, #tpu.memory_space<vmem>>, vector<1x8x32xf32>
    %370 = vector.shape_cast %369 : vector<1x8x32xf32> to vector<8x32xf32>
    %cst_197 = arith.constant dense<0.000000e+00> : vector<8x32xf32>
    %371 = tpu.matmul %321, %57, %cst_197 {dimension_numbers = #tpu.dot_dimension_numbers<[1], [0], [0], [1], [0, 0, 1, 1], [], []>} : vector<8x32xf32>, vector<32x32xf32>, vector<8x32xf32> -> vector<8x32xf32>
    %cst_198 = arith.constant dense<0.000000e+00> : vector<8x32xf32>
    %372 = tpu.matmul %321, %59, %cst_198 {dimension_numbers = #tpu.dot_dimension_numbers<[1], [0], [0], [1], [0, 0, 1, 1], [], []>} : vector<8x32xf32>, vector<32x32xf32>, vector<8x32xf32> -> vector<8x32xf32>
    %cst_199 = arith.constant dense<0.000000e+00> : vector<8x32xf32>
    %373 = tpu.matmul %321, %61, %cst_199 {dimension_numbers = #tpu.dot_dimension_numbers<[1], [0], [0], [1], [0, 0, 1, 1], [], []>} : vector<8x32xf32>, vector<32x32xf32>, vector<8x32xf32> -> vector<8x32xf32>
    %374 = arith.addf %364, %371 : vector<8x32xf32>
    %375 = arith.negf %374 : vector<8x32xf32>
    %376 = math.exp %375 : vector<8x32xf32>
    %cst_200 = arith.constant 1.000000e+00 : f32
    %377 = vector.broadcast %cst_200 : f32 to vector<8x32xf32>
    %378 = arith.addf %377, %376 : vector<8x32xf32>
    %379 = arith.divf %377, %378 : vector<8x32xf32>
    %380 = arith.addf %367, %372 : vector<8x32xf32>
    %381 = arith.negf %380 : vector<8x32xf32>
    %382 = math.exp %381 : vector<8x32xf32>
    %cst_201 = arith.constant 1.000000e+00 : f32
    %383 = vector.broadcast %cst_201 : f32 to vector<8x32xf32>
    %384 = arith.addf %383, %382 : vector<8x32xf32>
    %385 = arith.divf %383, %384 : vector<8x32xf32>
    %386 = arith.addf %373, %71 : vector<8x32xf32>
    %387 = arith.mulf %379, %386 : vector<8x32xf32>
    %388 = arith.addf %370, %387 : vector<8x32xf32>
    %389 = math.tanh %388 : vector<8x32xf32>
    %390 = arith.subf %321, %389 : vector<8x32xf32>
    %391 = arith.mulf %385, %390 : vector<8x32xf32>
    %392 = arith.addf %389, %391 : vector<8x32xf32>
    %393 = arith.index_cast %361 : i32 to index
    %c0_202 = arith.constant 0 : index
    %c0_203 = arith.constant 0 : index
    %394 = vector.load %arg15[%393, %c0_202, %c0_203] : memref<8x8x32xf32, #tpu.memory_space<vmem>>, vector<1x8x32xf32>
    %395 = vector.shape_cast %394 : vector<1x8x32xf32> to vector<8x32xf32>
    %396 = arith.index_cast %361 : i32 to index
    %c0_204 = arith.constant 0 : index
    %c0_205 = arith.constant 0 : index
    %397 = vector.load %arg16[%396, %c0_204, %c0_205] : memref<8x8x32xf32, #tpu.memory_space<vmem>>, vector<1x8x32xf32>
    %398 = vector.shape_cast %397 : vector<1x8x32xf32> to vector<8x32xf32>
    %399 = arith.index_cast %361 : i32 to index
    %c0_206 = arith.constant 0 : index
    %c0_207 = arith.constant 0 : index
    %400 = vector.load %arg17[%399, %c0_206, %c0_207] : memref<8x8x32xf32, #tpu.memory_space<vmem>>, vector<1x8x32xf32>
    %401 = vector.shape_cast %400 : vector<1x8x32xf32> to vector<8x32xf32>
    %cst_208 = arith.constant dense<0.000000e+00> : vector<8x32xf32>
    %402 = tpu.matmul %352, %63, %cst_208 {dimension_numbers = #tpu.dot_dimension_numbers<[1], [0], [0], [1], [0, 0, 1, 1], [], []>} : vector<8x32xf32>, vector<32x32xf32>, vector<8x32xf32> -> vector<8x32xf32>
    %cst_209 = arith.constant dense<0.000000e+00> : vector<8x32xf32>
    %403 = tpu.matmul %352, %65, %cst_209 {dimension_numbers = #tpu.dot_dimension_numbers<[1], [0], [0], [1], [0, 0, 1, 1], [], []>} : vector<8x32xf32>, vector<32x32xf32>, vector<8x32xf32> -> vector<8x32xf32>
    %cst_210 = arith.constant dense<0.000000e+00> : vector<8x32xf32>
    %404 = tpu.matmul %352, %67, %cst_210 {dimension_numbers = #tpu.dot_dimension_numbers<[1], [0], [0], [1], [0, 0, 1, 1], [], []>} : vector<8x32xf32>, vector<32x32xf32>, vector<8x32xf32> -> vector<8x32xf32>
    %405 = arith.addf %395, %402 : vector<8x32xf32>
    %406 = arith.negf %405 : vector<8x32xf32>
    %407 = math.exp %406 : vector<8x32xf32>
    %cst_211 = arith.constant 1.000000e+00 : f32
    %408 = vector.broadcast %cst_211 : f32 to vector<8x32xf32>
    %409 = arith.addf %408, %407 : vector<8x32xf32>
    %410 = arith.divf %408, %409 : vector<8x32xf32>
    %411 = arith.addf %398, %403 : vector<8x32xf32>
    %412 = arith.negf %411 : vector<8x32xf32>
    %413 = math.exp %412 : vector<8x32xf32>
    %cst_212 = arith.constant 1.000000e+00 : f32
    %414 = vector.broadcast %cst_212 : f32 to vector<8x32xf32>
    %415 = arith.addf %414, %413 : vector<8x32xf32>
    %416 = arith.divf %414, %415 : vector<8x32xf32>
    %417 = arith.addf %404, %75 : vector<8x32xf32>
    %418 = arith.mulf %410, %417 : vector<8x32xf32>
    %419 = arith.addf %401, %418 : vector<8x32xf32>
    %420 = math.tanh %419 : vector<8x32xf32>
    %421 = arith.subf %352, %420 : vector<8x32xf32>
    %422 = arith.mulf %416, %421 : vector<8x32xf32>
    %423 = arith.addf %420, %422 : vector<8x32xf32>
    %424 = arith.index_cast %c4_i32 : i32 to index
    %c0_213 = arith.constant 0 : index
    %c0_214 = arith.constant 0 : index
    %425 = vector.load %arg18[%424, %c0_213, %c0_214] : memref<8x8x32xf32, #tpu.memory_space<vmem>>, vector<1x8x32xf32>
    %426 = vector.shape_cast %425 : vector<1x8x32xf32> to vector<8x32xf32>
    %427 = vector.shape_cast %392 : vector<8x32xf32> to vector<1x8x32xf32>
    tpu.vector_store %arg18[%424, %c0_213, %c0_214], %427 {strides = array<i32>} : memref<8x8x32xf32, #tpu.memory_space<vmem>>, vector<1x8x32xf32>,
    %428 = arith.index_cast %361 : i32 to index
    %c0_215 = arith.constant 0 : index
    %c0_216 = arith.constant 0 : index
    %429 = vector.load %arg19[%428, %c0_215, %c0_216] : memref<8x8x32xf32, #tpu.memory_space<vmem>>, vector<1x8x32xf32>
    %430 = vector.shape_cast %429 : vector<1x8x32xf32> to vector<8x32xf32>
    %431 = vector.shape_cast %423 : vector<8x32xf32> to vector<1x8x32xf32>
    tpu.vector_store %arg19[%428, %c0_215, %c0_216], %431 {strides = array<i32>} : memref<8x8x32xf32, #tpu.memory_space<vmem>>, vector<1x8x32xf32>,
    %c5_i32 = arith.constant 5 : i32
    %c7_i32_217 = arith.constant 7 : i32
    %432 = arith.subi %c7_i32_217, %c5_i32 : i32
    %433 = arith.index_cast %c5_i32 : i32 to index
    %c0_218 = arith.constant 0 : index
    %c0_219 = arith.constant 0 : index
    %434 = vector.load %arg12[%433, %c0_218, %c0_219] : memref<8x8x32xf32, #tpu.memory_space<vmem>>, vector<1x8x32xf32>
    %435 = vector.shape_cast %434 : vector<1x8x32xf32> to vector<8x32xf32>
    %436 = arith.index_cast %c5_i32 : i32 to index
    %c0_220 = arith.constant 0 : index
    %c0_221 = arith.constant 0 : index
    %437 = vector.load %arg13[%436, %c0_220, %c0_221] : memref<8x8x32xf32, #tpu.memory_space<vmem>>, vector<1x8x32xf32>
    %438 = vector.shape_cast %437 : vector<1x8x32xf32> to vector<8x32xf32>
    %439 = arith.index_cast %c5_i32 : i32 to index
    %c0_222 = arith.constant 0 : index
    %c0_223 = arith.constant 0 : index
    %440 = vector.load %arg14[%439, %c0_222, %c0_223] : memref<8x8x32xf32, #tpu.memory_space<vmem>>, vector<1x8x32xf32>
    %441 = vector.shape_cast %440 : vector<1x8x32xf32> to vector<8x32xf32>
    %cst_224 = arith.constant dense<0.000000e+00> : vector<8x32xf32>
    %442 = tpu.matmul %392, %57, %cst_224 {dimension_numbers = #tpu.dot_dimension_numbers<[1], [0], [0], [1], [0, 0, 1, 1], [], []>} : vector<8x32xf32>, vector<32x32xf32>, vector<8x32xf32> -> vector<8x32xf32>
    %cst_225 = arith.constant dense<0.000000e+00> : vector<8x32xf32>
    %443 = tpu.matmul %392, %59, %cst_225 {dimension_numbers = #tpu.dot_dimension_numbers<[1], [0], [0], [1], [0, 0, 1, 1], [], []>} : vector<8x32xf32>, vector<32x32xf32>, vector<8x32xf32> -> vector<8x32xf32>
    %cst_226 = arith.constant dense<0.000000e+00> : vector<8x32xf32>
    %444 = tpu.matmul %392, %61, %cst_226 {dimension_numbers = #tpu.dot_dimension_numbers<[1], [0], [0], [1], [0, 0, 1, 1], [], []>} : vector<8x32xf32>, vector<32x32xf32>, vector<8x32xf32> -> vector<8x32xf32>
    %445 = arith.addf %435, %442 : vector<8x32xf32>
    %446 = arith.negf %445 : vector<8x32xf32>
    %447 = math.exp %446 : vector<8x32xf32>
    %cst_227 = arith.constant 1.000000e+00 : f32
    %448 = vector.broadcast %cst_227 : f32 to vector<8x32xf32>
    %449 = arith.addf %448, %447 : vector<8x32xf32>
    %450 = arith.divf %448, %449 : vector<8x32xf32>
    %451 = arith.addf %438, %443 : vector<8x32xf32>
    %452 = arith.negf %451 : vector<8x32xf32>
    %453 = math.exp %452 : vector<8x32xf32>
    %cst_228 = arith.constant 1.000000e+00 : f32
    %454 = vector.broadcast %cst_228 : f32 to vector<8x32xf32>
    %455 = arith.addf %454, %453 : vector<8x32xf32>
    %456 = arith.divf %454, %455 : vector<8x32xf32>
    %457 = arith.addf %444, %71 : vector<8x32xf32>
    %458 = arith.mulf %450, %457 : vector<8x32xf32>
    %459 = arith.addf %441, %458 : vector<8x32xf32>
    %460 = math.tanh %459 : vector<8x32xf32>
    %461 = arith.subf %392, %460 : vector<8x32xf32>
    %462 = arith.mulf %456, %461 : vector<8x32xf32>
    %463 = arith.addf %460, %462 : vector<8x32xf32>
    %464 = arith.index_cast %432 : i32 to index
    %c0_229 = arith.constant 0 : index
    %c0_230 = arith.constant 0 : index
    %465 = vector.load %arg15[%464, %c0_229, %c0_230] : memref<8x8x32xf32, #tpu.memory_space<vmem>>, vector<1x8x32xf32>
    %466 = vector.shape_cast %465 : vector<1x8x32xf32> to vector<8x32xf32>
    %467 = arith.index_cast %432 : i32 to index
    %c0_231 = arith.constant 0 : index
    %c0_232 = arith.constant 0 : index
    %468 = vector.load %arg16[%467, %c0_231, %c0_232] : memref<8x8x32xf32, #tpu.memory_space<vmem>>, vector<1x8x32xf32>
    %469 = vector.shape_cast %468 : vector<1x8x32xf32> to vector<8x32xf32>
    %470 = arith.index_cast %432 : i32 to index
    %c0_233 = arith.constant 0 : index
    %c0_234 = arith.constant 0 : index
    %471 = vector.load %arg17[%470, %c0_233, %c0_234] : memref<8x8x32xf32, #tpu.memory_space<vmem>>, vector<1x8x32xf32>
    %472 = vector.shape_cast %471 : vector<1x8x32xf32> to vector<8x32xf32>
    %cst_235 = arith.constant dense<0.000000e+00> : vector<8x32xf32>
    %473 = tpu.matmul %423, %63, %cst_235 {dimension_numbers = #tpu.dot_dimension_numbers<[1], [0], [0], [1], [0, 0, 1, 1], [], []>} : vector<8x32xf32>, vector<32x32xf32>, vector<8x32xf32> -> vector<8x32xf32>
    %cst_236 = arith.constant dense<0.000000e+00> : vector<8x32xf32>
    %474 = tpu.matmul %423, %65, %cst_236 {dimension_numbers = #tpu.dot_dimension_numbers<[1], [0], [0], [1], [0, 0, 1, 1], [], []>} : vector<8x32xf32>, vector<32x32xf32>, vector<8x32xf32> -> vector<8x32xf32>
    %cst_237 = arith.constant dense<0.000000e+00> : vector<8x32xf32>
    %475 = tpu.matmul %423, %67, %cst_237 {dimension_numbers = #tpu.dot_dimension_numbers<[1], [0], [0], [1], [0, 0, 1, 1], [], []>} : vector<8x32xf32>, vector<32x32xf32>, vector<8x32xf32> -> vector<8x32xf32>
    %476 = arith.addf %466, %473 : vector<8x32xf32>
    %477 = arith.negf %476 : vector<8x32xf32>
    %478 = math.exp %477 : vector<8x32xf32>
    %cst_238 = arith.constant 1.000000e+00 : f32
    %479 = vector.broadcast %cst_238 : f32 to vector<8x32xf32>
    %480 = arith.addf %479, %478 : vector<8x32xf32>
    %481 = arith.divf %479, %480 : vector<8x32xf32>
    %482 = arith.addf %469, %474 : vector<8x32xf32>
    %483 = arith.negf %482 : vector<8x32xf32>
    %484 = math.exp %483 : vector<8x32xf32>
    %cst_239 = arith.constant 1.000000e+00 : f32
    %485 = vector.broadcast %cst_239 : f32 to vector<8x32xf32>
    %486 = arith.addf %485, %484 : vector<8x32xf32>
    %487 = arith.divf %485, %486 : vector<8x32xf32>
    %488 = arith.addf %475, %75 : vector<8x32xf32>
    %489 = arith.mulf %481, %488 : vector<8x32xf32>
    %490 = arith.addf %472, %489 : vector<8x32xf32>
    %491 = math.tanh %490 : vector<8x32xf32>
    %492 = arith.subf %423, %491 : vector<8x32xf32>
    %493 = arith.mulf %487, %492 : vector<8x32xf32>
    %494 = arith.addf %491, %493 : vector<8x32xf32>
    %495 = arith.index_cast %c5_i32 : i32 to index
    %c0_240 = arith.constant 0 : index
    %c0_241 = arith.constant 0 : index
    %496 = vector.load %arg18[%495, %c0_240, %c0_241] : memref<8x8x32xf32, #tpu.memory_space<vmem>>, vector<1x8x32xf32>
    %497 = vector.shape_cast %496 : vector<1x8x32xf32> to vector<8x32xf32>
    %498 = vector.shape_cast %463 : vector<8x32xf32> to vector<1x8x32xf32>
    tpu.vector_store %arg18[%495, %c0_240, %c0_241], %498 {strides = array<i32>} : memref<8x8x32xf32, #tpu.memory_space<vmem>>, vector<1x8x32xf32>,
    %499 = arith.index_cast %432 : i32 to index
    %c0_242 = arith.constant 0 : index
    %c0_243 = arith.constant 0 : index
    %500 = vector.load %arg19[%499, %c0_242, %c0_243] : memref<8x8x32xf32, #tpu.memory_space<vmem>>, vector<1x8x32xf32>
    %501 = vector.shape_cast %500 : vector<1x8x32xf32> to vector<8x32xf32>
    %502 = vector.shape_cast %494 : vector<8x32xf32> to vector<1x8x32xf32>
    tpu.vector_store %arg19[%499, %c0_242, %c0_243], %502 {strides = array<i32>} : memref<8x8x32xf32, #tpu.memory_space<vmem>>, vector<1x8x32xf32>,
    %c6_i32 = arith.constant 6 : i32
    %c7_i32_244 = arith.constant 7 : i32
    %503 = arith.subi %c7_i32_244, %c6_i32 : i32
    %504 = arith.index_cast %c6_i32 : i32 to index
    %c0_245 = arith.constant 0 : index
    %c0_246 = arith.constant 0 : index
    %505 = vector.load %arg12[%504, %c0_245, %c0_246] : memref<8x8x32xf32, #tpu.memory_space<vmem>>, vector<1x8x32xf32>
    %506 = vector.shape_cast %505 : vector<1x8x32xf32> to vector<8x32xf32>
    %507 = arith.index_cast %c6_i32 : i32 to index
    %c0_247 = arith.constant 0 : index
    %c0_248 = arith.constant 0 : index
    %508 = vector.load %arg13[%507, %c0_247, %c0_248] : memref<8x8x32xf32, #tpu.memory_space<vmem>>, vector<1x8x32xf32>
    %509 = vector.shape_cast %508 : vector<1x8x32xf32> to vector<8x32xf32>
    %510 = arith.index_cast %c6_i32 : i32 to index
    %c0_249 = arith.constant 0 : index
    %c0_250 = arith.constant 0 : index
    %511 = vector.load %arg14[%510, %c0_249, %c0_250] : memref<8x8x32xf32, #tpu.memory_space<vmem>>, vector<1x8x32xf32>
    %512 = vector.shape_cast %511 : vector<1x8x32xf32> to vector<8x32xf32>
    %cst_251 = arith.constant dense<0.000000e+00> : vector<8x32xf32>
    %513 = tpu.matmul %463, %57, %cst_251 {dimension_numbers = #tpu.dot_dimension_numbers<[1], [0], [0], [1], [0, 0, 1, 1], [], []>} : vector<8x32xf32>, vector<32x32xf32>, vector<8x32xf32> -> vector<8x32xf32>
    %cst_252 = arith.constant dense<0.000000e+00> : vector<8x32xf32>
    %514 = tpu.matmul %463, %59, %cst_252 {dimension_numbers = #tpu.dot_dimension_numbers<[1], [0], [0], [1], [0, 0, 1, 1], [], []>} : vector<8x32xf32>, vector<32x32xf32>, vector<8x32xf32> -> vector<8x32xf32>
    %cst_253 = arith.constant dense<0.000000e+00> : vector<8x32xf32>
    %515 = tpu.matmul %463, %61, %cst_253 {dimension_numbers = #tpu.dot_dimension_numbers<[1], [0], [0], [1], [0, 0, 1, 1], [], []>} : vector<8x32xf32>, vector<32x32xf32>, vector<8x32xf32> -> vector<8x32xf32>
    %516 = arith.addf %506, %513 : vector<8x32xf32>
    %517 = arith.negf %516 : vector<8x32xf32>
    %518 = math.exp %517 : vector<8x32xf32>
    %cst_254 = arith.constant 1.000000e+00 : f32
    %519 = vector.broadcast %cst_254 : f32 to vector<8x32xf32>
    %520 = arith.addf %519, %518 : vector<8x32xf32>
    %521 = arith.divf %519, %520 : vector<8x32xf32>
    %522 = arith.addf %509, %514 : vector<8x32xf32>
    %523 = arith.negf %522 : vector<8x32xf32>
    %524 = math.exp %523 : vector<8x32xf32>
    %cst_255 = arith.constant 1.000000e+00 : f32
    %525 = vector.broadcast %cst_255 : f32 to vector<8x32xf32>
    %526 = arith.addf %525, %524 : vector<8x32xf32>
    %527 = arith.divf %525, %526 : vector<8x32xf32>
    %528 = arith.addf %515, %71 : vector<8x32xf32>
    %529 = arith.mulf %521, %528 : vector<8x32xf32>
    %530 = arith.addf %512, %529 : vector<8x32xf32>
    %531 = math.tanh %530 : vector<8x32xf32>
    %532 = arith.subf %463, %531 : vector<8x32xf32>
    %533 = arith.mulf %527, %532 : vector<8x32xf32>
    %534 = arith.addf %531, %533 : vector<8x32xf32>
    %535 = arith.index_cast %503 : i32 to index
    %c0_256 = arith.constant 0 : index
    %c0_257 = arith.constant 0 : index
    %536 = vector.load %arg15[%535, %c0_256, %c0_257] : memref<8x8x32xf32, #tpu.memory_space<vmem>>, vector<1x8x32xf32>
    %537 = vector.shape_cast %536 : vector<1x8x32xf32> to vector<8x32xf32>
    %538 = arith.index_cast %503 : i32 to index
    %c0_258 = arith.constant 0 : index
    %c0_259 = arith.constant 0 : index
    %539 = vector.load %arg16[%538, %c0_258, %c0_259] : memref<8x8x32xf32, #tpu.memory_space<vmem>>, vector<1x8x32xf32>
    %540 = vector.shape_cast %539 : vector<1x8x32xf32> to vector<8x32xf32>
    %541 = arith.index_cast %503 : i32 to index
    %c0_260 = arith.constant 0 : index
    %c0_261 = arith.constant 0 : index
    %542 = vector.load %arg17[%541, %c0_260, %c0_261] : memref<8x8x32xf32, #tpu.memory_space<vmem>>, vector<1x8x32xf32>
    %543 = vector.shape_cast %542 : vector<1x8x32xf32> to vector<8x32xf32>
    %cst_262 = arith.constant dense<0.000000e+00> : vector<8x32xf32>
    %544 = tpu.matmul %494, %63, %cst_262 {dimension_numbers = #tpu.dot_dimension_numbers<[1], [0], [0], [1], [0, 0, 1, 1], [], []>} : vector<8x32xf32>, vector<32x32xf32>, vector<8x32xf32> -> vector<8x32xf32>
    %cst_263 = arith.constant dense<0.000000e+00> : vector<8x32xf32>
    %545 = tpu.matmul %494, %65, %cst_263 {dimension_numbers = #tpu.dot_dimension_numbers<[1], [0], [0], [1], [0, 0, 1, 1], [], []>} : vector<8x32xf32>, vector<32x32xf32>, vector<8x32xf32> -> vector<8x32xf32>
    %cst_264 = arith.constant dense<0.000000e+00> : vector<8x32xf32>
    %546 = tpu.matmul %494, %67, %cst_264 {dimension_numbers = #tpu.dot_dimension_numbers<[1], [0], [0], [1], [0, 0, 1, 1], [], []>} : vector<8x32xf32>, vector<32x32xf32>, vector<8x32xf32> -> vector<8x32xf32>
    %547 = arith.addf %537, %544 : vector<8x32xf32>
    %548 = arith.negf %547 : vector<8x32xf32>
    %549 = math.exp %548 : vector<8x32xf32>
    %cst_265 = arith.constant 1.000000e+00 : f32
    %550 = vector.broadcast %cst_265 : f32 to vector<8x32xf32>
    %551 = arith.addf %550, %549 : vector<8x32xf32>
    %552 = arith.divf %550, %551 : vector<8x32xf32>
    %553 = arith.addf %540, %545 : vector<8x32xf32>
    %554 = arith.negf %553 : vector<8x32xf32>
    %555 = math.exp %554 : vector<8x32xf32>
    %cst_266 = arith.constant 1.000000e+00 : f32
    %556 = vector.broadcast %cst_266 : f32 to vector<8x32xf32>
    %557 = arith.addf %556, %555 : vector<8x32xf32>
    %558 = arith.divf %556, %557 : vector<8x32xf32>
    %559 = arith.addf %546, %75 : vector<8x32xf32>
    %560 = arith.mulf %552, %559 : vector<8x32xf32>
    %561 = arith.addf %543, %560 : vector<8x32xf32>
    %562 = math.tanh %561 : vector<8x32xf32>
    %563 = arith.subf %494, %562 : vector<8x32xf32>
    %564 = arith.mulf %558, %563 : vector<8x32xf32>
    %565 = arith.addf %562, %564 : vector<8x32xf32>
    %566 = arith.index_cast %c6_i32 : i32 to index
    %c0_267 = arith.constant 0 : index
    %c0_268 = arith.constant 0 : index
    %567 = vector.load %arg18[%566, %c0_267, %c0_268] : memref<8x8x32xf32, #tpu.memory_space<vmem>>, vector<1x8x32xf32>
    %568 = vector.shape_cast %567 : vector<1x8x32xf32> to vector<8x32xf32>
    %569 = vector.shape_cast %534 : vector<8x32xf32> to vector<1x8x32xf32>
    tpu.vector_store %arg18[%566, %c0_267, %c0_268], %569 {strides = array<i32>} : memref<8x8x32xf32, #tpu.memory_space<vmem>>, vector<1x8x32xf32>,
    %570 = arith.index_cast %503 : i32 to index
    %c0_269 = arith.constant 0 : index
    %c0_270 = arith.constant 0 : index
    %571 = vector.load %arg19[%570, %c0_269, %c0_270] : memref<8x8x32xf32, #tpu.memory_space<vmem>>, vector<1x8x32xf32>
    %572 = vector.shape_cast %571 : vector<1x8x32xf32> to vector<8x32xf32>
    %573 = vector.shape_cast %565 : vector<8x32xf32> to vector<1x8x32xf32>
    tpu.vector_store %arg19[%570, %c0_269, %c0_270], %573 {strides = array<i32>} : memref<8x8x32xf32, #tpu.memory_space<vmem>>, vector<1x8x32xf32>,
    %c7_i32_271 = arith.constant 7 : i32
    %c7_i32_272 = arith.constant 7 : i32
    %574 = arith.subi %c7_i32_272, %c7_i32_271 : i32
    %575 = arith.index_cast %c7_i32_271 : i32 to index
    %c0_273 = arith.constant 0 : index
    %c0_274 = arith.constant 0 : index
    %576 = vector.load %arg12[%575, %c0_273, %c0_274] : memref<8x8x32xf32, #tpu.memory_space<vmem>>, vector<1x8x32xf32>
    %577 = vector.shape_cast %576 : vector<1x8x32xf32> to vector<8x32xf32>
    %578 = arith.index_cast %c7_i32_271 : i32 to index
    %c0_275 = arith.constant 0 : index
    %c0_276 = arith.constant 0 : index
    %579 = vector.load %arg13[%578, %c0_275, %c0_276] : memref<8x8x32xf32, #tpu.memory_space<vmem>>, vector<1x8x32xf32>
    %580 = vector.shape_cast %579 : vector<1x8x32xf32> to vector<8x32xf32>
    %581 = arith.index_cast %c7_i32_271 : i32 to index
    %c0_277 = arith.constant 0 : index
    %c0_278 = arith.constant 0 : index
    %582 = vector.load %arg14[%581, %c0_277, %c0_278] : memref<8x8x32xf32, #tpu.memory_space<vmem>>, vector<1x8x32xf32>
    %583 = vector.shape_cast %582 : vector<1x8x32xf32> to vector<8x32xf32>
    %cst_279 = arith.constant dense<0.000000e+00> : vector<8x32xf32>
    %584 = tpu.matmul %534, %57, %cst_279 {dimension_numbers = #tpu.dot_dimension_numbers<[1], [0], [0], [1], [0, 0, 1, 1], [], []>} : vector<8x32xf32>, vector<32x32xf32>, vector<8x32xf32> -> vector<8x32xf32>
    %cst_280 = arith.constant dense<0.000000e+00> : vector<8x32xf32>
    %585 = tpu.matmul %534, %59, %cst_280 {dimension_numbers = #tpu.dot_dimension_numbers<[1], [0], [0], [1], [0, 0, 1, 1], [], []>} : vector<8x32xf32>, vector<32x32xf32>, vector<8x32xf32> -> vector<8x32xf32>
    %cst_281 = arith.constant dense<0.000000e+00> : vector<8x32xf32>
    %586 = tpu.matmul %534, %61, %cst_281 {dimension_numbers = #tpu.dot_dimension_numbers<[1], [0], [0], [1], [0, 0, 1, 1], [], []>} : vector<8x32xf32>, vector<32x32xf32>, vector<8x32xf32> -> vector<8x32xf32>
    %587 = arith.addf %577, %584 : vector<8x32xf32>
    %588 = arith.negf %587 : vector<8x32xf32>
    %589 = math.exp %588 : vector<8x32xf32>
    %cst_282 = arith.constant 1.000000e+00 : f32
    %590 = vector.broadcast %cst_282 : f32 to vector<8x32xf32>
    %591 = arith.addf %590, %589 : vector<8x32xf32>
    %592 = arith.divf %590, %591 : vector<8x32xf32>
    %593 = arith.addf %580, %585 : vector<8x32xf32>
    %594 = arith.negf %593 : vector<8x32xf32>
    %595 = math.exp %594 : vector<8x32xf32>
    %cst_283 = arith.constant 1.000000e+00 : f32
    %596 = vector.broadcast %cst_283 : f32 to vector<8x32xf32>
    %597 = arith.addf %596, %595 : vector<8x32xf32>
    %598 = arith.divf %596, %597 : vector<8x32xf32>
    %599 = arith.addf %586, %71 : vector<8x32xf32>
    %600 = arith.mulf %592, %599 : vector<8x32xf32>
    %601 = arith.addf %583, %600 : vector<8x32xf32>
    %602 = math.tanh %601 : vector<8x32xf32>
    %603 = arith.subf %534, %602 : vector<8x32xf32>
    %604 = arith.mulf %598, %603 : vector<8x32xf32>
    %605 = arith.addf %602, %604 : vector<8x32xf32>
    %606 = arith.index_cast %574 : i32 to index
    %c0_284 = arith.constant 0 : index
    %c0_285 = arith.constant 0 : index
    %607 = vector.load %arg15[%606, %c0_284, %c0_285] : memref<8x8x32xf32, #tpu.memory_space<vmem>>, vector<1x8x32xf32>
    %608 = vector.shape_cast %607 : vector<1x8x32xf32> to vector<8x32xf32>
    %609 = arith.index_cast %574 : i32 to index
    %c0_286 = arith.constant 0 : index
    %c0_287 = arith.constant 0 : index
    %610 = vector.load %arg16[%609, %c0_286, %c0_287] : memref<8x8x32xf32, #tpu.memory_space<vmem>>, vector<1x8x32xf32>
    %611 = vector.shape_cast %610 : vector<1x8x32xf32> to vector<8x32xf32>
    %612 = arith.index_cast %574 : i32 to index
    %c0_288 = arith.constant 0 : index
    %c0_289 = arith.constant 0 : index
    %613 = vector.load %arg17[%612, %c0_288, %c0_289] : memref<8x8x32xf32, #tpu.memory_space<vmem>>, vector<1x8x32xf32>
    %614 = vector.shape_cast %613 : vector<1x8x32xf32> to vector<8x32xf32>
    %cst_290 = arith.constant dense<0.000000e+00> : vector<8x32xf32>
    %615 = tpu.matmul %565, %63, %cst_290 {dimension_numbers = #tpu.dot_dimension_numbers<[1], [0], [0], [1], [0, 0, 1, 1], [], []>} : vector<8x32xf32>, vector<32x32xf32>, vector<8x32xf32> -> vector<8x32xf32>
    %cst_291 = arith.constant dense<0.000000e+00> : vector<8x32xf32>
    %616 = tpu.matmul %565, %65, %cst_291 {dimension_numbers = #tpu.dot_dimension_numbers<[1], [0], [0], [1], [0, 0, 1, 1], [], []>} : vector<8x32xf32>, vector<32x32xf32>, vector<8x32xf32> -> vector<8x32xf32>
    %cst_292 = arith.constant dense<0.000000e+00> : vector<8x32xf32>
    %617 = tpu.matmul %565, %67, %cst_292 {dimension_numbers = #tpu.dot_dimension_numbers<[1], [0], [0], [1], [0, 0, 1, 1], [], []>} : vector<8x32xf32>, vector<32x32xf32>, vector<8x32xf32> -> vector<8x32xf32>
    %618 = arith.addf %608, %615 : vector<8x32xf32>
    %619 = arith.negf %618 : vector<8x32xf32>
    %620 = math.exp %619 : vector<8x32xf32>
    %cst_293 = arith.constant 1.000000e+00 : f32
    %621 = vector.broadcast %cst_293 : f32 to vector<8x32xf32>
    %622 = arith.addf %621, %620 : vector<8x32xf32>
    %623 = arith.divf %621, %622 : vector<8x32xf32>
    %624 = arith.addf %611, %616 : vector<8x32xf32>
    %625 = arith.negf %624 : vector<8x32xf32>
    %626 = math.exp %625 : vector<8x32xf32>
    %cst_294 = arith.constant 1.000000e+00 : f32
    %627 = vector.broadcast %cst_294 : f32 to vector<8x32xf32>
    %628 = arith.addf %627, %626 : vector<8x32xf32>
    %629 = arith.divf %627, %628 : vector<8x32xf32>
    %630 = arith.addf %617, %75 : vector<8x32xf32>
    %631 = arith.mulf %623, %630 : vector<8x32xf32>
    %632 = arith.addf %614, %631 : vector<8x32xf32>
    %633 = math.tanh %632 : vector<8x32xf32>
    %634 = arith.subf %565, %633 : vector<8x32xf32>
    %635 = arith.mulf %629, %634 : vector<8x32xf32>
    %636 = arith.addf %633, %635 : vector<8x32xf32>
    %637 = arith.index_cast %c7_i32_271 : i32 to index
    %c0_295 = arith.constant 0 : index
    %c0_296 = arith.constant 0 : index
    %638 = vector.load %arg18[%637, %c0_295, %c0_296] : memref<8x8x32xf32, #tpu.memory_space<vmem>>, vector<1x8x32xf32>
    %639 = vector.shape_cast %638 : vector<1x8x32xf32> to vector<8x32xf32>
    %640 = vector.shape_cast %605 : vector<8x32xf32> to vector<1x8x32xf32>
    tpu.vector_store %arg18[%637, %c0_295, %c0_296], %640 {strides = array<i32>} : memref<8x8x32xf32, #tpu.memory_space<vmem>>, vector<1x8x32xf32>,
    %641 = arith.index_cast %574 : i32 to index
    %c0_297 = arith.constant 0 : index
    %c0_298 = arith.constant 0 : index
    %642 = vector.load %arg19[%641, %c0_297, %c0_298] : memref<8x8x32xf32, #tpu.memory_space<vmem>>, vector<1x8x32xf32>
    %643 = vector.shape_cast %642 : vector<1x8x32xf32> to vector<8x32xf32>
    %644 = vector.shape_cast %636 : vector<8x32xf32> to vector<1x8x32xf32>
    tpu.vector_store %arg19[%641, %c0_297, %c0_298], %644 {strides = array<i32>} : memref<8x8x32xf32, #tpu.memory_space<vmem>>, vector<1x8x32xf32>,
    %c8_i32 = arith.constant 8 : i32
    %c0_299 = arith.constant 0 : index
    %c0_300 = arith.constant 0 : index
    %c0_301 = arith.constant 0 : index
    %645 = vector.load %arg18[%c0_299, %c0_300, %c0_301] : memref<8x8x32xf32, #tpu.memory_space<vmem>>, vector<8x8x32xf32>
    %c0_302 = arith.constant 0 : index
    %c0_303 = arith.constant 0 : index
    %c0_304 = arith.constant 0 : index
    %646 = vector.load %arg1[%c0_302, %c0_303, %c0_304] : memref<8x8x1xf32, #tpu.memory_space<vmem>>, vector<8x8x1xf32>
    %647 = vector.broadcast %646 : vector<8x8x1xf32> to vector<8x8x32xf32>
    %648 = arith.mulf %645, %647 : vector<8x8x32xf32>
    %649 = vector.shape_cast %648 : vector<8x8x32xf32> to vector<64x32xf32>
    %c0_305 = arith.constant 0 : index
    %c0_306 = arith.constant 0 : index
    %c0_307 = arith.constant 0 : index
    %650 = vector.load %arg19[%c0_305, %c0_306, %c0_307] : memref<8x8x32xf32, #tpu.memory_space<vmem>>, vector<8x8x32xf32>
    %c0_308 = arith.constant 0 : index
    %c0_309 = arith.constant 0 : index
    %c0_310 = arith.constant 0 : index
    %651 = vector.load %arg1[%c0_308, %c0_309, %c0_310] : memref<8x8x1xf32, #tpu.memory_space<vmem>>, vector<8x8x1xf32>
    %652 = vector.broadcast %651 : vector<8x8x1xf32> to vector<8x8x32xf32>
    %653 = arith.mulf %650, %652 : vector<8x8x32xf32>
    %654 = vector.shape_cast %653 : vector<8x8x32xf32> to vector<64x32xf32>
    %c0_311 = arith.constant 0 : index
    %c0_312 = arith.constant 0 : index
    %655 = vector.load %arg8[%c0_311, %c0_312] : memref<32x32xf32, #tpu.memory_space<vmem>>, vector<32x32xf32>
    %cst_313 = arith.constant dense<0.000000e+00> : vector<64x32xf32>
    %656 = tpu.matmul %649, %655, %cst_313 {dimension_numbers = #tpu.dot_dimension_numbers<[1], [0], [0], [1], [0, 0, 1, 1], [], []>} : vector<64x32xf32>, vector<32x32xf32>, vector<64x32xf32> -> vector<64x32xf32>
    %c0_314 = arith.constant 0 : index
    %c0_315 = arith.constant 0 : index
    %657 = vector.load %arg9[%c0_314, %c0_315] : memref<32x32xf32, #tpu.memory_space<vmem>>, vector<32x32xf32>
    %cst_316 = arith.constant dense<0.000000e+00> : vector<64x32xf32>
    %658 = tpu.matmul %654, %657, %cst_316 {dimension_numbers = #tpu.dot_dimension_numbers<[1], [0], [0], [1], [0, 0, 1, 1], [], []>} : vector<64x32xf32>, vector<32x32xf32>, vector<64x32xf32> -> vector<64x32xf32>
    %659 = arith.addf %656, %658 : vector<64x32xf32>
    %c0_317 = arith.constant 0 : index
    %c0_318 = arith.constant 0 : index
    %660 = vector.load %arg10[%c0_317, %c0_318] : memref<1x32xf32, #tpu.memory_space<vmem>>, vector<1x32xf32>
    %661 = vector.broadcast %660 : vector<1x32xf32> to vector<64x32xf32>
    %662 = arith.addf %659, %661 : vector<64x32xf32>
    %663 = vector.shape_cast %662 : vector<64x32xf32> to vector<8x8x32xf32>
    %664 = tpu.iota {dimensions = array<i32: 1>} : vector<1x8x1xi32>
    %c4_i32_319 = arith.constant 4 : i32
    %665 = vector.broadcast %c4_i32_319 : i32 to vector<1x8x1xi32>
    %666 = arith.cmpi slt, %664, %665 : vector<1x8x1xi32>
    %cst_320 = arith.constant -3.40282347E+38 : f32
    %667 = vector.shape_cast %666 : vector<1x8x1xi1> to vector<1x8x1xi1>
    %668 = vector.broadcast %667 : vector<1x8x1xi1> to vector<8x8x32xi1>
    %669 = vector.broadcast %cst_320 : f32 to vector<8x8x32xf32>
    %670 = arith.select %668, %663, %669 : vector<8x8x32xi1>, vector<8x8x32xf32>
    %cst_321 = arith.constant dense<0xFF800000> : vector<8x32xf32>
    %671 = vector.multi_reduction <maximumf>, %670, %cst_321 [1] : vector<8x8x32xf32> to vector<8x32xf32>
    %c0_322 = arith.constant 0 : index
    %c0_323 = arith.constant 0 : index
    %672 = vector.load %arg11[%c0_322, %c0_323] : memref<8x32xf32, #tpu.memory_space<vmem>>, vector<8x32xf32>
    tpu.vector_store %arg11[%c0_322, %c0_323], %671 {strides = array<i32>} : memref<8x32xf32, #tpu.memory_space<vmem>>, vector<8x32xf32>,
    return
  }
}

</mosaic_0001>

<bundles_post_ra>
// kernel: tpu_custom_call.1
= control target key start
LH: loop header
LB: loop body
LE: loop exit
PB: predicated region body
PF: predicated region fallthrough
CT: control target
= control target key end

     0   :  { %16 = vsyncpa [#allocation11], 0  ;;  %s7981_s0 = inlined_call_operand.vmem [shape: f32[8,8,32], index: 0, kind: input, shape index: {}]   ;;  %s7982_s1 = inlined_call_operand.vmem [shape: f32[8,8,1], index: 1, kind: input, shape index: {}]   ;;  %s7983_s2 = inlined_call_operand.hbm [shape: f32[3,32,32], index: 2, kind: input, shape index: {}]   ;;  %s7984_s3 = inlined_call_operand.hbm [shape: f32[3,32,32], index: 3, kind: input, shape index: {}]   ;;  %s7985_s4 = inlined_call_operand.vmem [shape: f32[4,1,32], index: 4, kind: input, shape index: {}]   ;;  %s7986_s5 = inlined_call_operand.hbm [shape: f32[3,32,32], index: 5, kind: input, shape index: {}]   ;;  %s7987_s6 = inlined_call_operand.hbm [shape: f32[3,32,32], index: 6, kind: input, shape index: {}]   ;;  %s7988_s7 = inlined_call_operand.vmem [shape: f32[4,1,32], index: 7, kind: input, shape index: {}]   ;;  %s7989_s8 = inlined_call_operand.hbm [shape: f32[32,32], index: 8, kind: input, shape index: {}]   ;;  %s7990_s9 = inlined_call_operand.hbm [shape: f32[32,32], index: 9, kind: input, shape index: {}]   ;;  %s7991_s10 = inlined_call_operand.vmem [shape: f32[1,32], index: 10, kind: input, shape index: {}]   ;;  %s7992_s11 = inlined_call_operand.hbm [shape: f32[8,32], index: 11, kind: output, shape index: {}]  }
   0x1   :  { %17 = vsyncpa [#allocation14], 0 }
   0x2   :  { %18 = vsyncpa [#allocation17], 0 }
   0x3   :  { %19 = vsyncpa [#allocation20], 0 }
   0x4   :  { %20 = vsyncpa [#allocation12], 0  ;;  %s6794_s17 = smov [#allocation13]   ;;  %s6795_s19 = smov [#allocation16]  }
   0x5   :  { %s42_s18 = sshll.u32 %s6794_s17, 4  ;;  %s68_s20 = sshll.u32 %s6795_s19, 4  ;;  %s43_s18 = int_to_ptr.vmem [resolvable:$true] %s42_s18  ;;  %s69_s20 = int_to_ptr.vmem [resolvable:$true] %s68_s20 }
   0x6   :  { %s6652_s21 = scalar_lea.vmem %s43_s18, 1536  ;;  %p6657_p1 = scmp.lt.s32.totalorder %s43_s18, %s43_s18 }
   0x7   :  { %p6653_p0 = scmp.ne.s32.totalorder %s43_s18, %s6652_s21  ;;  %p6658_p2 = scmp.lt.s32.totalorder %s6652_s21, %s6652_s21 }
   0x9   :  { %p6659_p3 = por %p6658_p2, %p6657_p1 }
   0xb   :  { %p6660_p4 = pnand %p6659_p3, %p6653_p0 }
   0xd   :  { %6663 = shalt.err (!%p6660_p4)
}
   0xe   :  { %s6796_s22 = smov 128   ;;  %s6797_s23 = smov 8  }
   0xf   :  { %48 = dma.hbm_to_vmem [thread:$0]  %s7984_s3, 1536, %s43_s18, [#allocation14], %s6796_s22, %s6796_s22, %s6797_s23  }
  0x10   :  { %s6672_s26 = scalar_lea.vmem %s69_s20, 1536  ;;  %p6677_p6 = scmp.lt.s32.totalorder %s69_s20, %s69_s20 }
  0x11   :  { %p6673_p5 = scmp.ne.s32.totalorder %s69_s20, %s6672_s26  ;;  %p6678_p7 = scmp.lt.s32.totalorder %s6672_s26, %s6672_s26 }
  0x13   :  { %p6679_p8 = por %p6678_p7, %p6677_p6 }
  0x15   :  { %p6680_p9 = pnand %p6679_p8, %p6673_p5 }
  0x17   :  { %6683 = shalt.err (!%p6680_p9)
}
  0x18   :  { %74 = dma.hbm_to_vmem [thread:$0]  %s7987_s6, 1536, %s69_s20, [#allocation17], %s6796_s22, %s6796_s22, %s6797_s23  }
  0x19   :  { %s6798_s29 = smov [#allocation10]   ;;  %s6799_s12 = smov [#allocation15]  }
  0x1a   :  { %s30_s30 = sshll.u32 %s6798_s29, 4  ;;  %s56_s13 = sshll.u32 %s6799_s12, 4  ;;  %s31_s30 = int_to_ptr.vmem [resolvable:$true] %s30_s30  ;;  %s57_s13 = int_to_ptr.vmem [resolvable:$true] %s56_s13 }
  0x1b   :  { %s6692_s3 = scalar_lea.vmem %s31_s30, 1536  ;;  %p6697_p11 = scmp.lt.s32.totalorder %s31_s30, %s31_s30 }
  0x1c   :  { %p6693_p10 = scmp.ne.s32.totalorder %s31_s30, %s6692_s3  ;;  %p6698_p12 = scmp.lt.s32.totalorder %s6692_s3, %s6692_s3 }
  0x1e   :  { %p6699_p13 = por %p6698_p12, %p6697_p11 }
  0x20   :  { %p6700_p0 = pnand %p6699_p13, %p6693_p10 }
  0x22   :  { %6703 = shalt.err (!%p6700_p0)
}
  0x23   :  { %36 = dma.hbm_to_vmem [thread:$0]  %s7983_s2, 1536, %s31_s30, [#allocation11], %s6796_s22, %s6796_s22, %s6797_s23  }
  0x24   :  { %s6712_s6 = scalar_lea.vmem %s57_s13, 1536  ;;  %p6717_p2 = scmp.lt.s32.totalorder %s57_s13, %s57_s13 }
  0x25   :  { %p6713_p1 = scmp.ne.s32.totalorder %s57_s13, %s6712_s6  ;;  %p6718_p3 = scmp.lt.s32.totalorder %s6712_s6, %s6712_s6 }
  0x27   :  { %p6719_p4 = por %p6718_p3, %p6717_p2 }
  0x29   :  { %p6720_p5 = pnand %p6719_p4, %p6713_p1 }
  0x2b   :  { %6723 = shalt.err (!%p6720_p5)
}
  0x2c   :  { %62 = dma.hbm_to_vmem [thread:$0]  %s7986_s5, 1536, %s57_s13, [#allocation14], %s6796_s22, %s6796_s22, %s6797_s23  }
  0x2d   :  { %s6800_s18 = smov [#allocation18]   ;;  %s6801_s20 = smov [#allocation19]  }
  0x2e   :  { %s82_s19 = sshll.u32 %s6800_s18, 4  ;;  %s94_s21 = sshll.u32 %s6801_s20, 4  ;;  %s83_s19 = int_to_ptr.vmem [resolvable:$true] %s82_s19  ;;  %s95_s21 = int_to_ptr.vmem [resolvable:$true] %s94_s21 }
  0x2f   :  { %s6732_s2 = scalar_lea.vmem %s83_s19, 512  ;;  %p6737_p7 = scmp.lt.s32.totalorder %s83_s19, %s83_s19 }
  0x30   :  { %p6733_p6 = scmp.ne.s32.totalorder %s83_s19, %s6732_s2  ;;  %p6738_p8 = scmp.lt.s32.totalorder %s6732_s2, %s6732_s2 }
  0x32   :  { %p6739_p9 = por %p6738_p8, %p6737_p7 }
  0x34   :  { %p6740_p10 = pnand %p6739_p9, %p6733_p6 }
  0x36   :  { %6743 = shalt.err (!%p6740_p10)
}
  0x37   :  { %88 = dma.hbm_to_vmem [thread:$0]  %s7989_s8, 512, %s83_s19, [#allocation17], %s6796_s22, %s6796_s22, %s6797_s23  }
  0x38   :  { %s6752_s5 = scalar_lea.vmem %s95_s21, 512  ;;  %p6757_p12 = scmp.lt.s32.totalorder %s95_s21, %s95_s21 }
  0x39   :  { %p6753_p11 = scmp.ne.s32.totalorder %s95_s21, %s6752_s5  ;;  %p6758_p13 = scmp.lt.s32.totalorder %s6752_s5, %s6752_s5 }
  0x3b   :  { %p6759_p0 = por %p6758_p13, %p6757_p12 }
  0x3d   :  { %p6760_p1 = pnand %p6759_p0, %p6753_p11 }
  0x3f   :  { %6763 = shalt.err (!%p6760_p1)
}
  0x40   :  { %100 = dma.hbm_to_vmem [thread:$0]  %s7990_s9, 512, %s95_s21, [#allocation20], %s6796_s22, %s6796_s22, %s6797_s23  }
  0x41   :  { %6784 = dma.done.wait [#allocation11], 1536  }
  0x42   :  { %6785 = vsyncadd [#allocation11], 4294965760 }
  0x43   :  { %6786 = dma.done.wait [#allocation14], 3072  }
  0x44   :  { %6787 = vsyncadd [#allocation14], 4294964224 }
  0x45   :  { %6788 = dma.done.wait [#allocation17], 2048  }
  0x46   :  { %6789 = vsyncadd [#allocation17], 4294965248 }
  0x47   :  { %6790 = dma.done.wait [#allocation20], 512  }
  0x48   :  { %6791 = vsyncadd [#allocation20], 4294966784  ;;  %v6802_v0 = vmov 0   ;;  %v132_v1 = vld [vmem:[#allocation10 + $0x18] sm:$0xff]  ;;  %v131_v3 = vld [vmem:[#allocation10 + $0x10] sm:$0xff]  ;;  %vm140_vm0 = vcmask 261120  }
  0x49   :  { %6457 = vset.pattern.permute.xlu1 %v6802_v0  ;;  %6456 = vset.pattern.permute.xlu0 %v6802_v0  ;;  %v282_v2 = vld [vmem:[#allocation10 + $0x38] sm:$0xff]  ;;  %v281_v4 = vld [vmem:[#allocation10 + $0x30] sm:$0xff]  ;;  %v130_v5 = vld [vmem:[#allocation10 + $0x8] sm:$0xff]  ;;  %v6803_v35 = vmov 0.0   ;;  %vm6804_vm1 = vmmov 0   ;;  %vm5233_vm3 = vcmask 1041409  }
  0x4a   :  { %5756 = vmatprep.subr.mxu0 %v132_v1  ;;  %5776 = vmatprep.subr.mxu1 %v282_v2  ;;  %v280_v6 = vld [vmem:[#allocation10 + $0x28] sm:$0xff]  ;;  %v129_v7 = vld [vmem:[#allocation10] sm:$0xff]  ;;  %v408_v11 = vld [vmem:[#allocation10 + $0x58] sm:$0xff]  ;;  %vm5235_vm4 = vcmask 1042434   ;;  %vm5237_vm5 = vcmask 1043459   ;;  %vm5239_vm6 = vcmask 1044484  }
  0x4b   :  { %5757 = vmatpush3.msra.mxu0 %v132_v1  ;;  %5777 = vmatpush3.msra.mxu1 %v282_v2  ;;  %v279_v8 = vld [vmem:[#allocation10 + $0x20] sm:$0xff]  ;;  %v6910_v10 = vld [vmem:[%s7981_s0 + $0x8] sm:$0xff]  ;;  %v533_v12 = vld [vmem:[#allocation15 + $0x18] sm:$0xff]  ;;  %vm5241_vm7 = vcmask 1045509   ;;  %vm5243_vm8 = vcmask 1046534   ;;  %vm5245_vm9 = vcmask 1047559  }
  0x4c   :  { %5758 = vmatprep.subr.mxu0 %v131_v3  ;;  %5778 = vmatprep.subr.mxu1 %v281_v4  ;;  %v6905_v9 = vld [vmem:[%s7981_s0] sm:$0xff]  ;;  %v6923_v13 = vld [vmem:[%s7981_s0 + $0x10] sm:$0xff]  ;;  %v6928_v14 = vld [vmem:[%s7981_s0 + $0x18] sm:$0xff] }
  0x4d   :  { %5759 = vmatpush3.msra.mxu0 %v131_v3  ;;  %5779 = vmatpush3.msra.mxu1 %v281_v4  ;;  %v407_v15 = vld [vmem:[#allocation10 + $0x50] sm:$0xff]  ;;  %v6941_v17 = vld [vmem:[%s7981_s0 + $0x20] sm:$0xff]  ;;  %v6946_v18 = vld [vmem:[%s7981_s0 + $0x28] sm:$0xff] }
  0x4e   :  { %5760 = vmatprep.subr.mxu0 %v130_v5  ;;  %5780 = vmatprep.subr.mxu1 %v280_v6  ;;  %v532_v16 = vld [vmem:[#allocation15 + $0x10] sm:$0xff]  ;;  %v406_v19 = vld [vmem:[#allocation10 + $0x48] sm:$0xff]  ;;  %v6964_v22 = vld [vmem:[%s7981_s0 + $0x38] sm:$0xff] }
  0x4f   :  { %5761 = vmatpush3.msra.mxu0 %v130_v5  ;;  %5781 = vmatpush3.msra.mxu1 %v280_v6  ;;  %v531_v20 = vld [vmem:[#allocation15 + $0x8] sm:$0xff]  ;;  %v6959_v21 = vld [vmem:[%s7981_s0 + $0x30] sm:$0xff]  ;;  %v405_v23 = vld [vmem:[#allocation10 + $0x40] sm:$0xff] }
  0x50   :  { %5762 = vmatprep.subr.mxu0 %v129_v7  ;;  %5782 = vmatprep.subr.mxu1 %v279_v8  ;;  %v530_v24 = vld [vmem:[#allocation15] sm:$0xff]  ;;  %v658_v25 = vld [vmem:[#allocation15 + $0x38] sm:$0xff]  ;;  %v657_v27 = vld [vmem:[#allocation15 + $0x30] sm:$0xff] }
  0x51   :  { %5763 = vmatpush3.msra.mxu0 %v129_v7  ;;  %5764 = vmatprep.mubr.msk.f32.mxu0 %vm140_vm0, %v6905_v9  ;;  %v784_v26 = vld [vmem:[#allocation15 + $0x58] sm:$0xff]  ;;  %v783_v28 = vld [vmem:[#allocation15 + $0x50] sm:$0xff]  ;;  %v656_v29 = vld [vmem:[#allocation15 + $0x28] sm:$0xff] }
  0x52   :  { %5783 = vmatpush3.msra.mxu1 %v279_v8  ;;  %5784 = vmatprep.mubr.msk.f32.mxu1 %vm140_vm0, %v6905_v9  ;;  %v782_v30 = vld [vmem:[#allocation15 + $0x48] sm:$0xff]  ;;  %v655_v31 = vld [vmem:[#allocation15 + $0x20] sm:$0xff]  ;;  %v7010_v33 = vld [vmem:[#allocation13 + $0x18] sm:$0xff] }
  0x53   :  { %5765 = vmatmul.mubr.msk.f32.vlgmr.msra.gmra.mxu0 %vm140_vm0, %v6910_v10  ;;  %5785 = vmatmul.mubr.msk.f32.vlgmr.msra.gmra.mxu1 %vm140_vm0, %v6910_v10  ;;  %v781_v32 = vld [vmem:[#allocation15 + $0x40] sm:$0xff]  ;;  %v7012_v34 = vld [vmem:[#allocation13 + $0x38] sm:$0xff]  ;;  %v7026_v36 = vld [vmem:[#allocation13 + $0x10] sm:$0xff] }
  0x54   :  { %5796 = vmatprep.subr.mxu0 %v408_v11  ;;  %5816 = vmatprep.subr.mxu1 %v533_v12  ;;  %v7028_v37 = vld [vmem:[#allocation13 + $0x30] sm:$0xff]  ;;  %v7042_v38 = vld [vmem:[#allocation13 + $0x8] sm:$0xff]  ;;  %v7058_v40 = vld [vmem:[#allocation13] sm:$0xff] }
  0x55   :  { %5797 = vmatpush3.msra.mxu0 %v408_v11  ;;  %5817 = vmatpush3.msra.mxu1 %v533_v12  ;;  %v7044_v39 = vld [vmem:[#allocation13 + $0x28] sm:$0xff]  ;;  %v7060_v41 = vld [vmem:[#allocation13 + $0x20] sm:$0xff]  ;;  %v7074_v42 = vld [vmem:[#allocation13 + $0x58] sm:$0xff] }
  0x56   :  { %5767 = vmatprep.mubr.msk.f32.mxu0 %vm140_vm0, %v6923_v13  ;;  %5787 = vmatprep.mubr.msk.f32.mxu1 %vm140_vm0, %v6923_v13  ;;  %v7076_v43 = vld [vmem:[#allocation16 + $0x18] sm:$0xff]  ;;  %v7082_v44 = vld [vmem:[#allocation13 + $0x50] sm:$0xff]  ;;  %v7090_v46 = vld [vmem:[#allocation13 + $0x48] sm:$0xff] }
  0x57   :  { %5768 = vmatmul.mubr.msk.f32.gmra.mxu0 %vm140_vm0, %v6928_v14  ;;  %5788 = vmatmul.mubr.msk.f32.gmra.mxu1 %vm140_vm0, %v6928_v14  ;;  %v7084_v45 = vld [vmem:[#allocation16 + $0x10] sm:$0xff]  ;;  %v7092_v47 = vld [vmem:[#allocation16 + $0x8] sm:$0xff]  ;;  %v7098_v48 = vld [vmem:[#allocation13 + $0x40] sm:$0xff] }
  0x58   :  { %5798 = vmatprep.subr.mxu0 %v407_v15  ;;  %5818 = vmatprep.subr.mxu1 %v532_v16  ;;  %v7100_v49 = vld [vmem:[#allocation16] sm:$0xff]  ;;  %v7112_v50 = vld [vmem:[#allocation16 + $0x38] sm:$0xff]  ;;  %v7119_v52 = vld [vmem:[#allocation16 + $0x30] sm:$0xff] }
  0x59   :  { %5799 = vmatpush3.msra.mxu0 %v407_v15  ;;  %5819 = vmatpush3.msra.mxu1 %v532_v16  ;;  %v7116_v51 = vld [vmem:[#allocation16 + $0x58] sm:$0xff]  ;;  %v7125_v53 = vld [vmem:[#allocation16 + $0x50] sm:$0xff]  ;;  %v7128_v54 = vld [vmem:[#allocation16 + $0x28] sm:$0xff] }
  0x5a   :  { %5770 = vmatprep.mubr.msk.f32.mxu0 %vm140_vm0, %v6941_v17  ;;  %5790 = vmatprep.mubr.msk.f32.mxu1 %vm140_vm0, %v6941_v17  ;;  %v7133_v55 = vld [vmem:[#allocation16 + $0x48] sm:$0xff]  ;;  %v7136_v56 = vld [vmem:[#allocation16 + $0x20] sm:$0xff]  ;;  %v4805_v58 = vld [vmem:[%s7982_s1 + $0x10] sm:$0xff] }
  0x5b   :  { %5771 = vmatmul.mubr.msk.f32.gmra.mxu0 %vm140_vm0, %v6946_v18  ;;  %5791 = vmatmul.mubr.msk.f32.gmra.mxu1 %vm140_vm0, %v6946_v18  ;;  %v7141_v57 = vld [vmem:[#allocation16 + $0x40] sm:$0xff]  ;;  %v4806_v60 = vld [vmem:[%s7982_s1 + $0x18] sm:$0xff]  ;;  %v4808_v61 = vld [vmem:[%s7982_s1 + $0x28] sm:$0xff] }
  0x5c   :  { %5800 = vmatprep.subr.mxu0 %v406_v19  ;;  %5820 = vmatprep.subr.mxu1 %v531_v20  ;;  %v4803_v59 = vld [vmem:[%s7982_s1] sm:$0xff]  ;;  %v4810_v62 = vld [vmem:[%s7982_s1 + $0x38] sm:$0xff]  ;;  %v4804_v1 = vld [vmem:[%s7982_s1 + $0x8] sm:$0xff] }
  0x5d   :  { %5801 = vmatpush3.msra.mxu0 %v406_v19  ;;  %5821 = vmatpush3.msra.mxu1 %v531_v20  ;;  %v5267_v63 = vld [vmem:[%s7985_s4] ss:$0 sm:$0xff]  ;;  %v5277_v0 = vld [vmem:[%s7985_s4 + $0x1] ss:$0 sm:$0xff]  ;;  %v4809_v15 = vld [vmem:[%s7982_s1 + $0x30] sm:$0xff] }
  0x5e   :  { %5773 = vmatprep.mubr.msk.f32.mxu0 %vm140_vm0, %v6959_v21  ;;  %5793 = vmatprep.mubr.msk.f32.mxu1 %vm140_vm0, %v6959_v21  ;;  %v4807_v6 = vld [vmem:[%s7982_s1 + $0x20] sm:$0xff] }
  0x5f   :  { %5774 = vmatmul.mubr.msk.f32.gmra.mxu0 %vm140_vm0, %v6964_v22  ;;  %5794 = vmatmul.mubr.msk.f32.gmra.mxu1 %vm140_vm0, %v6964_v22 }
  0x60   :  { %5802 = vmatprep.subr.mxu0 %v405_v23  ;;  %5822 = vmatprep.subr.mxu1 %v530_v24 }
  0x61   :  { %5803 = vmatpush3.msra.mxu0 %v405_v23  ;;  %5823 = vmatpush3.msra.mxu1 %v530_v24 }
  0x62   :  { %5804 = vmatprep.mubr.msk.f32.mxu0 %vm140_vm0, %v6905_v9  ;;  %5824 = vmatprep.mubr.msk.f32.mxu1 %vm140_vm0, %v6905_v9 }
  0x63   :  { %5805 = vmatmul.mubr.msk.f32.vlgmr.msra.gmra.mxu0 %vm140_vm0, %v6910_v10  ;;  %5825 = vmatmul.mubr.msk.f32.vlgmr.msra.gmra.mxu1 %vm140_vm0, %v6910_v10 }
  0x64   :  { %5836 = vmatprep.subr.mxu0 %v658_v25  ;;  %5856 = vmatprep.subr.mxu1 %v784_v26 }
  0x65   :  { %5837 = vmatpush3.msra.mxu0 %v658_v25  ;;  %5857 = vmatpush3.msra.mxu1 %v784_v26 }
  0x66   :  { %5807 = vmatprep.mubr.msk.f32.mxu0 %vm140_vm0, %v6923_v13  ;;  %5827 = vmatprep.mubr.msk.f32.mxu1 %vm140_vm0, %v6923_v13 }
  0x67   :  { %5808 = vmatmul.mubr.msk.f32.gmra.mxu0 %vm140_vm0, %v6928_v14  ;;  %5828 = vmatmul.mubr.msk.f32.gmra.mxu1 %vm140_vm0, %v6928_v14 }
  0x68   :  { %5838 = vmatprep.subr.mxu0 %v657_v27  ;;  %5858 = vmatprep.subr.mxu1 %v783_v28 }
  0x69   :  { %5839 = vmatpush3.msra.mxu0 %v657_v27  ;;  %5859 = vmatpush3.msra.mxu1 %v783_v28 }
  0x6a   :  { %5810 = vmatprep.mubr.msk.f32.mxu0 %vm140_vm0, %v6941_v17  ;;  %5830 = vmatprep.mubr.msk.f32.mxu1 %vm140_vm0, %v6941_v17 }
  0x6b   :  { %5811 = vmatmul.mubr.msk.f32.gmra.mxu0 %vm140_vm0, %v6946_v18  ;;  %5831 = vmatmul.mubr.msk.f32.gmra.mxu1 %vm140_vm0, %v6946_v18 }
  0x6c   :  { %5840 = vmatprep.subr.mxu0 %v656_v29  ;;  %5860 = vmatprep.subr.mxu1 %v782_v30 }
  0x6d   :  { %5841 = vmatpush3.msra.mxu0 %v656_v29  ;;  %5861 = vmatpush3.msra.mxu1 %v782_v30 }
  0x6e   :  { %5813 = vmatprep.mubr.msk.f32.mxu0 %vm140_vm0, %v6959_v21  ;;  %5833 = vmatprep.mubr.msk.f32.mxu1 %vm140_vm0, %v6959_v21 }
  0x6f   :  { %5814 = vmatmul.mubr.msk.f32.gmra.mxu0 %vm140_vm0, %v6964_v22  ;;  %5834 = vmatmul.mubr.msk.f32.gmra.mxu1 %vm140_vm0, %v6964_v22 }
  0x70   :  { %5842 = vmatprep.subr.mxu0 %v655_v31  ;;  %5862 = vmatprep.subr.mxu1 %v781_v32 }
  0x71   :  { %5843 = vmatpush3.msra.mxu0 %v655_v31  ;;  %5863 = vmatpush3.msra.mxu1 %v781_v32 }
  0x72   :  { %5844 = vmatprep.mubr.msk.f32.mxu0 %vm140_vm0, %v6905_v9  ;;  %5864 = vmatprep.mubr.msk.f32.mxu1 %vm140_vm0, %v6905_v9 }
  0x73   :  { %5845 = vmatmul.mubr.msk.f32.vlgmr.msra.gmra.mxu0 %vm140_vm0, %v6910_v10  ;;  %5865 = vmatmul.mubr.msk.f32.vlgmr.msra.gmra.mxu1 %vm140_vm0, %v6910_v10 }
  0x74   :  { %5876 = vmatprep.subr.mxu0 %v6803_v35  ;;  %5887 = vmatprep.subr.mxu1 %v6803_v35 }
  0x75   :  { %5877 = vmatpush3.msra.mxu0 %v7010_v33  ;;  %5888 = vmatpush3.msra.mxu1 %v7012_v34 }
  0x76   :  { %5847 = vmatprep.mubr.msk.f32.mxu0 %vm140_vm0, %v6923_v13  ;;  %5867 = vmatprep.mubr.msk.f32.mxu1 %vm140_vm0, %v6923_v13 }
  0x77   :  { %5848 = vmatmul.mubr.msk.f32.gmra.mxu0 %vm140_vm0, %v6928_v14  ;;  %5868 = vmatmul.mubr.msk.f32.gmra.mxu1 %vm140_vm0, %v6928_v14 }
  0x78   :  { %5878 = vmatprep.subr.mxu0 %v6803_v35  ;;  %5889 = vmatprep.subr.mxu1 %v6803_v35 }
  0x79   :  { %5879 = vmatpush3.msra.mxu0 %v7026_v36  ;;  %5890 = vmatpush3.msra.mxu1 %v7028_v37 }
  0x7a   :  { %5850 = vmatprep.mubr.msk.f32.mxu0 %vm140_vm0, %v6941_v17  ;;  %5870 = vmatprep.mubr.msk.f32.mxu1 %vm140_vm0, %v6941_v17 }
  0x7b   :  { %5851 = vmatmul.mubr.msk.f32.gmra.mxu0 %vm140_vm0, %v6946_v18  ;;  %5871 = vmatmul.mubr.msk.f32.gmra.mxu1 %vm140_vm0, %v6946_v18 }
  0x7c   :  { %5880 = vmatprep.subr.mxu0 %v6803_v35  ;;  %5891 = vmatprep.subr.mxu1 %v6803_v35 }
  0x7d   :  { %5881 = vmatpush3.msra.mxu0 %v7042_v38  ;;  %5892 = vmatpush3.msra.mxu1 %v7044_v39 }
  0x7e   :  { %5853 = vmatprep.mubr.msk.f32.mxu0 %vm140_vm0, %v6959_v21  ;;  %5873 = vmatprep.mubr.msk.f32.mxu1 %vm140_vm0, %v6959_v21 }
  0x7f   :  { %5854 = vmatmul.mubr.msk.f32.gmra.mxu0 %vm140_vm0, %v6964_v22  ;;  %5874 = vmatmul.mubr.msk.f32.gmra.mxu1 %vm140_vm0, %v6964_v22 }
  0x80   :  { %5882 = vmatprep.subr.mxu0 %v6803_v35  ;;  %5893 = vmatprep.subr.mxu1 %v6803_v35 }
  0x81   :  { %5883 = vmatpush3.msra.mxu0 %v7058_v40  ;;  %5894 = vmatpush3.msra.mxu1 %v7060_v41 }
  0x82   :  { %5884 = vmatprep.mubr.msk.f32.mxu0 %vm6804_vm1, %v6803_v35  ;;  %5895 = vmatprep.mubr.msk.f32.mxu1 %vm6804_vm1, %v6803_v35 }
  0x83   :  { %5898 = vmatprep.subr.mxu0 %v6803_v35  ;;  %5909 = vmatprep.subr.mxu1 %v6803_v35 }
  0x84   :  { %5885 = vmatmul.mubr.f32.vlgmr.msra.gmra.mxu0 %v6803_v35  ;;  %5896 = vmatmul.mubr.f32.vlgmr.msra.gmra.mxu1 %v6803_v35 }
  0x85   :  { %5899 = vmatpush3.msra.mxu0 %v7074_v42  ;;  %5910 = vmatpush3.msra.mxu1 %v7076_v43 }
  0x86   :  { %5900 = vmatprep.subr.mxu0 %v6803_v35  ;;  %5911 = vmatprep.subr.mxu1 %v6803_v35 }
  0x87   :  { %5901 = vmatpush3.msra.mxu0 %v7082_v44  ;;  %5912 = vmatpush3.msra.mxu1 %v7084_v45 }
  0x88   :  { %5902 = vmatprep.subr.mxu0 %v6803_v35  ;;  %5913 = vmatprep.subr.mxu1 %v6803_v35 }
  0x89   :  { %5903 = vmatpush3.msra.mxu0 %v7090_v46  ;;  %5914 = vmatpush3.msra.mxu1 %v7092_v47 }
  0x8a   :  { %5904 = vmatprep.subr.mxu0 %v6803_v35  ;;  %5915 = vmatprep.subr.mxu1 %v6803_v35 }
  0x8b   :  { %5905 = vmatpush3.msra.mxu0 %v7098_v48  ;;  %5916 = vmatpush3.msra.mxu1 %v7100_v49 }
  0x8c   :  { %5917 = vmatprep.mubr.msk.f32.mxu1 %vm6804_vm1, %v6803_v35  ;;  %5906 = vmatprep.mubr.msk.f32.mxu0 %vm6804_vm1, %v6803_v35 }
  0x8d   :  { %5918 = vmatmul.mubr.f32.vlgmr.msra.gmra.mxu1 %v6803_v35  ;;  %5920 = vmatprep.subr.mxu0 %v6803_v35 }
  0x8e   :  { %5907 = vmatmul.mubr.f32.vlgmr.msra.gmra.mxu0 %v6803_v35  ;;  %5931 = vmatprep.subr.mxu1 %v6803_v35 }
  0x8f   :  { %5921 = vmatpush3.msra.mxu0 %v7112_v50  ;;  %5928 = vmatprep.mubr.msk.f32.mxu0 %vm6804_vm1, %v6803_v35 }
  0x90   :  { %5922 = vmatprep.subr.mxu0 %v6803_v35  ;;  %5932 = vmatpush3.msra.mxu1 %v7116_v51 }
  0x91   :  { %5923 = vmatpush3.msra.mxu0 %v7119_v52  ;;  %5933 = vmatprep.subr.mxu1 %v6803_v35 }
  0x92   :  { %5924 = vmatprep.subr.mxu0 %v6803_v35  ;;  %5934 = vmatpush3.msra.mxu1 %v7125_v53 }
  0x93   :  { %5925 = vmatpush3.msra.mxu0 %v7128_v54  ;;  %5935 = vmatprep.subr.mxu1 %v6803_v35 }
  0x94   :  { %5926 = vmatprep.subr.mxu0 %v6803_v35  ;;  %5936 = vmatpush3.msra.mxu1 %v7133_v55 }
  0x95   :  { %5927 = vmatpush3.msra.mxu0 %v7136_v56  ;;  %5937 = vmatprep.subr.mxu1 %v6803_v35 }
  0x96   :  { %5929 = vmatmul.mubr.f32.vlgmr.msra.gmra.mxu0 %v6803_v35  ;;  %5938 = vmatpush3.msra.mxu1 %v7141_v57 }
  0x97   :  { %5939 = vmatprep.mubr.msk.f32.mxu1 %vm6804_vm1, %v6803_v35  ;;  %4823 = vperm.xlu1 %6457, %v4805_v58  }
  0x98   :  { %5940 = vmatmul.mubr.f32.vlgmr.msra.gmra.mxu1 %v6803_v35  ;;  %4813 = vperm.xlu0 %6456, %v4803_v59   ;;  %v5287_v59 = vld [vmem:[%s7985_s4 + $0x2] ss:$0 sm:$0xff] }
  0x99   :  { %5942 = vmatprep.subr.mxu0 %v6803_v35  ;;  %5953 = vmatprep.subr.mxu1 %v6803_v35 }
  0x9a   :  { %5943 = vmatpush3.msra.mxu0 %v7010_v33  ;;  %5954 = vmatpush3.msra.mxu1 %v7012_v34 }
  0x9b   :  { %4828 = vperm.xlu1 %6457, %v4806_v60   ;;  %5944 = vmatprep.subr.mxu0 %v6803_v35  ;;  %v5296_v60 = vld [vmem:[%s7988_s7] ss:$0 sm:$0xff] }
  0x9c   :  { %5955 = vmatprep.subr.mxu1 %v6803_v35  ;;  %5945 = vmatpush3.msra.mxu0 %v7026_v36 }
  0x9d   :  { %5956 = vmatpush3.msra.mxu1 %v7028_v37  ;;  %5946 = vmatprep.subr.mxu0 %v6803_v35 }
  0x9e   :  { %5957 = vmatprep.subr.mxu1 %v6803_v35  ;;  %5947 = vmatpush3.msra.mxu0 %v7042_v38 }
  0x9f   :  { %4838 = vperm.xlu1 %6457, %v4808_v61   ;;  %5958 = vmatpush3.msra.mxu1 %v7044_v39 }
  0xa0   :  { %5948 = vmatprep.subr.mxu0 %v6803_v35  ;;  %5959 = vmatprep.subr.mxu1 %v6803_v35 }
  0xa1   :  { %5949 = vmatpush3.msra.mxu0 %v7058_v40  ;;  %5960 = vmatpush3.msra.mxu1 %v7060_v41 }
  0xa2   :  { %5950 = vmatprep.mubr.msk.f32.mxu0 %vm6804_vm1, %v6803_v35  ;;  %5961 = vmatprep.mubr.msk.f32.mxu1 %vm6804_vm1, %v6803_v35 }
  0xa3   :  { %4848 = vperm.xlu1 %6457, %v4810_v62   ;;  %5964 = vmatprep.subr.mxu0 %v6803_v35 }
  0xa4   :  { %5975 = vmatprep.subr.mxu1 %v6803_v35  ;;  %4818 = vperm.xlu0 %6456, %v4804_v1  }
  0xa8   :  { %4833 = vperm.xlu0 %6456, %v4807_v6  }
  0xac   :  { %4843 = vperm.xlu0 %6456, %v4809_v15  }
 0x113   :  { %v5766_v2 = vpop.f32.mrf.mxu0  ;;  %v5786_v3 = vpop.f32.mrf.mxu1 }
 0x114   :  { %v237_v4 = vadd.f32 %v5766_v2, %v5267_v63  ;;  %v363_v5 = vadd.f32 %v5786_v3, %v5277_v0 }
 0x115   :  { %v231_v7 = vpop.f32.mrf.mxu0  ;;  %v357_v8 = vpop.f32.mrf.mxu1 }
 0x116   :  { %271 = vst.msk [vmem:[#allocation2 + $0x8] sm:$0xff] %vm140_vm0, %v237_v4  ;;  %397 = vst.msk [vmem:[#allocation3 + $0x8] sm:$0xff] %vm140_vm0, %v363_v5  ;;  %v232_v9 = vadd.f32 %v5267_v63, %v231_v7  ;;  %v358_v10 = vadd.f32 %v5277_v0, %v357_v8 }
 0x117   :  { %v5769_v11 = vpop.f32.mrf.mxu0  ;;  %v5789_v12 = vpop.f32.mrf.mxu1 }
 0x118   :  { %270 = vst.msk [vmem:[#allocation2] sm:$0xff] %vm140_vm0, %v232_v9  ;;  %396 = vst.msk [vmem:[#allocation3] sm:$0xff] %vm140_vm0, %v358_v10  ;;  %v247_v13 = vadd.f32 %v5769_v11, %v5267_v63  ;;  %v373_v14 = vadd.f32 %v5789_v12, %v5277_v0 }
 0x119   :  { %v241_v16 = vpop.f32.mrf.mxu0  ;;  %v367_v17 = vpop.f32.mrf.mxu1 }
 0x11a   :  { %273 = vst.msk [vmem:[#allocation2 + $0x18] sm:$0xff] %vm140_vm0, %v247_v13  ;;  %399 = vst.msk [vmem:[#allocation3 + $0x18] sm:$0xff] %vm140_vm0, %v373_v14  ;;  %v242_v18 = vadd.f32 %v5267_v63, %v241_v16  ;;  %v368_v19 = vadd.f32 %v5277_v0, %v367_v17 }
 0x11b   :  { %v5772_v20 = vpop.f32.mrf.mxu0  ;;  %v5792_v21 = vpop.f32.mrf.mxu1 }
 0x11c   :  { %272 = vst.msk [vmem:[#allocation2 + $0x10] sm:$0xff] %vm140_vm0, %v242_v18  ;;  %398 = vst.msk [vmem:[#allocation3 + $0x10] sm:$0xff] %vm140_vm0, %v368_v19  ;;  %v257_v22 = vadd.f32 %v5772_v20, %v5267_v63  ;;  %v383_v23 = vadd.f32 %v5792_v21, %v5277_v0 }
 0x11d   :  { %v251_v24 = vpop.f32.mrf.mxu0  ;;  %v377_v25 = vpop.f32.mrf.mxu1 }
 0x11e   :  { %275 = vst.msk [vmem:[#allocation2 + $0x28] sm:$0xff] %vm140_vm0, %v257_v22  ;;  %401 = vst.msk [vmem:[#allocation3 + $0x28] sm:$0xff] %vm140_vm0, %v383_v23  ;;  %v252_v26 = vadd.f32 %v5267_v63, %v251_v24  ;;  %v378_v27 = vadd.f32 %v5277_v0, %v377_v25 }
 0x11f   :  { %v5775_v28 = vpop.f32.mrf.mxu0  ;;  %v5795_v29 = vpop.f32.mrf.mxu1 }
 0x120   :  { %274 = vst.msk [vmem:[#allocation2 + $0x20] sm:$0xff] %vm140_vm0, %v252_v26  ;;  %400 = vst.msk [vmem:[#allocation3 + $0x20] sm:$0xff] %vm140_vm0, %v378_v27  ;;  %v267_v30 = vadd.f32 %v5775_v28, %v5267_v63  ;;  %v393_v31 = vadd.f32 %v5795_v29, %v5277_v0  ;;  %v5306_v29 = vld [vmem:[%s7988_s7 + $0x1] ss:$0 sm:$0xff] }
 0x121   :  { %v261_v32 = vpop.f32.mrf.mxu0  ;;  %v387_v58 = vpop.f32.mrf.mxu1 }
 0x122   :  { %277 = vst.msk [vmem:[#allocation2 + $0x38] sm:$0xff] %vm140_vm0, %v267_v30  ;;  %403 = vst.msk [vmem:[#allocation3 + $0x38] sm:$0xff] %vm140_vm0, %v393_v31  ;;  %v262_v61 = vadd.f32 %v5267_v63, %v261_v32  ;;  %v388_v62 = vadd.f32 %v5277_v0, %v387_v58  ;;  %v5316_v30 = vld [vmem:[%s7988_s7 + $0x2] ss:$0 sm:$0xff] }
 0x123   :  { %v5806_v1 = vpop.f32.mrf.mxu0  ;;  %v5826_v2 = vpop.f32.mrf.mxu1 }
 0x124   :  { %276 = vst.msk [vmem:[#allocation2 + $0x30] sm:$0xff] %vm140_vm0, %v262_v61  ;;  %402 = vst.msk [vmem:[#allocation3 + $0x30] sm:$0xff] %vm140_vm0, %v388_v62  ;;  %v489_v3 = vadd.f32 %v5806_v1, %v5287_v59  ;;  %v613_v4 = vadd.f32 %v5826_v2, %v5296_v60 }
 0x125   :  { %v483_v5 = vpop.f32.mrf.mxu0  ;;  %v607_v6 = vpop.f32.mrf.mxu1 }
 0x126   :  { %523 = vst.msk [vmem:[#allocation4 + $0x8] sm:$0xff] %vm140_vm0, %v489_v3  ;;  %647 = vst.msk [vmem:[#allocation5 + $0x8] sm:$0xff] %vm140_vm0, %v613_v4  ;;  %v484_v7 = vadd.f32 %v5287_v59, %v483_v5  ;;  %v608_v8 = vadd.f32 %v5296_v60, %v607_v6 }
 0x127   :  { %v5809_v9 = vpop.f32.mrf.mxu0  ;;  %v5829_v10 = vpop.f32.mrf.mxu1 }
 0x128   :  { %522 = vst.msk [vmem:[#allocation4] sm:$0xff] %vm140_vm0, %v484_v7  ;;  %646 = vst.msk [vmem:[#allocation5] sm:$0xff] %vm140_vm0, %v608_v8  ;;  %v499_v63 = vadd.f32 %v5809_v9, %v5287_v59  ;;  %v623_v0 = vadd.f32 %v5829_v10, %v5296_v60 }
 0x129   :  { %v493_v11 = vpop.f32.mrf.mxu0  ;;  %v617_v12 = vpop.f32.mrf.mxu1 }
 0x12a   :  { %525 = vst.msk [vmem:[#allocation4 + $0x18] sm:$0xff] %vm140_vm0, %v499_v63  ;;  %649 = vst.msk [vmem:[#allocation5 + $0x18] sm:$0xff] %vm140_vm0, %v623_v0  ;;  %v494_v13 = vadd.f32 %v5287_v59, %v493_v11  ;;  %v618_v14 = vadd.f32 %v5296_v60, %v617_v12 }
 0x12b   :  { %v5812_v15 = vpop.f32.mrf.mxu0  ;;  %v5832_v16 = vpop.f32.mrf.mxu1 }
 0x12c   :  { %524 = vst.msk [vmem:[#allocation4 + $0x10] sm:$0xff] %vm140_vm0, %v494_v13  ;;  %648 = vst.msk [vmem:[#allocation5 + $0x10] sm:$0xff] %vm140_vm0, %v618_v14  ;;  %v509_v17 = vadd.f32 %v5812_v15, %v5287_v59  ;;  %v633_v18 = vadd.f32 %v5832_v16, %v5296_v60 }
 0x12d   :  { %v503_v19 = vpop.f32.mrf.mxu0  ;;  %v627_v20 = vpop.f32.mrf.mxu1 }
 0x12e   :  { %527 = vst.msk [vmem:[#allocation4 + $0x28] sm:$0xff] %vm140_vm0, %v509_v17  ;;  %651 = vst.msk [vmem:[#allocation5 + $0x28] sm:$0xff] %vm140_vm0, %v633_v18  ;;  %v504_v21 = vadd.f32 %v5287_v59, %v503_v19  ;;  %v628_v22 = vadd.f32 %v5296_v60, %v627_v20 }
 0x12f   :  { %v5815_v23 = vpop.f32.mrf.mxu0  ;;  %v5835_v24 = vpop.f32.mrf.mxu1 }
 0x130   :  { %526 = vst.msk [vmem:[#allocation4 + $0x20] sm:$0xff] %vm140_vm0, %v504_v21  ;;  %650 = vst.msk [vmem:[#allocation5 + $0x20] sm:$0xff] %vm140_vm0, %v628_v22  ;;  %v519_v25 = vadd.f32 %v5815_v23, %v5287_v59  ;;  %v643_v26 = vadd.f32 %v5835_v24, %v5296_v60 }
 0x131   :  { %v513_v27 = vpop.f32.mrf.mxu0  ;;  %v637_v28 = vpop.f32.mrf.mxu1 }
 0x132   :  { %529 = vst.msk [vmem:[#allocation4 + $0x38] sm:$0xff] %vm140_vm0, %v519_v25  ;;  %653 = vst.msk [vmem:[#allocation5 + $0x38] sm:$0xff] %vm140_vm0, %v643_v26  ;;  %v514_v31 = vadd.f32 %v5287_v59, %v513_v27  ;;  %v638_v32 = vadd.f32 %v5296_v60, %v637_v28  ;;  %v950_v26 = vld [vmem:[#allocation2] sm:$0xff] }
 0x133   :  { %v5846_v58 = vpop.f32.mrf.mxu0  ;;  %v5866_v61 = vpop.f32.mrf.mxu1 }
 0x134   :  { %528 = vst.msk [vmem:[#allocation4 + $0x30] sm:$0xff] %vm140_vm0, %v514_v31  ;;  %652 = vst.msk [vmem:[#allocation5 + $0x30] sm:$0xff] %vm140_vm0, %v638_v32  ;;  %v739_v62 = vadd.f32 %v5846_v58, %v5306_v29  ;;  %v865_v1 = vadd.f32 %v5866_v61, %v5316_v30 }
 0x135   :  { %v733_v2 = vpop.f32.mrf.mxu0  ;;  %v859_v3 = vpop.f32.mrf.mxu1 }
 0x136   :  { %773 = vst.msk [vmem:[#allocation6 + $0x8] sm:$0xff] %vm140_vm0, %v739_v62  ;;  %899 = vst.msk [vmem:[#allocation7 + $0x8] sm:$0xff] %vm140_vm0, %v865_v1  ;;  %v734_v4 = vadd.f32 %v5306_v29, %v733_v2  ;;  %v860_v5 = vadd.f32 %v5316_v30, %v859_v3 }
 0x137   :  { %v5849_v6 = vpop.f32.mrf.mxu0  ;;  %v5869_v7 = vpop.f32.mrf.mxu1 }
 0x138   :  { %772 = vst.msk [vmem:[#allocation6] sm:$0xff] %vm140_vm0, %v734_v4  ;;  %898 = vst.msk [vmem:[#allocation7] sm:$0xff] %vm140_vm0, %v860_v5  ;;  %v749_v59 = vadd.f32 %v5849_v6, %v5306_v29  ;;  %v875_v60 = vadd.f32 %v5869_v7, %v5316_v30  ;;  %v951_v4 = vld [vmem:[#allocation3] sm:$0xff] }
 0x139   :  { %v743_v8 = vpop.f32.mrf.mxu0  ;;  %v869_v9 = vpop.f32.mrf.mxu1  ;;  %v1187_v62 = vld [vmem:[#allocation5 + $0x38] sm:$0xff] }
 0x13a   :  { %775 = vst.msk [vmem:[#allocation6 + $0x18] sm:$0xff] %vm140_vm0, %v749_v59  ;;  %901 = vst.msk [vmem:[#allocation7 + $0x18] sm:$0xff] %vm140_vm0, %v875_v60  ;;  %v744_v10 = vadd.f32 %v5306_v29, %v743_v8  ;;  %v870_v63 = vadd.f32 %v5316_v30, %v869_v9 }
 0x13b   :  { %v5852_v0 = vpop.f32.mrf.mxu0  ;;  %v5872_v11 = vpop.f32.mrf.mxu1 }
 0x13c   :  { %774 = vst.msk [vmem:[#allocation6 + $0x10] sm:$0xff] %vm140_vm0, %v744_v10  ;;  %900 = vst.msk [vmem:[#allocation7 + $0x10] sm:$0xff] %vm140_vm0, %v870_v63  ;;  %v759_v12 = vadd.f32 %v5852_v0, %v5306_v29  ;;  %v885_v13 = vadd.f32 %v5872_v11, %v5316_v30 }
 0x13d   :  { %v753_v14 = vpop.f32.mrf.mxu0  ;;  %v879_v15 = vpop.f32.mrf.mxu1 }
 0x13e   :  { %777 = vst.msk [vmem:[#allocation6 + $0x28] sm:$0xff] %vm140_vm0, %v759_v12  ;;  %903 = vst.msk [vmem:[#allocation7 + $0x28] sm:$0xff] %vm140_vm0, %v885_v13  ;;  %v754_v16 = vadd.f32 %v5306_v29, %v753_v14  ;;  %v880_v17 = vadd.f32 %v5316_v30, %v879_v15  ;;  %v7267_v15 = vld [vmem:[%s7985_s4 + $0x3] ss:$0 sm:$0xff] }
 0x13f   :  { %v5855_v18 = vpop.f32.mrf.mxu0  ;;  %v5875_v19 = vpop.f32.mrf.mxu1 }
 0x140   :  { %776 = vst.msk [vmem:[#allocation6 + $0x20] sm:$0xff] %vm140_vm0, %v754_v16  ;;  %902 = vst.msk [vmem:[#allocation7 + $0x20] sm:$0xff] %vm140_vm0, %v880_v17  ;;  %v769_v20 = vadd.f32 %v5855_v18, %v5306_v29  ;;  %v895_v21 = vadd.f32 %v5875_v19, %v5316_v30 }
 0x141   :  { %v763_v22 = vpop.f32.mrf.mxu0  ;;  %v889_v23 = vpop.f32.mrf.mxu1 }
 0x142   :  { %779 = vst.msk [vmem:[#allocation6 + $0x38] sm:$0xff] %vm140_vm0, %v769_v20  ;;  %905 = vst.msk [vmem:[#allocation7 + $0x38] sm:$0xff] %vm140_vm0, %v895_v21  ;;  %v764_v24 = vadd.f32 %v5306_v29, %v763_v22  ;;  %v890_v25 = vadd.f32 %v5316_v30, %v889_v23  ;;  %v952_v20 = vld [vmem:[#allocation4] sm:$0xff] }
 0x143   :  { %v7273_v23 = vld [vmem:[%s7988_s7 + $0x3] ss:$0 sm:$0xff] }
 0x144   :  { %778 = vst.msk [vmem:[#allocation6 + $0x30] sm:$0xff] %vm140_vm0, %v764_v24  ;;  %904 = vst.msk [vmem:[#allocation7 + $0x30] sm:$0xff] %vm140_vm0, %v890_v25  ;;  %v1022_v27 = vpop.f32.mrf.mxu0  ;;  %v1092_v28 = vpop.f32.mrf.mxu1 }
 0x145   :  { %v1096_v31 = vadd.f32 %v1022_v27, %v950_v26  ;;  %v1103_v29 = vadd.f32 %v1092_v28, %v951_v4 }
 0x146   :  { %v5886_v32 = vpop.f32.mrf.mxu0  ;;  %v5897_v58 = vpop.f32.mrf.mxu1 }
 0x147   :  { %v5329_v61 = vmul.f32 -1.442695, %v1096_v31  ;;  %v5330_v7 = vmul.f32 -1.442695, %v1103_v29 }
 0x149   :  { %6458 = vpow2.f32 %v5329_v61  ;;  %v1189_v9 = vld [vmem:[#allocation6 + $0x38] sm:$0xff] }
 0x14a   :  { %v1191_v28 = vld [vmem:[#allocation7 + $0x38] sm:$0xff] }
 0x14d   :  { %v1258_v1 = vpop.f32.mrf.mxu1 }
 0x14e   :  { %v1332_v2 = vadd.f32 %v1258_v1, %v1187_v62  ;;  %v1176_v3 = vpop.f32.mrf.mxu0 }
 0x14f   :  { %v5919_v5 = vpop.f32.mrf.mxu1  ;;  %v1177_v17 = vadd.f32 %v7267_v15, %v1176_v3 }
 0x150   :  { %v5331_v30 = vmul.f32 -1.442695, %v1332_v2  ;;  %v5908_v6 = vpop.f32.mrf.mxu0 }
 0x152   :  { %6460 = vpow2.f32 %v5331_v30 }
 0x153   :  { %6462 = vpow2.f32 %v5330_v7 }
 0x156   :  { %v6459_v59 = vpop.eup %6458  ;;  %v1328_v60 = vpop.f32.mrf.mxu0 }
 0x157   :  { %v1100_v8 = vadd.f32 1.0, %v6459_v59  ;;  %v1339_v0 = vadd.f32 %v1328_v60, %v1189_v9 }
 0x158   :  { %v5930_v10 = vpop.f32.mrf.mxu0  ;;  %v1412_v63 = vpop.f32.mrf.mxu1 }
 0x159   :  { %6464 = vrcp.f32 %v1100_v8  ;;  %v5332_v12 = vmul.f32 -1.442695, %v1339_v0  ;;  %v1413_v24 = vadd.f32 %v7273_v23, %v1412_v63  ;;  %v1665_v10 = vld [vmem:[#allocation5 + $0x30] sm:$0xff] }
 0x15a   :  { %v5941_v11 = vpop.f32.mrf.mxu1 }
 0x15b   :  { %6466 = vpow2.f32 %v5332_v12  ;;  %v1428_v11 = vld [vmem:[#allocation3 + $0x8] sm:$0xff] }
 0x15f   :  { %v6461_v13 = vpop.eup %6460 }
 0x160   :  { %v1336_v14 = vadd.f32 1.0, %v6461_v13  ;;  %v6463_v16 = vpop.eup %6462 }
 0x161   :  { %v1107_v21 = vadd.f32 1.0, %v6463_v16 }
 0x162   :  { %6468 = vrcp.f32 %v1336_v14 }
 0x166   :  { %v6465_v18 = vpop.eup %6464 }
 0x167   :  { %v1180_v19 = vmul.f32 %v6465_v18, %v1177_v17 }
 0x168   :  { %v6467_v25 = vpop.eup %6466 }
 0x169   :  { %v1181_v22 = vadd.f32 %v1180_v19, %v952_v20  ;;  %v1343_v31 = vadd.f32 1.0, %v6467_v25 }
 0x16b   :  { %6470 = vtanh.f32 %v1181_v22  ;;  %v1667_v22 = vld [vmem:[#allocation6 + $0x30] sm:$0xff] }
 0x16c   :  { %6472 = vrcp.f32 %v1107_v21 }
 0x16f   :  { %v6469_v26 = vpop.eup %6468 }
 0x170   :  { %v1416_v27 = vmul.f32 %v6469_v26, %v1413_v24 }
 0x172   :  { %v1417_v32 = vadd.f32 %v1416_v27, %v1191_v28 }
 0x174   :  { %6474 = vtanh.f32 %v1417_v32 }
 0x175   :  { %6476 = vrcp.f32 %v1343_v31 }
 0x178   :  { %v6471_v58 = vpop.eup %6470 }
 0x179   :  { %v1183_v61 = vsub.f32 0.0, %v6471_v58  ;;  %v6473_v62 = vpop.eup %6472 }
 0x17b   :  { %v1184_v1 = vmul.f32 %v6473_v62, %v1183_v61 }
 0x17d   :  { %v7276_v2 = vadd.f32 %v6471_v58, %v1184_v1  ;;  %v1430_v1 = vld [vmem:[#allocation4 + $0x8] sm:$0xff] }
 0x17f   :  { %1422 = vst.msk [vmem:[#allocation8] sm:$0xff] %vm140_vm0, %v7276_v2  ;;  %5951 = vmatmul.mubr.msk.f32.vlgmr.msra.gmra.mxu0 %vm140_vm0, %v7276_v2  ;;  %5962 = vmatmul.mubr.msk.f32.vlgmr.msra.gmra.mxu1 %vm140_vm0, %v7276_v2 }
 0x180   :  { %5965 = vmatpush3.msra.mxu0 %v7074_v42  ;;  %5976 = vmatpush3.msra.mxu1 %v7076_v43 }
 0x181   :  { %v6475_v3 = vpop.eup %6474  ;;  %5966 = vmatprep.subr.mxu0 %v6803_v35  ;;  %5977 = vmatprep.subr.mxu1 %v6803_v35 }
 0x182   :  { %5967 = vmatpush3.msra.mxu0 %v7082_v44  ;;  %5978 = vmatpush3.msra.mxu1 %v7084_v45  ;;  %v1419_v4 = vsub.f32 0.0, %v6475_v3  ;;  %v6477_v5 = vpop.eup %6476 }
 0x183   :  { %5968 = vmatprep.subr.mxu0 %v6803_v35  ;;  %5979 = vmatprep.subr.mxu1 %v6803_v35 }
 0x184   :  { %5969 = vmatpush3.msra.mxu0 %v7090_v46  ;;  %5980 = vmatpush3.msra.mxu1 %v7092_v47  ;;  %v1420_v29 = vmul.f32 %v6477_v5, %v1419_v4 }
 0x185   :  { %5970 = vmatprep.subr.mxu0 %v6803_v35  ;;  %5981 = vmatprep.subr.mxu1 %v6803_v35 }
 0x186   :  { %5971 = vmatpush3.msra.mxu0 %v7098_v48  ;;  %5972 = vmatprep.mubr.msk.f32.mxu0 %vm6804_vm1, %v6803_v35  ;;  %v7299_v30 = vadd.f32 %v6475_v3, %v1420_v29 }
 0x187   :  { %5982 = vmatpush3.msra.mxu1 %v7100_v49  ;;  %5983 = vmatprep.mubr.msk.f32.mxu1 %vm6804_vm1, %v6803_v35 }
 0x188   :  { %5973 = vmatmul.mubr.msk.f32.vlgmr.msra.gmra.mxu0 %vm140_vm0, %v7276_v2  ;;  %1424 = vst.msk [vmem:[#allocation9 + $0x38] sm:$0xff] %vm140_vm0, %v7299_v30  ;;  %5984 = vmatmul.mubr.msk.f32.vlgmr.msra.gmra.mxu1 %vm140_vm0, %v7299_v30 }
 0x189   :  { %5986 = vmatprep.subr.mxu0 %v6803_v35  ;;  %5997 = vmatprep.subr.mxu1 %v6803_v35 }
 0x18a   :  { %5987 = vmatpush3.msra.mxu0 %v7112_v50  ;;  %5998 = vmatpush3.msra.mxu1 %v7116_v51 }
 0x18b   :  { %5988 = vmatprep.subr.mxu0 %v6803_v35  ;;  %5999 = vmatprep.subr.mxu1 %v6803_v35 }
 0x18c   :  { %5989 = vmatpush3.msra.mxu0 %v7119_v52  ;;  %6000 = vmatpush3.msra.mxu1 %v7125_v53 }
 0x18d   :  { %5990 = vmatprep.subr.mxu0 %v6803_v35  ;;  %6001 = vmatprep.subr.mxu1 %v6803_v35 }
 0x18e   :  { %5991 = vmatpush3.msra.mxu0 %v7128_v54  ;;  %6002 = vmatpush3.msra.mxu1 %v7133_v55 }
 0x18f   :  { %5992 = vmatprep.subr.mxu0 %v6803_v35  ;;  %6003 = vmatprep.subr.mxu1 %v6803_v35 }
 0x190   :  { %5993 = vmatpush3.msra.mxu0 %v7136_v56  ;;  %5994 = vmatprep.mubr.msk.f32.mxu0 %vm6804_vm1, %v6803_v35 }
 0x191   :  { %6004 = vmatpush3.msra.mxu1 %v7141_v57  ;;  %6005 = vmatprep.mubr.msk.f32.mxu1 %vm6804_vm1, %v6803_v35 }
 0x192   :  { %5995 = vmatmul.mubr.msk.f32.vlgmr.msra.gmra.mxu0 %vm140_vm0, %v7299_v30  ;;  %6006 = vmatmul.mubr.msk.f32.vlgmr.msra.gmra.mxu1 %vm140_vm0, %v7299_v30 }
 0x193   :  { %6008 = vmatprep.subr.mxu0 %v6803_v35  ;;  %6019 = vmatprep.subr.mxu1 %v6803_v35 }
 0x194   :  { %6009 = vmatpush3.msra.mxu0 %v7010_v33  ;;  %6020 = vmatpush3.msra.mxu1 %v7012_v34  ;;  %v1426_v33 = vld [vmem:[#allocation2 + $0x8] sm:$0xff] }
 0x195   :  { %6010 = vmatprep.subr.mxu0 %v6803_v35  ;;  %6021 = vmatprep.subr.mxu1 %v6803_v35 }
 0x196   :  { %6011 = vmatpush3.msra.mxu0 %v7026_v36  ;;  %6022 = vmatpush3.msra.mxu1 %v7028_v37 }
 0x197   :  { %6012 = vmatprep.subr.mxu0 %v6803_v35  ;;  %6023 = vmatprep.subr.mxu1 %v6803_v35 }
 0x198   :  { %6013 = vmatpush3.msra.mxu0 %v7042_v38  ;;  %6024 = vmatpush3.msra.mxu1 %v7044_v39 }
 0x199   :  { %6014 = vmatprep.subr.mxu0 %v6803_v35  ;;  %6025 = vmatprep.subr.mxu1 %v6803_v35 }
 0x19a   :  { %6015 = vmatpush3.msra.mxu0 %v7058_v40  ;;  %6026 = vmatpush3.msra.mxu1 %v7060_v41 }
 0x19b   :  { %6016 = vmatprep.mubr.msk.f32.mxu0 %vm6804_vm1, %v6803_v35  ;;  %6027 = vmatprep.mubr.msk.f32.mxu1 %vm6804_vm1, %v6803_v35 }
 0x19c   :  { %6030 = vmatprep.subr.mxu0 %v6803_v35  ;;  %6041 = vmatprep.subr.mxu1 %v6803_v35 }
 0x23f   :  { %v1500_v34 = vpop.f32.mrf.mxu0  ;;  %v1570_v6 = vpop.f32.mrf.mxu1 }
 0x240   :  { %v1574_v7 = vadd.f32 %v1500_v34, %v1426_v33  ;;  %v1581_v14 = vadd.f32 %v1570_v6, %v1428_v11  ;;  %v1669_v6 = vld [vmem:[#allocation7 + $0x30] sm:$0xff] }
 0x241   :  { %v5952_v59 = vpop.f32.mrf.mxu0  ;;  %v5963_v60 = vpop.f32.mrf.mxu1 }
 0x242   :  { %v5335_v8 = vmul.f32 -1.442695, %v1574_v7  ;;  %v5336_v17 = vmul.f32 -1.442695, %v1581_v14  ;;  %v2149_v14 = vld [vmem:[#allocation6 + $0x28] sm:$0xff] }
 0x244   :  { %6478 = vpow2.f32 %v5335_v8 }
 0x248   :  { %v1654_v9 = vpop.f32.mrf.mxu0  ;;  %v1739_v63 = vpop.f32.mrf.mxu1 }
 0x249   :  { %v1813_v0 = vadd.f32 %v1739_v63, %v1665_v10  ;;  %v1655_v58 = vadd.f32 %v7267_v15, %v1654_v9 }
 0x24a   :  { %v5974_v12 = vpop.f32.mrf.mxu0  ;;  %v5985_v13 = vpop.f32.mrf.mxu1 }
 0x24b   :  { %v5340_v16 = vmul.f32 -1.442695, %v1813_v0 }
 0x24d   :  { %6480 = vpow2.f32 %v5340_v16 }
 0x24e   :  { %6482 = vpow2.f32 %v5336_v17 }
 0x251   :  { %v6479_v18 = vpop.eup %6478 }
 0x252   :  { %v1578_v19 = vadd.f32 1.0, %v6479_v18  ;;  %v1809_v20 = vpop.f32.mrf.mxu0  ;;  %v1893_v21 = vpop.f32.mrf.mxu1 }
 0x253   :  { %v1820_v24 = vadd.f32 %v1809_v20, %v1667_v22  ;;  %v1894_v29 = vadd.f32 %v7273_v23, %v1893_v21 }
 0x254   :  { %6484 = vrcp.f32 %v1578_v19  ;;  %v5996_v25 = vpop.f32.mrf.mxu0  ;;  %v6007_v26 = vpop.f32.mrf.mxu1 }
 0x255   :  { %v5341_v27 = vmul.f32 -1.442695, %v1820_v24 }
 0x257   :  { %6486 = vpow2.f32 %v5341_v27  ;;  %v1912_v27 = vld [vmem:[#allocation4 + $0x10] sm:$0xff] }
 0x25a   :  { %v6481_v28 = vpop.eup %6480 }
 0x25b   :  { %v1817_v31 = vadd.f32 1.0, %v6481_v28  ;;  %v6483_v32 = vpop.eup %6482 }
 0x25c   :  { %v1585_v3 = vadd.f32 1.0, %v6483_v32 }
 0x25d   :  { %6488 = vrcp.f32 %v1817_v31 }
 0x261   :  { %v6485_v61 = vpop.eup %6484 }
 0x262   :  { %v1658_v62 = vmul.f32 %v6485_v61, %v1655_v58 }
 0x264   :  { %v1659_v4 = vadd.f32 %v1658_v62, %v1430_v1  ;;  %v6487_v5 = vpop.eup %6486  ;;  %v2151_v1 = vld [vmem:[#allocation7 + $0x28] sm:$0xff] }
 0x265   :  { %v1824_v7 = vadd.f32 1.0, %v6487_v5 }
 0x266   :  { %6490 = vtanh.f32 %v1659_v4 }
 0x267   :  { %6492 = vrcp.f32 %v1585_v3 }
 0x26a   :  { %v6489_v33 = vpop.eup %6488 }
 0x26b   :  { %v1897_v34 = vmul.f32 %v6489_v33, %v1894_v29 }
 0x26d   :  { %v1898_v59 = vadd.f32 %v1897_v34, %v1669_v6 }
 0x26f   :  { %6494 = vtanh.f32 %v1898_v59  ;;  %v7458_v59 = vld [vmem:[#allocation16 + $0x18] sm:$0xff] }
 0x270   :  { %6496 = vrcp.f32 %v1824_v7  ;;  %v7455_v7 = vld [vmem:[#allocation13 + $0x58] sm:$0xff] }
 0x273   :  { %v6491_v60 = vpop.eup %6490 }
 0x274   :  { %v1661_v8 = vsub.f32 %v7276_v2, %v6491_v60  ;;  %v6493_v9 = vpop.eup %6492 }
 0x276   :  { %v1662_v10 = vmul.f32 %v6493_v9, %v1661_v8  ;;  %v7463_v8 = vld [vmem:[#allocation13 + $0x50] sm:$0xff] }
 0x277   :  { %v7466_v9 = vld [vmem:[#allocation16 + $0x10] sm:$0xff] }
 0x278   :  { %v7359_v63 = vadd.f32 %v6491_v60, %v1662_v10 }
 0x27a   :  { %1904 = vst.msk [vmem:[#allocation8 + $0x8] sm:$0xff] %vm140_vm0, %v7359_v63  ;;  %6017 = vmatmul.mubr.msk.f32.vlgmr.msra.gmra.mxu0 %vm140_vm0, %v7359_v63  ;;  %6028 = vmatmul.mubr.msk.f32.vlgmr.msra.gmra.mxu1 %vm140_vm0, %v7359_v63 }
 0x27b   :  { %6031 = vmatpush3.msra.mxu0 %v7074_v42  ;;  %6042 = vmatpush3.msra.mxu1 %v7076_v43 }
 0x27c   :  { %v6495_v0 = vpop.eup %6494  ;;  %6032 = vmatprep.subr.mxu0 %v6803_v35  ;;  %6043 = vmatprep.subr.mxu1 %v6803_v35 }
 0x27d   :  { %6033 = vmatpush3.msra.mxu0 %v7082_v44  ;;  %6044 = vmatpush3.msra.mxu1 %v7084_v45  ;;  %v1900_v2 = vsub.f32 %v7299_v30, %v6495_v0  ;;  %v6497_v11 = vpop.eup %6496  ;;  %v7420_v44 = vld [vmem:[#allocation13 + $0x18] sm:$0xff] }
 0x27e   :  { %6034 = vmatprep.subr.mxu0 %v6803_v35  ;;  %6045 = vmatprep.subr.mxu1 %v6803_v35  ;;  %v7423_v45 = vld [vmem:[#allocation13 + $0x38] sm:$0xff] }
 0x27f   :  { %6035 = vmatpush3.msra.mxu0 %v7090_v46  ;;  %6046 = vmatpush3.msra.mxu1 %v7092_v47  ;;  %v1901_v42 = vmul.f32 %v6497_v11, %v1900_v2  ;;  %v7475_v2 = vld [vmem:[#allocation16 + $0x8] sm:$0xff] }
 0x280   :  { %6036 = vmatprep.subr.mxu0 %v6803_v35  ;;  %6047 = vmatprep.subr.mxu1 %v6803_v35 }
 0x281   :  { %6037 = vmatpush3.msra.mxu0 %v7098_v48  ;;  %6038 = vmatprep.mubr.msk.f32.mxu0 %vm6804_vm1, %v6803_v35  ;;  %v7383_v43 = vadd.f32 %v6495_v0, %v1901_v42  ;;  %v7472_v0 = vld [vmem:[#allocation13 + $0x48] sm:$0xff]  ;;  %v7480_v42 = vld [vmem:[#allocation13 + $0x40] sm:$0xff] }
 0x282   :  { %6048 = vmatpush3.msra.mxu1 %v7100_v49  ;;  %6049 = vmatprep.mubr.msk.f32.mxu1 %vm6804_vm1, %v6803_v35 }
 0x283   :  { %6039 = vmatmul.mubr.msk.f32.vlgmr.msra.gmra.mxu0 %vm140_vm0, %v7359_v63  ;;  %1906 = vst.msk [vmem:[#allocation9 + $0x30] sm:$0xff] %vm140_vm0, %v7383_v43  ;;  %6050 = vmatmul.mubr.msk.f32.vlgmr.msra.gmra.mxu1 %vm140_vm0, %v7383_v43 }
 0x284   :  { %6052 = vmatprep.subr.mxu0 %v6803_v35  ;;  %6063 = vmatprep.subr.mxu1 %v6803_v35 }
 0x285   :  { %6053 = vmatpush3.msra.mxu0 %v7112_v50  ;;  %6064 = vmatpush3.msra.mxu1 %v7116_v51  ;;  %v1910_v51 = vld [vmem:[#allocation3 + $0x10] sm:$0xff] }
 0x286   :  { %6054 = vmatprep.subr.mxu0 %v6803_v35  ;;  %6065 = vmatprep.subr.mxu1 %v6803_v35 }
 0x287   :  { %6055 = vmatpush3.msra.mxu0 %v7119_v52  ;;  %6066 = vmatpush3.msra.mxu1 %v7125_v53 }
 0x288   :  { %6056 = vmatprep.subr.mxu0 %v6803_v35  ;;  %6067 = vmatprep.subr.mxu1 %v6803_v35 }
 0x289   :  { %6057 = vmatpush3.msra.mxu0 %v7128_v54  ;;  %6068 = vmatpush3.msra.mxu1 %v7133_v55 }
 0x28a   :  { %6058 = vmatprep.subr.mxu0 %v6803_v35  ;;  %6069 = vmatprep.subr.mxu1 %v6803_v35 }
 0x28b   :  { %6059 = vmatpush3.msra.mxu0 %v7136_v56  ;;  %6060 = vmatprep.mubr.msk.f32.mxu0 %vm6804_vm1, %v6803_v35 }
 0x28c   :  { %6070 = vmatpush3.msra.mxu1 %v7141_v57  ;;  %6071 = vmatprep.mubr.msk.f32.mxu1 %vm6804_vm1, %v6803_v35 }
 0x28d   :  { %6061 = vmatmul.mubr.msk.f32.vlgmr.msra.gmra.mxu0 %vm140_vm0, %v7383_v43  ;;  %6072 = vmatmul.mubr.msk.f32.vlgmr.msra.gmra.mxu1 %vm140_vm0, %v7383_v43 }
 0x28e   :  { %6074 = vmatprep.subr.mxu0 %v6803_v35  ;;  %6085 = vmatprep.subr.mxu1 %v6803_v35 }
 0x28f   :  { %6075 = vmatpush3.msra.mxu0 %v7420_v44  ;;  %6086 = vmatpush3.msra.mxu1 %v7423_v45 }
 0x290   :  { %6076 = vmatprep.subr.mxu0 %v6803_v35  ;;  %6087 = vmatprep.subr.mxu1 %v6803_v35 }
 0x291   :  { %6077 = vmatpush3.msra.mxu0 %v7026_v36  ;;  %6088 = vmatpush3.msra.mxu1 %v7028_v37  ;;  %v1908_v36 = vld [vmem:[#allocation2 + $0x10] sm:$0xff] }
 0x292   :  { %6078 = vmatprep.subr.mxu0 %v6803_v35  ;;  %6089 = vmatprep.subr.mxu1 %v6803_v35 }
 0x293   :  { %6079 = vmatpush3.msra.mxu0 %v7042_v38  ;;  %6090 = vmatpush3.msra.mxu1 %v7044_v39 }
 0x294   :  { %6080 = vmatprep.subr.mxu0 %v6803_v35  ;;  %6091 = vmatprep.subr.mxu1 %v6803_v35 }
 0x295   :  { %6081 = vmatpush3.msra.mxu0 %v7058_v40  ;;  %6092 = vmatpush3.msra.mxu1 %v7060_v41  ;;  %v2147_v41 = vld [vmem:[#allocation5 + $0x28] sm:$0xff] }
 0x296   :  { %6082 = vmatprep.mubr.msk.f32.mxu0 %vm6804_vm1, %v6803_v35  ;;  %6093 = vmatprep.mubr.msk.f32.mxu1 %vm6804_vm1, %v6803_v35 }
 0x297   :  { %6096 = vmatprep.subr.mxu0 %v6803_v35  ;;  %6107 = vmatprep.subr.mxu1 %v6803_v35 }
 0x33a   :  { %v1982_v37 = vpop.f32.mrf.mxu0  ;;  %v2052_v38 = vpop.f32.mrf.mxu1 }
 0x33b   :  { %v2056_v39 = vadd.f32 %v1982_v37, %v1908_v36  ;;  %v2063_v54 = vadd.f32 %v2052_v38, %v1910_v51  ;;  %v7487_v36 = vld [vmem:[#allocation16] sm:$0xff]  ;;  %v7500_v37 = vld [vmem:[#allocation16 + $0x38] sm:$0xff]  ;;  %v7552_v51 = vld [vmem:[#allocation13 + $0x8] sm:$0xff] }
 0x33c   :  { %v6018_v46 = vpop.f32.mrf.mxu0  ;;  %v6029_v47 = vpop.f32.mrf.mxu1  ;;  %v7503_v38 = vld [vmem:[#allocation16 + $0x58] sm:$0xff] }
 0x33d   :  { %v5345_v48 = vmul.f32 -1.442695, %v2056_v39  ;;  %v5346_v56 = vmul.f32 -1.442695, %v2063_v54  ;;  %v7508_v39 = vld [vmem:[#allocation16 + $0x30] sm:$0xff]  ;;  %v7516_v47 = vld [vmem:[#allocation16 + $0x28] sm:$0xff] }
 0x33e   :  { %v7511_v46 = vld [vmem:[#allocation16 + $0x50] sm:$0xff]  ;;  %v7563_v54 = vld [vmem:[#allocation13 + $0x20] sm:$0xff] }
 0x33f   :  { %6498 = vpow2.f32 %v5345_v48  ;;  %v7519_v48 = vld [vmem:[#allocation16 + $0x48] sm:$0xff] }
 0x343   :  { %v2136_v40 = vpop.f32.mrf.mxu0  ;;  %v2221_v49 = vpop.f32.mrf.mxu1 }
 0x344   :  { %v2295_v50 = vadd.f32 %v2221_v49, %v2147_v41  ;;  %v2137_v24 = vadd.f32 %v7267_v15, %v2136_v40  ;;  %v7524_v40 = vld [vmem:[#allocation16 + $0x20] sm:$0xff]  ;;  %v7544_v49 = vld [vmem:[#allocation13 + $0x10] sm:$0xff] }
 0x345   :  { %v6040_v52 = vpop.f32.mrf.mxu0  ;;  %v6051_v53 = vpop.f32.mrf.mxu1  ;;  %v7529_v41 = vld [vmem:[#allocation16 + $0x40] sm:$0xff] }
 0x346   :  { %v5350_v55 = vmul.f32 -1.442695, %v2295_v50  ;;  %v7547_v50 = vld [vmem:[#allocation13 + $0x30] sm:$0xff]  ;;  %v7555_v52 = vld [vmem:[#allocation13 + $0x28] sm:$0xff]  ;;  %v7560_v53 = vld [vmem:[#allocation13] sm:$0xff] }
 0x348   :  { %6500 = vpow2.f32 %v5350_v55  ;;  %v2390_v55 = vld [vmem:[#allocation2 + $0x18] sm:$0xff] }
 0x349   :  { %6502 = vpow2.f32 %v5346_v56 }
 0x34c   :  { %v6499_v57 = vpop.eup %6498 }
 0x34d   :  { %v2060_v30 = vadd.f32 1.0, %v6499_v57  ;;  %v2291_v12 = vpop.f32.mrf.mxu0  ;;  %v2375_v13 = vpop.f32.mrf.mxu1 }
 0x34e   :  { %v2302_v16 = vadd.f32 %v2291_v12, %v2149_v14  ;;  %v2376_v58 = vadd.f32 %v7273_v23, %v2375_v13 }
 0x34f   :  { %6504 = vrcp.f32 %v2060_v30  ;;  %v6062_v17 = vpop.f32.mrf.mxu0  ;;  %v6073_v18 = vpop.f32.mrf.mxu1 }
 0x350   :  { %v5351_v19 = vmul.f32 -1.442695, %v2302_v16  ;;  %v2629_v17 = vld [vmem:[#allocation5 + $0x20] sm:$0xff] }
 0x352   :  { %6506 = vpow2.f32 %v5351_v19 }
 0x355   :  { %v6501_v20 = vpop.eup %6500 }
 0x356   :  { %v2299_v21 = vadd.f32 1.0, %v6501_v20  ;;  %v6503_v22 = vpop.eup %6502  ;;  %v2392_v20 = vld [vmem:[#allocation3 + $0x18] sm:$0xff] }
 0x357   :  { %v2067_v28 = vadd.f32 1.0, %v6503_v22 }
 0x358   :  { %6508 = vrcp.f32 %v2299_v21 }
 0x35c   :  { %v6505_v25 = vpop.eup %6504 }
 0x35d   :  { %v2140_v26 = vmul.f32 %v6505_v25, %v2137_v24 }
 0x35f   :  { %v2141_v31 = vadd.f32 %v2140_v26, %v1912_v27  ;;  %v6507_v32 = vpop.eup %6506 }
 0x360   :  { %v2306_v3 = vadd.f32 1.0, %v6507_v32 }
 0x361   :  { %6510 = vtanh.f32 %v2141_v31 }
 0x362   :  { %6512 = vrcp.f32 %v2067_v28 }
 0x365   :  { %v6509_v61 = vpop.eup %6508 }
 0x366   :  { %v2379_v62 = vmul.f32 %v6509_v61, %v2376_v58  ;;  %v2631_v58 = vld [vmem:[#allocation6 + $0x20] sm:$0xff] }
 0x368   :  { %v2380_v4 = vadd.f32 %v2379_v62, %v2151_v1 }
 0x36a   :  { %6514 = vtanh.f32 %v2380_v4 }
 0x36b   :  { %6516 = vrcp.f32 %v2306_v3 }
 0x36e   :  { %v6511_v5 = vpop.eup %6510 }
 0x36f   :  { %v2143_v29 = vsub.f32 %v7359_v63, %v6511_v5  ;;  %v6513_v33 = vpop.eup %6512 }
 0x371   :  { %v2144_v34 = vmul.f32 %v6513_v33, %v2143_v29 }
 0x373   :  { %v7447_v6 = vadd.f32 %v6511_v5, %v2144_v34 }
 0x375   :  { %2386 = vst.msk [vmem:[#allocation8 + $0x10] sm:$0xff] %vm140_vm0, %v7447_v6  ;;  %6083 = vmatmul.mubr.msk.f32.vlgmr.msra.gmra.mxu0 %vm140_vm0, %v7447_v6  ;;  %6094 = vmatmul.mubr.msk.f32.vlgmr.msra.gmra.mxu1 %vm140_vm0, %v7447_v6 }
 0x376   :  { %6097 = vmatpush3.msra.mxu0 %v7455_v7  ;;  %6108 = vmatpush3.msra.mxu1 %v7458_v59 }
 0x377   :  { %v6515_v60 = vpop.eup %6514  ;;  %6098 = vmatprep.subr.mxu0 %v6803_v35  ;;  %6109 = vmatprep.subr.mxu1 %v6803_v35 }
 0x378   :  { %6099 = vmatpush3.msra.mxu0 %v7463_v8  ;;  %6110 = vmatpush3.msra.mxu1 %v7466_v9  ;;  %v2382_v10 = vsub.f32 %v7383_v43, %v6515_v60  ;;  %v6517_v63 = vpop.eup %6516 }
 0x379   :  { %6100 = vmatprep.subr.mxu0 %v6803_v35  ;;  %6111 = vmatprep.subr.mxu1 %v6803_v35 }
 0x37a   :  { %6101 = vmatpush3.msra.mxu0 %v7472_v0  ;;  %6112 = vmatpush3.msra.mxu1 %v7475_v2  ;;  %v2383_v11 = vmul.f32 %v6517_v63, %v2382_v10  ;;  %v2394_v10 = vld [vmem:[#allocation4 + $0x18] sm:$0xff] }
 0x37b   :  { %6102 = vmatprep.subr.mxu0 %v6803_v35  ;;  %6113 = vmatprep.subr.mxu1 %v6803_v35 }
 0x37c   :  { %6103 = vmatpush3.msra.mxu0 %v7480_v42  ;;  %6104 = vmatprep.mubr.msk.f32.mxu0 %vm6804_vm1, %v6803_v35  ;;  %v7485_v43 = vadd.f32 %v6515_v60, %v2383_v11 }
 0x37d   :  { %6114 = vmatpush3.msra.mxu1 %v7487_v36  ;;  %6115 = vmatprep.mubr.msk.f32.mxu1 %vm6804_vm1, %v6803_v35 }
 0x37e   :  { %6105 = vmatmul.mubr.msk.f32.vlgmr.msra.gmra.mxu0 %vm140_vm0, %v7447_v6  ;;  %2388 = vst.msk [vmem:[#allocation9 + $0x28] sm:$0xff] %vm140_vm0, %v7485_v43  ;;  %6116 = vmatmul.mubr.msk.f32.vlgmr.msra.gmra.mxu1 %vm140_vm0, %v7485_v43 }
 0x37f   :  { %6118 = vmatprep.subr.mxu0 %v6803_v35  ;;  %6129 = vmatprep.subr.mxu1 %v6803_v35 }
 0x380   :  { %6119 = vmatpush3.msra.mxu0 %v7500_v37  ;;  %6130 = vmatpush3.msra.mxu1 %v7503_v38 }
 0x381   :  { %6120 = vmatprep.subr.mxu0 %v6803_v35  ;;  %6131 = vmatprep.subr.mxu1 %v6803_v35 }
 0x382   :  { %6121 = vmatpush3.msra.mxu0 %v7508_v39  ;;  %6132 = vmatpush3.msra.mxu1 %v7511_v46 }
 0x383   :  { %6122 = vmatprep.subr.mxu0 %v6803_v35  ;;  %6133 = vmatprep.subr.mxu1 %v6803_v35 }
 0x384   :  { %6123 = vmatpush3.msra.mxu0 %v7516_v47  ;;  %6134 = vmatpush3.msra.mxu1 %v7519_v48 }
 0x385   :  { %6124 = vmatprep.subr.mxu0 %v6803_v35  ;;  %6135 = vmatprep.subr.mxu1 %v6803_v35 }
 0x386   :  { %6125 = vmatpush3.msra.mxu0 %v7524_v40  ;;  %6126 = vmatprep.mubr.msk.f32.mxu0 %vm6804_vm1, %v6803_v35 }
 0x387   :  { %6136 = vmatpush3.msra.mxu1 %v7529_v41  ;;  %6137 = vmatprep.mubr.msk.f32.mxu1 %vm6804_vm1, %v6803_v35 }
 0x388   :  { %6127 = vmatmul.mubr.msk.f32.vlgmr.msra.gmra.mxu0 %vm140_vm0, %v7485_v43  ;;  %6138 = vmatmul.mubr.msk.f32.vlgmr.msra.gmra.mxu1 %vm140_vm0, %v7485_v43 }
 0x389   :  { %6140 = vmatprep.subr.mxu0 %v6803_v35  ;;  %6151 = vmatprep.subr.mxu1 %v6803_v35 }
 0x38a   :  { %6141 = vmatpush3.msra.mxu0 %v7420_v44  ;;  %6152 = vmatpush3.msra.mxu1 %v7423_v45 }
 0x38b   :  { %6142 = vmatprep.subr.mxu0 %v6803_v35  ;;  %6153 = vmatprep.subr.mxu1 %v6803_v35 }
 0x38c   :  { %6143 = vmatpush3.msra.mxu0 %v7544_v49  ;;  %6154 = vmatpush3.msra.mxu1 %v7547_v50 }
 0x38d   :  { %6144 = vmatprep.subr.mxu0 %v6803_v35  ;;  %6155 = vmatprep.subr.mxu1 %v6803_v35 }
 0x38e   :  { %6145 = vmatpush3.msra.mxu0 %v7552_v51  ;;  %6156 = vmatpush3.msra.mxu1 %v7555_v52 }
 0x38f   :  { %6146 = vmatprep.subr.mxu0 %v6803_v35  ;;  %6157 = vmatprep.subr.mxu1 %v6803_v35 }
 0x390   :  { %6147 = vmatpush3.msra.mxu0 %v7560_v53  ;;  %6158 = vmatpush3.msra.mxu1 %v7563_v54 }
 0x391   :  { %6148 = vmatprep.mubr.msk.f32.mxu0 %vm6804_vm1, %v6803_v35  ;;  %6159 = vmatprep.mubr.msk.f32.mxu1 %vm6804_vm1, %v6803_v35 }
 0x392   :  { %6162 = vmatprep.subr.mxu0 %v6803_v35  ;;  %6173 = vmatprep.subr.mxu1 %v6803_v35 }
 0x435   :  { %v2464_v56 = vpop.f32.mrf.mxu0  ;;  %v2534_v57 = vpop.f32.mrf.mxu1 }
 0x436   :  { %v2538_v30 = vadd.f32 %v2464_v56, %v2390_v55  ;;  %v2545_v24 = vadd.f32 %v2534_v57, %v2392_v20 }
 0x437   :  { %v6084_v12 = vpop.f32.mrf.mxu0  ;;  %v6095_v13 = vpop.f32.mrf.mxu1 }
 0x438   :  { %v5355_v14 = vmul.f32 -1.442695, %v2538_v30  ;;  %v5356_v26 = vmul.f32 -1.442695, %v2545_v24  ;;  %v2633_v12 = vld [vmem:[#allocation7 + $0x20] sm:$0xff] }
 0x43a   :  { %6518 = vpow2.f32 %v5355_v14 }
 0x43e   :  { %v2618_v16 = vpop.f32.mrf.mxu0  ;;  %v2703_v18 = vpop.f32.mrf.mxu1 }
 0x43f   :  { %v2777_v19 = vadd.f32 %v2703_v18, %v2629_v17  ;;  %v2619_v33 = vadd.f32 %v7267_v15, %v2618_v16 }
 0x440   :  { %v6106_v21 = vpop.f32.mrf.mxu0  ;;  %v6117_v22 = vpop.f32.mrf.mxu1 }
 0x441   :  { %v5360_v25 = vmul.f32 -1.442695, %v2777_v19 }
 0x443   :  { %6520 = vpow2.f32 %v5360_v25  ;;  %v2872_v25 = vld [vmem:[#allocation2 + $0x20] sm:$0xff] }
 0x444   :  { %6522 = vpow2.f32 %v5356_v26 }
 0x447   :  { %v6519_v27 = vpop.eup %6518 }
 0x448   :  { %v2542_v28 = vadd.f32 1.0, %v6519_v27  ;;  %v2773_v31 = vpop.f32.mrf.mxu0  ;;  %v2857_v32 = vpop.f32.mrf.mxu1 }
 0x449   :  { %v2784_v61 = vadd.f32 %v2773_v31, %v2631_v58  ;;  %v2858_v56 = vadd.f32 %v7273_v23, %v2857_v32 }
 0x44a   :  { %6524 = vrcp.f32 %v2542_v28  ;;  %v6128_v62 = vpop.f32.mrf.mxu0  ;;  %v6139_v1 = vpop.f32.mrf.mxu1 }
 0x44b   :  { %v5361_v3 = vmul.f32 -1.442695, %v2784_v61  ;;  %v3111_v62 = vld [vmem:[#allocation5 + $0x18] sm:$0xff] }
 0x44d   :  { %6526 = vpow2.f32 %v5361_v3 }
 0x450   :  { %v6521_v4 = vpop.eup %6520 }
 0x451   :  { %v2781_v5 = vadd.f32 1.0, %v6521_v4  ;;  %v6523_v29 = vpop.eup %6522  ;;  %v2874_v4 = vld [vmem:[#allocation3 + $0x20] sm:$0xff] }
 0x452   :  { %v2549_v63 = vadd.f32 1.0, %v6523_v29 }
 0x453   :  { %6528 = vrcp.f32 %v2781_v5 }
 0x457   :  { %v6525_v34 = vpop.eup %6524 }
 0x458   :  { %v2622_v60 = vmul.f32 %v6525_v34, %v2619_v33 }
 0x45a   :  { %v2623_v11 = vadd.f32 %v2622_v60, %v2394_v10  ;;  %v6527_v55 = vpop.eup %6526 }
 0x45b   :  { %v2788_v13 = vadd.f32 1.0, %v6527_v55 }
 0x45c   :  { %6530 = vtanh.f32 %v2623_v11 }
 0x45d   :  { %6532 = vrcp.f32 %v2549_v63 }
 0x460   :  { %v6529_v57 = vpop.eup %6528 }
 0x461   :  { %v2861_v30 = vmul.f32 %v6529_v57, %v2858_v56  ;;  %v3113_v56 = vld [vmem:[#allocation6 + $0x18] sm:$0xff] }
 0x463   :  { %v2862_v14 = vadd.f32 %v2861_v30, %v2633_v12 }
 0x465   :  { %6534 = vtanh.f32 %v2862_v14 }
 0x466   :  { %6536 = vrcp.f32 %v2788_v13 }
 0x469   :  { %v6531_v17 = vpop.eup %6530 }
 0x46a   :  { %v2625_v16 = vsub.f32 %v7447_v6, %v6531_v17  ;;  %v6533_v18 = vpop.eup %6532 }
 0x46c   :  { %v2626_v19 = vmul.f32 %v6533_v18, %v2625_v16 }
 0x46e   :  { %v7575_v20 = vadd.f32 %v6531_v17, %v2626_v19 }
 0x470   :  { %2868 = vst.msk [vmem:[#allocation8 + $0x18] sm:$0xff] %vm140_vm0, %v7575_v20  ;;  %6149 = vmatmul.mubr.msk.f32.vlgmr.msra.gmra.mxu0 %vm140_vm0, %v7575_v20  ;;  %6160 = vmatmul.mubr.msk.f32.vlgmr.msra.gmra.mxu1 %vm140_vm0, %v7575_v20 }
 0x471   :  { %6163 = vmatpush3.msra.mxu0 %v7455_v7  ;;  %6174 = vmatpush3.msra.mxu1 %v7458_v59 }
 0x472   :  { %v6535_v21 = vpop.eup %6534  ;;  %6164 = vmatprep.subr.mxu0 %v6803_v35  ;;  %6175 = vmatprep.subr.mxu1 %v6803_v35 }
 0x473   :  { %6165 = vmatpush3.msra.mxu0 %v7463_v8  ;;  %6176 = vmatpush3.msra.mxu1 %v7466_v9  ;;  %v2864_v6 = vsub.f32 %v7485_v43, %v6535_v21  ;;  %v6537_v22 = vpop.eup %6536 }
 0x474   :  { %6166 = vmatprep.subr.mxu0 %v6803_v35  ;;  %6177 = vmatprep.subr.mxu1 %v6803_v35 }
 0x475   :  { %6167 = vmatpush3.msra.mxu0 %v7472_v0  ;;  %6178 = vmatpush3.msra.mxu1 %v7475_v2  ;;  %v2865_v24 = vmul.f32 %v6537_v22, %v2864_v6  ;;  %v2876_v6 = vld [vmem:[#allocation4 + $0x20] sm:$0xff] }
 0x476   :  { %6168 = vmatprep.subr.mxu0 %v6803_v35  ;;  %6179 = vmatprep.subr.mxu1 %v6803_v35 }
 0x477   :  { %6169 = vmatpush3.msra.mxu0 %v7480_v42  ;;  %6170 = vmatprep.mubr.msk.f32.mxu0 %vm6804_vm1, %v6803_v35  ;;  %v7599_v43 = vadd.f32 %v6535_v21, %v2865_v24 }
 0x478   :  { %6180 = vmatpush3.msra.mxu1 %v7487_v36  ;;  %6181 = vmatprep.mubr.msk.f32.mxu1 %vm6804_vm1, %v6803_v35 }
 0x479   :  { %6171 = vmatmul.mubr.msk.f32.vlgmr.msra.gmra.mxu0 %vm140_vm0, %v7575_v20  ;;  %2870 = vst.msk [vmem:[#allocation9 + $0x20] sm:$0xff] %vm140_vm0, %v7599_v43  ;;  %6182 = vmatmul.mubr.msk.f32.vlgmr.msra.gmra.mxu1 %vm140_vm0, %v7599_v43 }
 0x47a   :  { %6184 = vmatprep.subr.mxu0 %v6803_v35  ;;  %6195 = vmatprep.subr.mxu1 %v6803_v35 }
 0x47b   :  { %6185 = vmatpush3.msra.mxu0 %v7500_v37  ;;  %6196 = vmatpush3.msra.mxu1 %v7503_v38 }
 0x47c   :  { %6186 = vmatprep.subr.mxu0 %v6803_v35  ;;  %6197 = vmatprep.subr.mxu1 %v6803_v35 }
 0x47d   :  { %6187 = vmatpush3.msra.mxu0 %v7508_v39  ;;  %6198 = vmatpush3.msra.mxu1 %v7511_v46 }
 0x47e   :  { %6188 = vmatprep.subr.mxu0 %v6803_v35  ;;  %6199 = vmatprep.subr.mxu1 %v6803_v35 }
 0x47f   :  { %6189 = vmatpush3.msra.mxu0 %v7516_v47  ;;  %6200 = vmatpush3.msra.mxu1 %v7519_v48 }
 0x480   :  { %6190 = vmatprep.subr.mxu0 %v6803_v35  ;;  %6201 = vmatprep.subr.mxu1 %v6803_v35 }
 0x481   :  { %6191 = vmatpush3.msra.mxu0 %v7524_v40  ;;  %6192 = vmatprep.mubr.msk.f32.mxu0 %vm6804_vm1, %v6803_v35 }
 0x482   :  { %6202 = vmatpush3.msra.mxu1 %v7529_v41  ;;  %6203 = vmatprep.mubr.msk.f32.mxu1 %vm6804_vm1, %v6803_v35 }
 0x483   :  { %6193 = vmatmul.mubr.msk.f32.vlgmr.msra.gmra.mxu0 %vm140_vm0, %v7599_v43  ;;  %6204 = vmatmul.mubr.msk.f32.vlgmr.msra.gmra.mxu1 %vm140_vm0, %v7599_v43 }
 0x484   :  { %6206 = vmatprep.subr.mxu0 %v6803_v35  ;;  %6217 = vmatprep.subr.mxu1 %v6803_v35 }
 0x485   :  { %6207 = vmatpush3.msra.mxu0 %v7420_v44  ;;  %6218 = vmatpush3.msra.mxu1 %v7423_v45 }
 0x486   :  { %6208 = vmatprep.subr.mxu0 %v6803_v35  ;;  %6219 = vmatprep.subr.mxu1 %v6803_v35 }
 0x487   :  { %6209 = vmatpush3.msra.mxu0 %v7544_v49  ;;  %6220 = vmatpush3.msra.mxu1 %v7547_v50 }
 0x488   :  { %6210 = vmatprep.subr.mxu0 %v6803_v35  ;;  %6221 = vmatprep.subr.mxu1 %v6803_v35 }
 0x489   :  { %6211 = vmatpush3.msra.mxu0 %v7552_v51  ;;  %6222 = vmatpush3.msra.mxu1 %v7555_v52 }
 0x48a   :  { %6212 = vmatprep.subr.mxu0 %v6803_v35  ;;  %6223 = vmatprep.subr.mxu1 %v6803_v35 }
 0x48b   :  { %6213 = vmatpush3.msra.mxu0 %v7560_v53  ;;  %6224 = vmatpush3.msra.mxu1 %v7563_v54 }
 0x48c   :  { %6214 = vmatprep.mubr.msk.f32.mxu0 %vm6804_vm1, %v6803_v35  ;;  %6225 = vmatprep.mubr.msk.f32.mxu1 %vm6804_vm1, %v6803_v35 }
 0x48d   :  { %6228 = vmatprep.subr.mxu0 %v6803_v35  ;;  %6239 = vmatprep.subr.mxu1 %v6803_v35 }
 0x530   :  { %v2946_v26 = vpop.f32.mrf.mxu0  ;;  %v3016_v27 = vpop.f32.mrf.mxu1 }
 0x531   :  { %v3020_v28 = vadd.f32 %v2946_v26, %v2872_v25  ;;  %v3027_v33 = vadd.f32 %v3016_v27, %v2874_v4 }
 0x532   :  { %v6150_v31 = vpop.f32.mrf.mxu0  ;;  %v6161_v32 = vpop.f32.mrf.mxu1 }
 0x533   :  { %v5365_v58 = vmul.f32 -1.442695, %v3020_v28  ;;  %v5366_v60 = vmul.f32 -1.442695, %v3027_v33  ;;  %v3115_v31 = vld [vmem:[#allocation7 + $0x18] sm:$0xff] }
 0x535   :  { %6538 = vpow2.f32 %v5365_v58 }
 0x539   :  { %v3100_v61 = vpop.f32.mrf.mxu0  ;;  %v3185_v1 = vpop.f32.mrf.mxu1 }
 0x53a   :  { %v3259_v3 = vadd.f32 %v3185_v1, %v3111_v62  ;;  %v3101_v18 = vadd.f32 %v7267_v15, %v3100_v61 }
 0x53b   :  { %v6172_v5 = vpop.f32.mrf.mxu0  ;;  %v6183_v29 = vpop.f32.mrf.mxu1 }
 0x53c   :  { %v5370_v34 = vmul.f32 -1.442695, %v3259_v3  ;;  %v3354_v29 = vld [vmem:[#allocation2 + $0x28] sm:$0xff] }
 0x53e   :  { %6540 = vpow2.f32 %v5370_v34 }
 0x53f   :  { %6542 = vpow2.f32 %v5366_v60 }
 0x542   :  { %v6539_v10 = vpop.eup %6538 }
 0x543   :  { %v3024_v63 = vadd.f32 1.0, %v6539_v10  ;;  %v3255_v11 = vpop.f32.mrf.mxu0  ;;  %v3339_v55 = vpop.f32.mrf.mxu1 }
 0x544   :  { %v3266_v57 = vadd.f32 %v3255_v11, %v3113_v56  ;;  %v3340_v26 = vadd.f32 %v7273_v23, %v3339_v55  ;;  %v3593_v56 = vld [vmem:[#allocation5 + $0x10] sm:$0xff] }
 0x545   :  { %6544 = vrcp.f32 %v3024_v63  ;;  %v6194_v30 = vpop.f32.mrf.mxu0  ;;  %v6205_v12 = vpop.f32.mrf.mxu1 }
 0x546   :  { %v5371_v13 = vmul.f32 -1.442695, %v3266_v57  ;;  %v3356_v12 = vld [vmem:[#allocation3 + $0x28] sm:$0xff] }
 0x548   :  { %6546 = vpow2.f32 %v5371_v13 }
 0x54b   :  { %v6541_v14 = vpop.eup %6540 }
 0x54c   :  { %v3263_v17 = vadd.f32 1.0, %v6541_v14  ;;  %v6543_v16 = vpop.eup %6542 }
 0x54d   :  { %v3031_v22 = vadd.f32 1.0, %v6543_v16 }
 0x54e   :  { %6548 = vrcp.f32 %v3263_v17 }
 0x552   :  { %v6545_v19 = vpop.eup %6544 }
 0x553   :  { %v3104_v21 = vmul.f32 %v6545_v19, %v3101_v18 }
 0x555   :  { %v3105_v24 = vadd.f32 %v3104_v21, %v2876_v6  ;;  %v6547_v25 = vpop.eup %6546 }
 0x556   :  { %v3270_v32 = vadd.f32 1.0, %v6547_v25 }
 0x557   :  { %6550 = vtanh.f32 %v3105_v24  ;;  %v3595_v24 = vld [vmem:[#allocation6 + $0x10] sm:$0xff] }
 0x558   :  { %6552 = vrcp.f32 %v3031_v22 }
 0x55b   :  { %v6549_v27 = vpop.eup %6548 }
 0x55c   :  { %v3343_v28 = vmul.f32 %v6549_v27, %v3340_v26 }
 0x55e   :  { %v3344_v58 = vadd.f32 %v3343_v28, %v3115_v31 }
 0x560   :  { %6554 = vtanh.f32 %v3344_v58 }
 0x561   :  { %6556 = vrcp.f32 %v3270_v32 }
 0x564   :  { %v6551_v62 = vpop.eup %6550 }
 0x565   :  { %v3107_v15 = vsub.f32 %v7575_v20, %v6551_v62  ;;  %v6553_v61 = vpop.eup %6552 }
 0x567   :  { %v3108_v1 = vmul.f32 %v6553_v61, %v3107_v15 }
 0x569   :  { %v7659_v3 = vadd.f32 %v6551_v62, %v3108_v1  ;;  %v7743_v62 = vld [vmem:[%s7985_s4 + $0x3] ss:$0 sm:$0xff] }
 0x56b   :  { %3350 = vst.msk [vmem:[#allocation8 + $0x20] sm:$0xff] %vm140_vm0, %v7659_v3  ;;  %6215 = vmatmul.mubr.msk.f32.vlgmr.msra.gmra.mxu0 %vm140_vm0, %v7659_v3  ;;  %6226 = vmatmul.mubr.msk.f32.vlgmr.msra.gmra.mxu1 %vm140_vm0, %v7659_v3 }
 0x56c   :  { %6229 = vmatpush3.msra.mxu0 %v7455_v7  ;;  %6240 = vmatpush3.msra.mxu1 %v7458_v59 }
 0x56d   :  { %v6555_v23 = vpop.eup %6554  ;;  %6230 = vmatprep.subr.mxu0 %v6803_v35  ;;  %6241 = vmatprep.subr.mxu1 %v6803_v35 }
 0x56e   :  { %6231 = vmatpush3.msra.mxu0 %v7463_v8  ;;  %6242 = vmatpush3.msra.mxu1 %v7466_v9  ;;  %v3346_v20 = vsub.f32 %v7599_v43, %v6555_v23  ;;  %v6557_v4 = vpop.eup %6556 }
 0x56f   :  { %6232 = vmatprep.subr.mxu0 %v6803_v35  ;;  %6243 = vmatprep.subr.mxu1 %v6803_v35 }
 0x570   :  { %6233 = vmatpush3.msra.mxu0 %v7472_v0  ;;  %6244 = vmatpush3.msra.mxu1 %v7475_v2  ;;  %v3347_v5 = vmul.f32 %v6557_v4, %v3346_v20 }
 0x571   :  { %6234 = vmatprep.subr.mxu0 %v6803_v35  ;;  %6245 = vmatprep.subr.mxu1 %v6803_v35 }
 0x572   :  { %6235 = vmatpush3.msra.mxu0 %v7480_v42  ;;  %6236 = vmatprep.mubr.msk.f32.mxu0 %vm6804_vm1, %v6803_v35  ;;  %v7683_v43 = vadd.f32 %v6555_v23, %v3347_v5  ;;  %v3358_v23 = vld [vmem:[#allocation4 + $0x28] sm:$0xff] }
 0x573   :  { %6246 = vmatpush3.msra.mxu1 %v7487_v36  ;;  %6247 = vmatprep.mubr.msk.f32.mxu1 %vm6804_vm1, %v6803_v35 }
 0x574   :  { %6237 = vmatmul.mubr.msk.f32.vlgmr.msra.gmra.mxu0 %vm140_vm0, %v7659_v3  ;;  %3352 = vst.msk [vmem:[#allocation9 + $0x18] sm:$0xff] %vm140_vm0, %v7683_v43  ;;  %6248 = vmatmul.mubr.msk.f32.vlgmr.msra.gmra.mxu1 %vm140_vm0, %v7683_v43 }
 0x575   :  { %6250 = vmatprep.subr.mxu0 %v6803_v35  ;;  %6261 = vmatprep.subr.mxu1 %v6803_v35 }
 0x576   :  { %6251 = vmatpush3.msra.mxu0 %v7500_v37  ;;  %6262 = vmatpush3.msra.mxu1 %v7503_v38 }
 0x577   :  { %6252 = vmatprep.subr.mxu0 %v6803_v35  ;;  %6263 = vmatprep.subr.mxu1 %v6803_v35 }
 0x578   :  { %6253 = vmatpush3.msra.mxu0 %v7508_v39  ;;  %6264 = vmatpush3.msra.mxu1 %v7511_v46 }
 0x579   :  { %6254 = vmatprep.subr.mxu0 %v6803_v35  ;;  %6265 = vmatprep.subr.mxu1 %v6803_v35 }
 0x57a   :  { %6255 = vmatpush3.msra.mxu0 %v7516_v47  ;;  %6266 = vmatpush3.msra.mxu1 %v7519_v48 }
 0x57b   :  { %6256 = vmatprep.subr.mxu0 %v6803_v35  ;;  %6267 = vmatprep.subr.mxu1 %v6803_v35 }
 0x57c   :  { %6257 = vmatpush3.msra.mxu0 %v7524_v40  ;;  %6258 = vmatprep.mubr.msk.f32.mxu0 %vm6804_vm1, %v6803_v35 }
 0x57d   :  { %6268 = vmatpush3.msra.mxu1 %v7529_v41  ;;  %6269 = vmatprep.mubr.msk.f32.mxu1 %vm6804_vm1, %v6803_v35 }
 0x57e   :  { %6259 = vmatmul.mubr.msk.f32.vlgmr.msra.gmra.mxu0 %vm140_vm0, %v7683_v43  ;;  %6270 = vmatmul.mubr.msk.f32.vlgmr.msra.gmra.mxu1 %vm140_vm0, %v7683_v43 }
 0x57f   :  { %6272 = vmatprep.subr.mxu0 %v6803_v35  ;;  %6283 = vmatprep.subr.mxu1 %v6803_v35 }
 0x580   :  { %6273 = vmatpush3.msra.mxu0 %v7420_v44  ;;  %6284 = vmatpush3.msra.mxu1 %v7423_v45 }
 0x581   :  { %6274 = vmatprep.subr.mxu0 %v6803_v35  ;;  %6285 = vmatprep.subr.mxu1 %v6803_v35 }
 0x582   :  { %6275 = vmatpush3.msra.mxu0 %v7544_v49  ;;  %6286 = vmatpush3.msra.mxu1 %v7547_v50 }
 0x583   :  { %6276 = vmatprep.subr.mxu0 %v6803_v35  ;;  %6287 = vmatprep.subr.mxu1 %v6803_v35 }
 0x584   :  { %6277 = vmatpush3.msra.mxu0 %v7552_v51  ;;  %6288 = vmatpush3.msra.mxu1 %v7555_v52 }
 0x585   :  { %6278 = vmatprep.subr.mxu0 %v6803_v35  ;;  %6289 = vmatprep.subr.mxu1 %v6803_v35 }
 0x586   :  { %6279 = vmatpush3.msra.mxu0 %v7560_v53  ;;  %6290 = vmatpush3.msra.mxu1 %v7563_v54 }
 0x587   :  { %6280 = vmatprep.mubr.msk.f32.mxu0 %vm6804_vm1, %v6803_v35  ;;  %6291 = vmatprep.mubr.msk.f32.mxu1 %vm6804_vm1, %v6803_v35 }
 0x588   :  { %6294 = vmatprep.subr.mxu0 %v6803_v35  ;;  %6305 = vmatprep.subr.mxu1 %v6803_v35 }
 0x62b   :  { %v3428_v33 = vpop.f32.mrf.mxu0  ;;  %v3498_v34 = vpop.f32.mrf.mxu1 }
 0x62c   :  { %v3502_v60 = vadd.f32 %v3428_v33, %v3354_v29  ;;  %v3509_v17 = vadd.f32 %v3498_v34, %v3356_v12  ;;  %v7749_v29 = vld [vmem:[%s7988_s7 + $0x3] ss:$0 sm:$0xff] }
 0x62d   :  { %v6216_v10 = vpop.f32.mrf.mxu0  ;;  %v6227_v63 = vpop.f32.mrf.mxu1 }
 0x62e   :  { %v5375_v11 = vmul.f32 -1.442695, %v3502_v60  ;;  %v5376_v18 = vmul.f32 -1.442695, %v3509_v17  ;;  %v3597_v10 = vld [vmem:[#allocation7 + $0x10] sm:$0xff] }
 0x630   :  { %6558 = vpow2.f32 %v5375_v11 }
 0x634   :  { %v3582_v55 = vpop.f32.mrf.mxu0  ;;  %v3667_v57 = vpop.f32.mrf.mxu1 }
 0x635   :  { %v3741_v30 = vadd.f32 %v3667_v57, %v3593_v56  ;;  %v3583_v15 = vadd.f32 %v7743_v62, %v3582_v55 }
 0x636   :  { %v6238_v13 = vpop.f32.mrf.mxu0  ;;  %v6249_v14 = vpop.f32.mrf.mxu1 }
 0x637   :  { %v5380_v16 = vmul.f32 -1.442695, %v3741_v30 }
 0x639   :  { %6560 = vpow2.f32 %v5380_v16 }
 0x63a   :  { %6562 = vpow2.f32 %v5376_v18 }
 0x63d   :  { %v6559_v19 = vpop.eup %6558 }
 0x63e   :  { %v3506_v21 = vadd.f32 1.0, %v6559_v19  ;;  %v3737_v6 = vpop.f32.mrf.mxu0  ;;  %v3821_v22 = vpop.f32.mrf.mxu1 }
 0x63f   :  { %v3748_v25 = vadd.f32 %v3737_v6, %v3595_v24  ;;  %v3822_v33 = vadd.f32 %v7749_v29, %v3821_v22 }
 0x640   :  { %6564 = vrcp.f32 %v3506_v21  ;;  %v6260_v26 = vpop.f32.mrf.mxu0  ;;  %v6271_v27 = vpop.f32.mrf.mxu1  ;;  %v3838_v21 = vld [vmem:[#allocation3 + $0x30] sm:$0xff] }
 0x641   :  { %v5381_v28 = vmul.f32 -1.442695, %v3748_v25 }
 0x643   :  { %6566 = vpow2.f32 %v5381_v28 }
 0x646   :  { %v6561_v31 = vpop.eup %6560 }
 0x647   :  { %v3745_v32 = vadd.f32 1.0, %v6561_v31  ;;  %v6563_v58 = vpop.eup %6562 }
 0x648   :  { %v3513_v20 = vadd.f32 1.0, %v6563_v58  ;;  %v4077_v58 = vld [vmem:[#allocation6 + $0x8] sm:$0xff] }
 0x649   :  { %6568 = vrcp.f32 %v3745_v32 }
 0x64d   :  { %v6565_v61 = vpop.eup %6564 }
 0x64e   :  { %v3586_v1 = vmul.f32 %v6565_v61, %v3583_v15 }
 0x650   :  { %v3587_v4 = vadd.f32 %v3586_v1, %v3358_v23  ;;  %v6567_v5 = vpop.eup %6566 }
 0x651   :  { %v3752_v63 = vadd.f32 1.0, %v6567_v5 }
 0x652   :  { %6570 = vtanh.f32 %v3587_v4 }
 0x653   :  { %6572 = vrcp.f32 %v3513_v20 }
 0x656   :  { %v6569_v34 = vpop.eup %6568 }
 0x657   :  { %v3825_v60 = vmul.f32 %v6569_v34, %v3822_v33 }
 0x659   :  { %v3826_v11 = vadd.f32 %v3825_v60, %v3597_v10  ;;  %v3840_v10 = vld [vmem:[#allocation4 + $0x30] sm:$0xff] }
 0x65b   :  { %6574 = vtanh.f32 %v3826_v11 }
 0x65c   :  { %6576 = vrcp.f32 %v3752_v63 }
 0x65f   :  { %v6571_v55 = vpop.eup %6570 }
 0x660   :  { %v3589_v56 = vsub.f32 %v7659_v3, %v6571_v55  ;;  %v6573_v57 = vpop.eup %6572 }
 0x662   :  { %v3590_v30 = vmul.f32 %v6573_v57, %v3589_v56 }
 0x664   :  { %v7753_v12 = vadd.f32 %v6571_v55, %v3590_v30 }
 0x666   :  { %3832 = vst.msk [vmem:[#allocation8 + $0x28] sm:$0xff] %vm140_vm0, %v7753_v12  ;;  %6281 = vmatmul.mubr.msk.f32.vlgmr.msra.gmra.mxu0 %vm140_vm0, %v7753_v12  ;;  %6292 = vmatmul.mubr.msk.f32.vlgmr.msra.gmra.mxu1 %vm140_vm0, %v7753_v12 }
 0x667   :  { %6295 = vmatpush3.msra.mxu0 %v7455_v7  ;;  %6306 = vmatpush3.msra.mxu1 %v7458_v59 }
 0x668   :  { %v6575_v13 = vpop.eup %6574  ;;  %6296 = vmatprep.subr.mxu0 %v6803_v35  ;;  %6307 = vmatprep.subr.mxu1 %v6803_v35 }
 0x669   :  { %6297 = vmatpush3.msra.mxu0 %v7463_v8  ;;  %6308 = vmatpush3.msra.mxu1 %v7466_v9  ;;  %v3828_v3 = vsub.f32 %v7683_v43, %v6575_v13  ;;  %v6577_v14 = vpop.eup %6576 }
 0x66a   :  { %6298 = vmatprep.subr.mxu0 %v6803_v35  ;;  %6309 = vmatprep.subr.mxu1 %v6803_v35 }
 0x66b   :  { %6299 = vmatpush3.msra.mxu0 %v7472_v0  ;;  %6310 = vmatpush3.msra.mxu1 %v7475_v2  ;;  %v3829_v17 = vmul.f32 %v6577_v14, %v3828_v3 }
 0x66c   :  { %6300 = vmatprep.subr.mxu0 %v6803_v35  ;;  %6311 = vmatprep.subr.mxu1 %v6803_v35 }
 0x66d   :  { %6301 = vmatpush3.msra.mxu0 %v7480_v42  ;;  %6302 = vmatprep.mubr.msk.f32.mxu0 %vm6804_vm1, %v6803_v35  ;;  %v7777_v43 = vadd.f32 %v6575_v13, %v3829_v17  ;;  %v4079_v13 = vld [vmem:[#allocation7 + $0x8] sm:$0xff] }
 0x66e   :  { %6312 = vmatpush3.msra.mxu1 %v7487_v36  ;;  %6313 = vmatprep.mubr.msk.f32.mxu1 %vm6804_vm1, %v6803_v35 }
 0x66f   :  { %6303 = vmatmul.mubr.msk.f32.vlgmr.msra.gmra.mxu0 %vm140_vm0, %v7753_v12  ;;  %3834 = vst.msk [vmem:[#allocation9 + $0x10] sm:$0xff] %vm140_vm0, %v7777_v43  ;;  %6314 = vmatmul.mubr.msk.f32.vlgmr.msra.gmra.mxu1 %vm140_vm0, %v7777_v43 }
 0x670   :  { %6316 = vmatprep.subr.mxu0 %v6803_v35  ;;  %6327 = vmatprep.subr.mxu1 %v6803_v35 }
 0x671   :  { %6317 = vmatpush3.msra.mxu0 %v7500_v37  ;;  %6328 = vmatpush3.msra.mxu1 %v7503_v38 }
 0x672   :  { %6318 = vmatprep.subr.mxu0 %v6803_v35  ;;  %6329 = vmatprep.subr.mxu1 %v6803_v35 }
 0x673   :  { %6319 = vmatpush3.msra.mxu0 %v7508_v39  ;;  %6330 = vmatpush3.msra.mxu1 %v7511_v46 }
 0x674   :  { %6320 = vmatprep.subr.mxu0 %v6803_v35  ;;  %6331 = vmatprep.subr.mxu1 %v6803_v35 }
 0x675   :  { %6321 = vmatpush3.msra.mxu0 %v7516_v47  ;;  %6332 = vmatpush3.msra.mxu1 %v7519_v48 }
 0x676   :  { %6322 = vmatprep.subr.mxu0 %v6803_v35  ;;  %6333 = vmatprep.subr.mxu1 %v6803_v35 }
 0x677   :  { %6323 = vmatpush3.msra.mxu0 %v7524_v40  ;;  %6324 = vmatprep.mubr.msk.f32.mxu0 %vm6804_vm1, %v6803_v35 }
 0x678   :  { %6334 = vmatpush3.msra.mxu1 %v7529_v41  ;;  %6335 = vmatprep.mubr.msk.f32.mxu1 %vm6804_vm1, %v6803_v35 }
 0x679   :  { %6325 = vmatmul.mubr.msk.f32.vlgmr.msra.gmra.mxu0 %vm140_vm0, %v7777_v43  ;;  %6336 = vmatmul.mubr.msk.f32.vlgmr.msra.gmra.mxu1 %vm140_vm0, %v7777_v43 }
 0x67a   :  { %6338 = vmatprep.subr.mxu0 %v6803_v35  ;;  %6349 = vmatprep.subr.mxu1 %v6803_v35 }
 0x67b   :  { %6339 = vmatpush3.msra.mxu0 %v7420_v44  ;;  %6350 = vmatpush3.msra.mxu1 %v7423_v45  ;;  %v3836_v44 = vld [vmem:[#allocation2 + $0x30] sm:$0xff] }
 0x67c   :  { %6340 = vmatprep.subr.mxu0 %v6803_v35  ;;  %6351 = vmatprep.subr.mxu1 %v6803_v35 }
 0x67d   :  { %6341 = vmatpush3.msra.mxu0 %v7544_v49  ;;  %6352 = vmatpush3.msra.mxu1 %v7547_v50 }
 0x67e   :  { %6342 = vmatprep.subr.mxu0 %v6803_v35  ;;  %6353 = vmatprep.subr.mxu1 %v6803_v35 }
 0x67f   :  { %6343 = vmatpush3.msra.mxu0 %v7552_v51  ;;  %6354 = vmatpush3.msra.mxu1 %v7555_v52 }
 0x680   :  { %6344 = vmatprep.subr.mxu0 %v6803_v35  ;;  %6355 = vmatprep.subr.mxu1 %v6803_v35 }
 0x681   :  { %6345 = vmatpush3.msra.mxu0 %v7560_v53  ;;  %6356 = vmatpush3.msra.mxu1 %v7563_v54  ;;  %v4075_v54 = vld [vmem:[#allocation5 + $0x8] sm:$0xff] }
 0x682   :  { %6346 = vmatprep.mubr.msk.f32.mxu0 %vm6804_vm1, %v6803_v35  ;;  %6357 = vmatprep.mubr.msk.f32.mxu1 %vm6804_vm1, %v6803_v35 }
 0x683   :  { %6360 = vmatprep.subr.mxu0 %v6803_v35  ;;  %6371 = vmatprep.subr.mxu1 %v6803_v35 }
 0x726   :  { %v3910_v45 = vpop.f32.mrf.mxu0  ;;  %v3980_v49 = vpop.f32.mrf.mxu1 }
 0x727   :  { %v3984_v50 = vadd.f32 %v3910_v45, %v3836_v44  ;;  %v3991_v24 = vadd.f32 %v3980_v49, %v3838_v21 }
 0x728   :  { %v6282_v51 = vpop.f32.mrf.mxu0  ;;  %v6293_v52 = vpop.f32.mrf.mxu1 }
 0x729   :  { %v5385_v16 = vmul.f32 -1.442695, %v3984_v50  ;;  %v5386_v26 = vmul.f32 -1.442695, %v3991_v24 }
 0x72b   :  { %6578 = vpow2.f32 %v5385_v16  ;;  %v4799_v16 = vld [vmem:[#allocation8 + $0x20] sm:$0xff] }
 0x72f   :  { %v4064_v53 = vpop.f32.mrf.mxu0  ;;  %v4149_v18 = vpop.f32.mrf.mxu1 }
 0x730   :  { %v4223_v19 = vadd.f32 %v4149_v18, %v4075_v54  ;;  %v4065_v33 = vadd.f32 %v7743_v62, %v4064_v53  ;;  %v4800_v18 = vld [vmem:[#allocation8 + $0x28] sm:$0xff] }
 0x731   :  { %v6304_v6 = vpop.f32.mrf.mxu0  ;;  %v6315_v22 = vpop.f32.mrf.mxu1 }
 0x732   :  { %v5390_v25 = vmul.f32 -1.442695, %v4223_v19 }
 0x734   :  { %6580 = vpow2.f32 %v5390_v25  ;;  %v4882_v25 = vld [vmem:[#allocation19 + $0x18] sm:$0xff] }
 0x735   :  { %6582 = vpow2.f32 %v5386_v26  ;;  %v4881_v26 = vld [vmem:[#allocation19 + $0x10] sm:$0xff] }
 0x738   :  { %v6579_v27 = vpop.eup %6578 }
 0x739   :  { %v3988_v28 = vadd.f32 1.0, %v6579_v27  ;;  %v4219_v31 = vpop.f32.mrf.mxu0  ;;  %v4303_v32 = vpop.f32.mrf.mxu1  ;;  %v4880_v27 = vld [vmem:[#allocation19 + $0x8] sm:$0xff] }
 0x73a   :  { %v4230_v15 = vadd.f32 %v4219_v31, %v4077_v58  ;;  %v4304_v56 = vadd.f32 %v7749_v29, %v4303_v32  ;;  %v4318_v31 = vld [vmem:[#allocation2 + $0x38] sm:$0xff] }
 0x73b   :  { %6584 = vrcp.f32 %v3988_v28  ;;  %v6326_v61 = vpop.f32.mrf.mxu0  ;;  %v6337_v1 = vpop.f32.mrf.mxu1  ;;  %v4879_v28 = vld [vmem:[#allocation19] sm:$0xff] }
 0x73c   :  { %v5391_v23 = vmul.f32 -1.442695, %v4230_v15 }
 0x73e   :  { %6586 = vpow2.f32 %v5391_v23 }
 0x741   :  { %v6581_v20 = vpop.eup %6580 }
 0x742   :  { %v4227_v4 = vadd.f32 1.0, %v6581_v20  ;;  %v6583_v5 = vpop.eup %6582 }
 0x743   :  { %v3995_v63 = vadd.f32 1.0, %v6583_v5 }
 0x744   :  { %6588 = vrcp.f32 %v4227_v4  ;;  %v4556_v4 = vld [vmem:[#allocation5] sm:$0xff] }
 0x748   :  { %v6585_v34 = vpop.eup %6584 }
 0x749   :  { %v4068_v60 = vmul.f32 %v6585_v34, %v4065_v33  ;;  %v4320_v34 = vld [vmem:[#allocation3 + $0x38] sm:$0xff] }
 0x74b   :  { %v4069_v11 = vadd.f32 %v4068_v60, %v3840_v10  ;;  %v6587_v55 = vpop.eup %6586 }
 0x74c   :  { %v4234_v3 = vadd.f32 1.0, %v6587_v55 }
 0x74d   :  { %6590 = vtanh.f32 %v4069_v11 }
 0x74e   :  { %6592 = vrcp.f32 %v3995_v63 }
 0x751   :  { %v6589_v57 = vpop.eup %6588 }
 0x752   :  { %v4307_v30 = vmul.f32 %v6589_v57, %v4304_v56 }
 0x754   :  { %v4308_v14 = vadd.f32 %v4307_v30, %v4079_v13 }
 0x756   :  { %6594 = vtanh.f32 %v4308_v14 }
 0x757   :  { %6596 = vrcp.f32 %v4234_v3  ;;  %v4557_v3 = vld [vmem:[#allocation6] sm:$0xff] }
 0x75a   :  { %v6591_v17 = vpop.eup %6590 }
 0x75b   :  { %v4071_v44 = vsub.f32 %v7753_v12, %v6591_v17  ;;  %v6593_v45 = vpop.eup %6592 }
 0x75d   :  { %v4072_v49 = vmul.f32 %v6593_v45, %v4071_v44 }
 0x75f   :  { %v7837_v50 = vadd.f32 %v6591_v17, %v4072_v49 }
 0x761   :  { %4314 = vst.msk [vmem:[#allocation8 + $0x30] sm:$0xff] %vm140_vm0, %v7837_v50  ;;  %6347 = vmatmul.mubr.msk.f32.vlgmr.msra.gmra.mxu0 %vm140_vm0, %v7837_v50  ;;  %6358 = vmatmul.mubr.msk.f32.vlgmr.msra.gmra.mxu1 %vm140_vm0, %v7837_v50 }
 0x762   :  { %6361 = vmatpush3.msra.mxu0 %v7455_v7  ;;  %6372 = vmatpush3.msra.mxu1 %v7458_v59 }
 0x763   :  { %v6595_v51 = vpop.eup %6594  ;;  %6362 = vmatprep.subr.mxu0 %v6803_v35  ;;  %6373 = vmatprep.subr.mxu1 %v6803_v35 }
 0x764   :  { %6363 = vmatpush3.msra.mxu0 %v7463_v8  ;;  %6374 = vmatpush3.msra.mxu1 %v7466_v9  ;;  %v4310_v12 = vsub.f32 %v7777_v43, %v6595_v51  ;;  %v6597_v52 = vpop.eup %6596  ;;  %v7882_v8 = vpop.permute.xlu0 %4813  ;;  %v4795_v9 = vld [vmem:[#allocation8] sm:$0xff] }
 0x765   :  { %6364 = vmatprep.subr.mxu0 %v6803_v35  ;;  %6375 = vmatprep.subr.mxu1 %v6803_v35 }
 0x766   :  { %6365 = vmatpush3.msra.mxu0 %v7472_v0  ;;  %6376 = vmatpush3.msra.mxu1 %v7475_v2  ;;  %v4311_v7 = vmul.f32 %v6597_v52, %v4310_v12  ;;  %v4878_v0 = vld [vmem:[#allocation18 + $0x18] sm:$0xff]  ;;  %v4851_v2 = vmul.f32 %v7882_v8, %v4795_v9 }
 0x767   :  { %6366 = vmatprep.subr.mxu0 %v6803_v35  ;;  %6377 = vmatprep.subr.mxu1 %v6803_v35 }
 0x768   :  { %6367 = vmatpush3.msra.mxu0 %v7480_v42  ;;  %6368 = vmatprep.mubr.msk.f32.mxu0 %vm6804_vm1, %v6803_v35  ;;  %v7861_v59 = vadd.f32 %v6595_v51, %v4311_v7  ;;  %v4877_v42 = vld [vmem:[#allocation18 + $0x10] sm:$0xff] }
 0x769   :  { %6378 = vmatpush3.msra.mxu1 %v7487_v36  ;;  %6379 = vmatprep.mubr.msk.f32.mxu1 %vm6804_vm1, %v6803_v35  ;;  %v7900_v36 = vpop.permute.xlu1 %4823  ;;  %v4801_v19 = vld [vmem:[#allocation8 + $0x30] sm:$0xff] }
 0x76a   :  { %6369 = vmatmul.mubr.msk.f32.vlgmr.msra.gmra.mxu0 %vm140_vm0, %v7837_v50  ;;  %4316 = vst.msk [vmem:[#allocation9 + $0x8] sm:$0xff] %vm140_vm0, %v7861_v59  ;;  %6380 = vmatmul.mubr.msk.f32.vlgmr.msra.gmra.mxu1 %vm140_vm0, %v7861_v59 }
 0x76b   :  { %6382 = vmatprep.subr.mxu0 %v6803_v35  ;;  %6393 = vmatprep.subr.mxu1 %v6803_v35 }
 0x76c   :  { %6383 = vmatpush3.msra.mxu0 %v7500_v37  ;;  %6394 = vmatpush3.msra.mxu1 %v7503_v38  ;;  %v4876_v37 = vld [vmem:[#allocation18 + $0x8] sm:$0xff]  ;;  %v7902_v38 = vpop.permute.xlu0 %4818 }
 0x76d   :  { %6384 = vmatprep.subr.mxu0 %v6803_v35  ;;  %6395 = vmatprep.subr.mxu1 %v6803_v35 }
 0x76e   :  { %6385 = vmatpush3.msra.mxu0 %v7508_v39  ;;  %6396 = vmatpush3.msra.mxu1 %v7511_v46  ;;  %v4796_v39 = vld [vmem:[#allocation8 + $0x8] sm:$0xff]  ;;  %v4797_v46 = vld [vmem:[#allocation8 + $0x10] sm:$0xff] }
 0x76f   :  { %6386 = vmatprep.subr.mxu0 %v6803_v35  ;;  %6397 = vmatprep.subr.mxu1 %v6803_v35 }
 0x770   :  { %6387 = vmatpush3.msra.mxu0 %v7516_v47  ;;  %6398 = vmatpush3.msra.mxu1 %v7519_v48  ;;  %v4852_v47 = vmul.f32 %v7902_v38, %v4796_v39  ;;  %v7905_v48 = vpop.permute.xlu1 %4828  ;;  %v7908_v43 = vpop.permute.xlu0 %4833 }
 0x771   :  { %6388 = vmatprep.subr.mxu0 %v6803_v35  ;;  %6399 = vmatprep.subr.mxu1 %v6803_v35  ;;  %v4855_v54 = vmul.f32 %v7908_v43, %v4799_v16 }
 0x772   :  { %6389 = vmatpush3.msra.mxu0 %v7524_v40  ;;  %6390 = vmatprep.mubr.msk.f32.mxu0 %vm6804_vm1, %v6803_v35  ;;  %v4853_v40 = vmul.f32 %v7900_v36, %v4797_v46 }
 0x773   :  { %6400 = vmatpush3.msra.mxu1 %v7529_v41  ;;  %6401 = vmatprep.mubr.msk.f32.mxu1 %vm6804_vm1, %v6803_v35  ;;  %v4875_v35 = vld [vmem:[#allocation18] sm:$0xff]  ;;  %v4798_v41 = vld [vmem:[#allocation8 + $0x18] sm:$0xff] }
 0x774   :  { %6391 = vmatmul.mubr.msk.f32.vlgmr.msra.gmra.mxu0 %vm140_vm0, %v7861_v59  ;;  %6402 = vmatmul.mubr.msk.f32.vlgmr.msra.gmra.mxu1 %vm140_vm0, %v7861_v59  ;;  %v4854_v53 = vmul.f32 %v7905_v48, %v4798_v41  ;;  %v7915_v21 = vpop.permute.xlu1 %4838  ;;  %v7918_v6 = vpop.permute.xlu0 %4843 }
 0x775   :  { %6424 = vmatprep.subr.mxu1 %v4878_v0  ;;  %6432 = vmatprep.mubr.msk.f32.mxu1 %vm140_vm0, %v4851_v2  ;;  %v4856_v22 = vmul.f32 %v7915_v21, %v4800_v18  ;;  %v4857_v24 = vmul.f32 %v7918_v6, %v4801_v19 }
 0x776   :  { %6425 = vmatpush3.msra.mxu1 %v4878_v0  ;;  %6404 = vmatprep.subr.mxu0 %v4882_v25  ;;  %v4322_v0 = vld [vmem:[#allocation4 + $0x38] sm:$0xff] }
 0x777   :  { %6426 = vmatprep.subr.mxu1 %v4877_v42  ;;  %6405 = vmatpush3.msra.mxu0 %v4882_v25 }
 0x778   :  { %6427 = vmatpush3.msra.mxu1 %v4877_v42  ;;  %6406 = vmatprep.subr.mxu0 %v4881_v26  ;;  %v4849_v25 = vpop.permute.xlu1 %4848 }
 0x779   :  { %6428 = vmatprep.subr.mxu1 %v4876_v37  ;;  %6407 = vmatpush3.msra.mxu0 %v4881_v26 }
 0x77a   :  { %6429 = vmatpush3.msra.mxu1 %v4876_v37  ;;  %6408 = vmatprep.subr.mxu0 %v4880_v27 }
 0x77b   :  { %6430 = vmatprep.subr.mxu1 %v4875_v35  ;;  %6409 = vmatpush3.msra.mxu0 %v4880_v27 }
 0x77c   :  { %6431 = vmatpush3.msra.mxu1 %v4875_v35  ;;  %6410 = vmatprep.subr.mxu0 %v4879_v28 }
 0x77d   :  { %6433 = vmatmul.mubr.msk.f32.vlgmr.msra.gmra.mxu1 %vm140_vm0, %v4852_v47  ;;  %6411 = vmatpush3.msra.mxu0 %v4879_v28  ;;  %v4558_v47 = vld [vmem:[#allocation7] sm:$0xff] }
 0x77e   :  { %6435 = vmatprep.mubr.msk.f32.mxu1 %vm140_vm0, %v4853_v40 }
 0x781   :  { %6436 = vmatmul.mubr.msk.f32.gmra.mxu1 %vm140_vm0, %v4854_v53 }
 0x782   :  { %6438 = vmatprep.mubr.msk.f32.mxu1 %vm140_vm0, %v4855_v54 }
 0x785   :  { %6439 = vmatmul.mubr.msk.f32.gmra.mxu1 %vm140_vm0, %v4856_v22 }
 0x786   :  { %6441 = vmatprep.mubr.msk.f32.mxu1 %vm140_vm0, %v4857_v24 }
 0x821   :  { %v4392_v32 = vpop.f32.mrf.mxu0  ;;  %v4462_v58 = vpop.f32.mrf.mxu1 }
 0x822   :  { %v4466_v15 = vadd.f32 %v4392_v32, %v4318_v31  ;;  %v4473_v63 = vadd.f32 %v4462_v58, %v4320_v34  ;;  %v4860_v31 = vld [vmem:[#allocation9 + $0x8] sm:$0xff]  ;;  %v4861_v32 = vld [vmem:[#allocation9 + $0x10] sm:$0xff]  ;;  %v5156_v34 = vlaneseq }
 0x823   :  { %v6348_v61 = vpop.f32.mrf.mxu0  ;;  %v6359_v1 = vpop.f32.mrf.mxu1 }
 0x824   :  { %v5395_v23 = vmul.f32 -1.442695, %v4466_v15  ;;  %v5396_v55 = vmul.f32 -1.442695, %v4473_v63  ;;  %v4868_v15 = vmul.f32 %v4860_v31, %v7902_v38  ;;  %v4862_v61 = vld [vmem:[#allocation9 + $0x18] sm:$0xff]  ;;  %v4863_v1 = vld [vmem:[#allocation9 + $0x20] sm:$0xff] }
 0x825   :  { %v4866_v38 = vld [vmem:[#allocation9 + $0x38] sm:$0xff] }
 0x826   :  { %6598 = vpow2.f32 %v5395_v23  ;;  %v4870_v23 = vmul.f32 %v4862_v61, %v7905_v48 }
 0x82a   :  { %v4546_v20 = vpop.f32.mrf.mxu0  ;;  %v4628_v5 = vpop.f32.mrf.mxu1 }
 0x82b   :  { %v4702_v33 = vadd.f32 %v4628_v5, %v4556_v4  ;;  %v4547_v52 = vadd.f32 %v7743_v62, %v4546_v20  ;;  %v4871_v20 = vmul.f32 %v4863_v1, %v7908_v43  ;;  %v4864_v4 = vld [vmem:[#allocation9 + $0x28] sm:$0xff]  ;;  %v4865_v5 = vld [vmem:[#allocation9 + $0x30] sm:$0xff] }
 0x82c   :  { %v6370_v60 = vpop.f32.mrf.mxu0  ;;  %v6381_v10 = vpop.f32.mrf.mxu1 }
 0x82d   :  { %v5400_v11 = vmul.f32 -1.442695, %v4702_v33  ;;  %v4874_v33 = vmul.f32 %v4866_v38, %v4849_v25  ;;  %v7946_v10 = vshrl.u32 %v5156_v34, 7 }
 0x82f   :  { %6600 = vpow2.f32 %v5400_v11  ;;  %vm5158_vm2 = vcmp.lt.s32.totalorder %v7946_v10, 4 }
 0x830   :  { %6602 = vpow2.f32 %v5396_v55 }
 0x833   :  { %v6599_v56 = vpop.eup %6598 }
 0x834   :  { %v4470_v57 = vadd.f32 1.0, %v6599_v56  ;;  %v4698_v30 = vpop.f32.mrf.mxu0  ;;  %v4782_v13 = vpop.f32.mrf.mxu1 }
 0x835   :  { %v4709_v14 = vadd.f32 %v4698_v30, %v4557_v3  ;;  %v4783_v39 = vadd.f32 %v7749_v29, %v4782_v13 }
 0x836   :  { %6604 = vrcp.f32 %v4470_v57  ;;  %v6392_v17 = vpop.f32.mrf.mxu0  ;;  %v6403_v44 = vpop.f32.mrf.mxu1 }
 0x837   :  { %v5401_v45 = vmul.f32 -1.442695, %v4709_v14 }
 0x839   :  { %6606 = vpow2.f32 %v5401_v45 }
 0x83c   :  { %v6601_v49 = vpop.eup %6600 }
 0x83d   :  { %v4706_v51 = vadd.f32 1.0, %v6601_v49  ;;  %v6603_v12 = vpop.eup %6602  ;;  %v6434_v48 = vpop.f32.mrf.mxu1 }
 0x83e   :  { %v4477_v2 = vadd.f32 1.0, %v6603_v12 }
 0x83f   :  { %6608 = vrcp.f32 %v4706_v51  ;;  %v5102_v43 = vpop.f32.mrf.mxu1 }
 0x841   :  { %v6437_v60 = vpop.f32.mrf.mxu1 }
 0x843   :  { %v6605_v7 = vpop.eup %6604  ;;  %v5112_v11 = vpop.f32.mrf.mxu1 }
 0x844   :  { %v4550_v9 = vmul.f32 %v6605_v7, %v4547_v52 }
 0x845   :  { %v6440_v13 = vpop.f32.mrf.mxu1 }
 0x846   :  { %v4551_v42 = vadd.f32 %v4550_v9, %v4322_v0  ;;  %v6607_v37 = vpop.eup %6606 }
 0x847   :  { %v4713_v40 = vadd.f32 1.0, %v6607_v37  ;;  %v5122_v0 = vpop.f32.mrf.mxu1 }
 0x848   :  { %6610 = vtanh.f32 %v4551_v42 }
 0x849   :  { %6612 = vrcp.f32 %v4477_v2 }
 0x84c   :  { %v6609_v35 = vpop.eup %6608 }
 0x84d   :  { %v4786_v46 = vmul.f32 %v6609_v35, %v4783_v39 }
 0x84f   :  { %v4787_v41 = vadd.f32 %v4786_v46, %v4558_v47 }
 0x851   :  { %6614 = vtanh.f32 %v4787_v41 }
 0x852   :  { %6616 = vrcp.f32 %v4713_v40 }
 0x855   :  { %v6611_v16 = vpop.eup %6610 }
 0x856   :  { %v4553_v62 = vsub.f32 %v7837_v50, %v6611_v16  ;;  %v6613_v53 = vpop.eup %6612 }
 0x858   :  { %v4554_v54 = vmul.f32 %v6613_v53, %v4553_v62 }
 0x85a   :  { %v4555_v18 = vadd.f32 %v6611_v16, %v4554_v54 }
 0x85c   :  { %4793 = vst.msk [vmem:[#allocation8 + $0x38] sm:$0xff] %vm140_vm0, %v4555_v18 }
 0x85e   :  { %v6615_v19 = vpop.eup %6614 }
 0x85f   :  { %v4789_v22 = vsub.f32 %v7861_v59, %v6615_v19  ;;  %v6617_v24 = vpop.eup %6616  ;;  %v4869_v59 = vmul.f32 %v4861_v32, %v7900_v36  ;;  %v4873_v36 = vmul.f32 %v4865_v5, %v7918_v6 }
 0x861   :  { %v4790_v29 = vmul.f32 %v6617_v24, %v4789_v22 }
 0x863   :  { %v4791_v26 = vadd.f32 %v6615_v19, %v4790_v29  ;;  %v4802_v27 = vld [vmem:[#allocation8 + $0x38] sm:$0xff] }
 0x864   :  { %v4858_v28 = vmul.f32 %v4849_v25, %v4802_v27 }
 0x865   :  { %4794 = vst.msk [vmem:[#allocation9] sm:$0xff] %vm140_vm0, %v4791_v26 }
 0x866   :  { %6442 = vmatmul.mubr.msk.f32.gmra.mxu1 %vm140_vm0, %v4858_v28 }
 0x86c   :  { %v4859_v50 = vld [vmem:[#allocation9] sm:$0xff] }
 0x86d   :  { %v4867_v58 = vmul.f32 %v4859_v50, %v7882_v8  ;;  %v4872_v8 = vmul.f32 %v4864_v4, %v7915_v21  ;;  %v5419_v21 = vld [vmem:[%s7991_s10] ss:$0 sm:$0xff]  ;;  %s6805_s10 = smov [#allocation21]  }
 0x86e   :  { %s5255_s27 = sshll.u32 %s6805_s10, 4  ;;  %s5256_s27 = int_to_ptr.vmem [resolvable:$true] %s5255_s27 }
 0x86f   :  { %6412 = vmatprep.mubr.msk.f32.mxu0 %vm140_vm0, %v4867_v58  ;;  %s6764_s8 = scalar_lea.vmem %s5256_s27, 128  ;;  %p6769_p3 = scmp.lt.s32.totalorder %s5256_s27, %s5256_s27 }
 0x870   :  { %6413 = vmatmul.mubr.msk.f32.vlgmr.msra.gmra.mxu0 %vm140_vm0, %v4868_v15  ;;  %p6765_p2 = scmp.ne.s32.totalorder %s5256_s27, %s6764_s8  ;;  %p6770_p4 = scmp.lt.s32.totalorder %s6764_s8, %s6764_s8 }
 0x871   :  { %6415 = vmatprep.mubr.msk.f32.mxu0 %vm140_vm0, %v4869_v59 }
 0x872   :  { %p6771_p5 = por %p6770_p4, %p6769_p3 }
 0x874   :  { %6416 = vmatmul.mubr.msk.f32.gmra.mxu0 %vm140_vm0, %v4870_v23  ;;  %p6772_p6 = pnand %p6771_p5, %p6765_p2 }
 0x875   :  { %6418 = vmatprep.mubr.msk.f32.mxu0 %vm140_vm0, %v4871_v20 }
 0x878   :  { %6419 = vmatmul.mubr.msk.f32.gmra.mxu0 %vm140_vm0, %v4872_v8 }
 0x879   :  { %6421 = vmatprep.mubr.msk.f32.mxu0 %vm140_vm0, %v4873_v36 }
 0x87c   :  { %6422 = vmatmul.mubr.msk.f32.gmra.mxu0 %vm140_vm0, %v4874_v33 }
 0x926   :  { %v6443_v40 = vpop.f32.mrf.mxu1 }
 0x928   :  { %v5132_v50 = vpop.f32.mrf.mxu1 }
 0x930   :  { %v6414_v63 = vpop.f32.mrf.mxu0 }
 0x931   :  { %v5108_v6 = vadd.f32 %v6434_v48, %v6414_v63 }
 0x932   :  { %v4973_v55 = vpop.f32.mrf.mxu0 }
 0x933   :  { %v5149_v56 = vadd.f32 %v5419_v21, %v5108_v6  ;;  %v5103_v57 = vadd.f32 %v5102_v43, %v4973_v55 }
 0x934   :  { %v6417_v30 = vpop.f32.mrf.mxu0 }
 0x935   :  { %v5162_v3 = vsel %vm5158_vm2, %v5149_v56, -3.4028235e+38  ;;  %v5148_v14 = vadd.f32 %v5419_v21, %v5103_v57  ;;  %v5118_v17 = vadd.f32 %v6437_v60, %v6417_v30 }
 0x936   :  { %v5176_v44 = vsel %vm140_vm0, %v5162_v3, -inf  ;;  %v4983_v45 = vpop.f32.mrf.mxu0 }
 0x937   :  { %v5177_v49 = vrot.slane %v5176_v44, 4  ;;  %v5161_v51 = vsel %vm5158_vm2, %v5148_v14, -3.4028235e+38  ;;  %v5151_v12 = vadd.f32 %v5419_v21, %v5118_v17  ;;  %v5113_v52 = vadd.f32 %v5112_v11, %v4983_v45 }
 0x938   :  { %v5169_v7 = vsel %vm140_vm0, %v5161_v51, -inf  ;;  %v6420_v9 = vpop.f32.mrf.mxu0 }
 0x939   :  { %v5178_v2 = vmax.f32 %v5176_v44, %v5177_v49  ;;  %v5170_v42 = vrot.slane %v5169_v7, 4  ;;  %v5164_v37 = vsel %vm5158_vm2, %v5151_v12, -3.4028235e+38  ;;  %v5150_v39 = vadd.f32 %v5419_v21, %v5113_v52 }
 0x93a   :  { %v5190_v35 = vsel %vm140_vm0, %v5164_v37, -inf  ;;  %v5128_v46 = vadd.f32 %v6440_v13, %v6420_v9  ;;  %v4993_v47 = vpop.f32.mrf.mxu0 }
 0x93b   :  { %v5179_v41 = vrot.slane %v5178_v2, 2  ;;  %v5171_v16 = vmax.f32 %v5169_v7, %v5170_v42  ;;  %v5191_v62 = vrot.slane %v5190_v35, 4  ;;  %v5163_v53 = vsel %vm5158_vm2, %v5150_v39, -3.4028235e+38 }
 0x93c   :  { %v5183_v54 = vsel %vm140_vm0, %v5163_v53, -inf  ;;  %v5153_v18 = vadd.f32 %v5419_v21, %v5128_v46  ;;  %v5123_v19 = vadd.f32 %v5122_v0, %v4993_v47  ;;  %v6423_v22 = vpop.f32.mrf.mxu0 }
 0x93d   :  { %v5172_v24 = vrot.slane %v5171_v16, 2  ;;  %v5192_v29 = vmax.f32 %v5190_v35, %v5191_v62  ;;  %v5184_v25 = vrot.slane %v5183_v54, 4  ;;  %v5138_v28 = vadd.f32 %v6443_v40, %v6423_v22 }
 0x93e   :  { %v5166_v26 = vsel %vm5158_vm2, %v5153_v18, -3.4028235e+38  ;;  %v5152_v27 = vadd.f32 %v5419_v21, %v5123_v19  ;;  %v5003_v31 = vpop.f32.mrf.mxu0  ;;  %v5180_v32 = vmax.f32 %v5178_v2, %v5179_v41 }
 0x93f   :  { %v5173_v58 = vmax.f32 %v5171_v16, %v5172_v24  ;;  %v5193_v15 = vrot.slane %v5192_v29, 2  ;;  %v5185_v59 = vmax.f32 %v5183_v54, %v5184_v25  ;;  %v5204_v61 = vsel %vm140_vm0, %v5166_v26, -inf }
 0x940   :  { %v5165_v1 = vsel %vm5158_vm2, %v5152_v27, -3.4028235e+38  ;;  %v5155_v23 = vadd.f32 %v5419_v21, %v5138_v28  ;;  %v5133_v20 = vadd.f32 %v5132_v50, %v5003_v31  ;;  %v5205_v8 = vrot.slane %v5204_v61, 4 }
 0x941   :  { %v5174_v4 = vrot.slane %v5173_v58, 1  ;;  %v5186_v5 = vrot.slane %v5185_v59, 2  ;;  %v5197_v38 = vsel %vm140_vm0, %v5165_v1, -inf  ;;  %v5181_v48 = vrot.slane %v5180_v32, 1 }
 0x942   :  { %v5168_v36 = vsel %vm5158_vm2, %v5155_v23, -3.4028235e+38  ;;  %v5154_v33 = vadd.f32 %v5419_v21, %v5133_v20  ;;  %v5198_v34 = vrot.slane %v5197_v38, 4  ;;  %v5194_v60 = vmax.f32 %v5192_v29, %v5193_v15 }
 0x943   :  { %v5187_v43 = vmax.f32 %v5185_v59, %v5186_v5  ;;  %v5206_v63 = vmax.f32 %v5204_v61, %v5205_v8  ;;  %v5218_v11 = vsel %vm140_vm0, %v5168_v36, -inf  ;;  %v5175_v57 = vmax.f32 %v5173_v58, %v5174_v4 }
 0x944   :  { %v5167_v6 = vsel %vm5158_vm2, %v5154_v33, -3.4028235e+38  ;;  %v5199_v56 = vmax.f32 %v5197_v38, %v5198_v34  ;;  %v5219_v13 = vrot.slane %v5218_v11, 4  ;;  %v5182_v44 = vmax.f32 %v5180_v32, %v5181_v48 }
 0x945   :  { %v5188_v55 = vrot.slane %v5187_v43, 1  ;;  %v5207_v30 = vrot.slane %v5206_v63, 2  ;;  %v5211_v3 = vsel %vm140_vm0, %v5167_v6, -inf  ;;  %v5195_v45 = vrot.slane %v5194_v60, 1 }
 0x946   :  { %v5200_v21 = vrot.slane %v5199_v56, 2  ;;  %v5212_v17 = vrot.slane %v5211_v3, 4  ;;  %v5220_v51 = vmax.f32 %v5218_v11, %v5219_v13  ;;  %v5234_v10 = vsel %vm5233_vm3, %v5182_v44, %v5175_v57 }
 0x947   :  { %v5189_v14 = vmax.f32 %v5187_v43, %v5188_v55  ;;  %v5208_v49 = vmax.f32 %v5206_v63, %v5207_v30  ;;  %v5196_v42 = vmax.f32 %v5194_v60, %v5195_v45 }
 0x948   :  { %v5201_v12 = vmax.f32 %v5199_v56, %v5200_v21  ;;  %v5213_v52 = vmax.f32 %v5211_v3, %v5212_v17  ;;  %v5221_v7 = vrot.slane %v5220_v51, 2 }
 0x949   :  { %v5236_v9 = vsel %vm5235_vm4, %v5189_v14, %v5234_v10  ;;  %v5209_v37 = vrot.slane %v5208_v49, 1 }
 0x94a   :  { %v5202_v0 = vrot.slane %v5201_v12, 1  ;;  %v5214_v2 = vrot.slane %v5213_v52, 2  ;;  %v5222_v39 = vmax.f32 %v5220_v51, %v5221_v7  ;;  %v5238_v40 = vsel %vm5237_vm5, %v5196_v42, %v5236_v9 }
 0x94b   :  { %v5210_v62 = vmax.f32 %v5208_v49, %v5209_v37 }
 0x94c   :  { %v5203_v35 = vmax.f32 %v5201_v12, %v5202_v0  ;;  %v5215_v46 = vmax.f32 %v5213_v52, %v5214_v2  ;;  %v5223_v47 = vrot.slane %v5222_v39, 1 }
 0x94e   :  { %v5216_v41 = vrot.slane %v5215_v46, 1  ;;  %v5240_v16 = vsel %vm5239_vm6, %v5203_v35, %v5238_v40  ;;  %v5224_v54 = vmax.f32 %v5222_v39, %v5223_v47 }
 0x94f   :  { %v5242_v18 = vsel %vm5241_vm7, %v5210_v62, %v5240_v16 }
 0x950   :  { %v5217_v53 = vmax.f32 %v5215_v46, %v5216_v41 }
 0x952   :  { %v5244_v19 = vsel %vm5243_vm8, %v5217_v53, %v5242_v18 }
 0x953   :  { %v5246_v22 = vsel %vm5245_vm9, %v5224_v54, %v5244_v19 }
 0x954   :  { %5248 = vst.msk [vmem:[#allocation21] sm:$0xff] %vm140_vm0, %v5246_v22 }
 0x955   :  { %6775 = shalt.err (!%p6772_p6)
}
 0x956   :  { %5258 = dma.vmem_to_hbm [thread:$0]  %s5256_s27, 128, %s7992_s11, [#allocation12]  }
 0x957   :  { %6792 = dma.done.wait [#allocation12], 128  }
 0x958   :  { %6793 = vsyncadd [#allocation12], 4294967168 }
 0x959   :  { %5262 = vsyncpa [#allocation11], 1 }
 0x95a   :  { %5263 = vsyncpa [#allocation14], 1 }
 0x95b   :  { %5264 = vsyncpa [#allocation17], 1 }
 0x95c   :  { %5265 = vsyncpa [#allocation20], 1 }
 0x95d   :  { %5266 = vsyncpa [#allocation12], 1 }

</bundles_post_ra>
